<compile_context>
chip_gen: v5e
topology: v5e:2x2
jax: 0.10.0
libtpu: 0.0.40
codegen_flags: <defaults>
</compile_context>

<pallas_src>
import functools

import jax
import jax.numpy as jnp
from jax.experimental import pallas as pl
from jax.experimental.pallas import tpu as pltpu


def _encoder_kernel(tok_ref, emb_ref,
                    w1_ref, b1_ref, w2_ref, b2_ref, w3_ref, b3_ref,
                    wh_ref, bh_ref,
                    out_ref):
    # tok_ref : (TB*L, 1) int32   TB sequences per grid step, flattened rows
    # emb_ref : (V, E)            embedding table (cdtype)
    # wN_ref  : (K, Cin, Cout)    conv weights (cdtype);  bN_ref : (1, Cout) f32
    # wh_ref  : (10, OUT_W)       fused, zero-padded mu|logvar head (cdtype)
    # bh_ref  : (1, OUT_W) f32
    # out_ref : (TB, OUT_W) f32   lane-dense (OUT_W is a multiple of 128)
    TB = out_ref.shape[0]
    R = tok_ref.shape[0]                 # TB * L
    L = R // TB
    V, E = emb_ref.shape
    cdtype = emb_ref.dtype               # MXU operand dtype (f32 or bf16)

    # ---- Embedding: one-hot @ table (padding_idx row of the table is zero).
    # Chunked over rows so the (rows, V) one-hot intermediate stays bounded
    # when TB*L is large.
    tok = tok_ref[...]                                          # (R, 1) int32
    chunk = min(R, 2048)
    parts = []
    for r0 in range(0, R, chunk):
        t_chunk = tok[r0:r0 + chunk, :]                         # (c, 1)
        iota_v = jax.lax.broadcasted_iota(jnp.int32, (t_chunk.shape[0], V), 1)
        onehot = (t_chunk == iota_v).astype(cdtype)             # exact in bf16
        parts.append(jnp.dot(onehot, emb_ref[...],
                             preferred_element_type=jnp.float32))
    h = parts[0] if len(parts) == 1 else jnp.concatenate(parts, axis=0)  # (R, E) f32

    def shift_L(x3, s):
        # x3: (TB, L, C); returns y with y[:, l, :] = x3[:, l+s, :], zeros
        # outside [0, L).  Per-sequence shift -> no cross-sequence bleed.
        if s == 0:
            return x3
        C = x3.shape[2]
        z = jnp.zeros((TB, abs(s), C), x3.dtype)
        if s > 0:
            return jnp.concatenate([x3[:, s:, :], z], axis=1)
        return jnp.concatenate([z, x3[:, :L + s, :]], axis=1)

    def conv_relu(h2, w_ref, b_ref, pad):
        # h2: (R, Cin) f32.  K shifted matmuls accumulated in f32 (no scratch,
        # no masked stores, no lane-offset concatenation).
        K, Cin, Cout = w_ref.shape
        x3 = h2.reshape(TB, L, Cin)
        acc = jnp.zeros((R, Cout), jnp.float32)
        for t in range(K):
            lhs = shift_L(x3, t - pad).reshape(R, Cin).astype(cdtype)
            acc = acc + jnp.dot(lhs, w_ref[t],
                                preferred_element_type=jnp.float32)
        return jnp.maximum(acc + b_ref[...], 0.0)               # (R, Cout) f32

    h = conv_relu(h, w1_ref, b1_ref, pad=4)                     # (R, 9)
    h = conv_relu(h, w2_ref, b2_ref, pad=4)                     # (R, 9)
    h = conv_relu(h, w3_ref, b3_ref, pad=5)                     # (R, 10)

    # Global max pool over the sequence.
    pooled = jnp.max(h.reshape(TB, L, h.shape[1]), axis=1)      # (TB, 10)

    # Fused (mu | logvar) head: one matmul, one lane-dense (TB, OUT_W) store.
    out_ref[...] = (jnp.dot(pooled.astype(cdtype), wh_ref[...],
                            preferred_element_type=jnp.float32) + bh_ref[...])


@functools.partial(jax.jit, static_argnames=("block_b", "use_bf16"))
def encoder_forward(tokens, params, *, block_b=128, use_bf16=True):
    """tokens: (B, L) int tokens. Returns (mu, logvar), each (B, D) f32.

    block_b: sequences per grid step (amortizes ~0.35us/step overhead; for
    v7x megacore pick block_b so B_pad/block_b >= 2).  use_bf16: cast MXU
    operands to bf16 (f32 accumulation); elementwise work stays f32.
    """
    (emb, w1, b1, w2, b2, w3, b3, wmu, bmu, wlv, blv) = params
    B, L = tokens.shape
    D = wmu.shape[1]

    # Sequences per grid step: multiple of 8, clamped to the (8-aligned) batch.
    TB = min(block_b, pl.cdiv(B, 8) * 8)
    TB = max(8, (TB // 8) * 8)
    B_pad = pl.cdiv(B, TB) * TB

    cdtype = jnp.bfloat16 if use_bf16 else jnp.float32

    tok = tokens.astype(jnp.int32)
    if B_pad != B:
        tok = jnp.pad(tok, ((0, B_pad - B), (0, 0)))
    tok_flat = tok.reshape(B_pad * L, 1)

    # Fused mu|logvar head, zero-padded to a lane-dense (>=128) column count.
    OUT_W = max(128, pl.cdiv(2 * D, 128) * 128)
    wh = jnp.zeros((10, OUT_W), jnp.float32)
    wh = wh.at[:, :D].set(wmu).at[:, D:2 * D].set(wlv)
    bh = jnp.zeros((1, OUT_W), jnp.float32)
    bh = bh.at[:, :D].set(bmu).at[:, D:2 * D].set(blv)

    emb_c = emb.astype(cdtype)
    w1_c = w1.astype(cdtype)
    w2_c = w2.astype(cdtype)
    w3_c = w3.astype(cdtype)
    wh_c = wh.astype(cdtype)

    def full(a):
        return pl.BlockSpec(a.shape, lambda i: (0,) * a.ndim)

    grid_spec = pltpu.PrefetchScalarGridSpec(
        num_scalar_prefetch=0,
        grid=(B_pad // TB,),
        in_specs=[
            pl.BlockSpec((TB * L, 1), lambda i: (i, 0)),        # tokens
            full(emb_c),
            full(w1_c), full(b1),
            full(w2_c), full(b2),
            full(w3_c), full(b3),
            full(wh_c), full(bh),
        ],
        out_specs=pl.BlockSpec((TB, OUT_W), lambda i: (i, 0)),
    )

    out = pl.pallas_call(
        _encoder_kernel,
        out_shape=jax.ShapeDtypeStruct((B_pad, OUT_W), jnp.float32),
        grid_spec=grid_spec,
        compiler_params=pltpu.CompilerParams(
            dimension_semantics=("parallel",),
            vmem_limit_bytes=32 * 1024 * 1024),
    )(tok_flat, emb_c, w1_c, b1, w2_c, b2, w3_c, b3, wh_c, bh)

    mu = out[:B, :D]
    logvar = out[:B, D:2 * D]
    return mu, logvar


def init_params(key, vocab_size, embed_size, latent_dim, pad_token_idx):
    ks = jax.random.split(key, 11)
    scale = 0.1
    emb = scale * jax.random.normal(ks[0], (vocab_size, embed_size), jnp.float32)
    emb = emb.at[pad_token_idx].set(0.0)            # padding_idx row is zero
    # conv weights in kernel layout (K, Cin, Cout)  (torch: (Cout, Cin, K))
    w1 = scale * jax.random.normal(ks[1], (9, embed_size, 9), jnp.float32)
    b1 = scale * jax.random.normal(ks[2], (1, 9), jnp.float32)
    w2 = scale * jax.random.normal(ks[3], (9, 9, 9), jnp.float32)
    b2 = scale * jax.random.normal(ks[4], (1, 9), jnp.float32)
    w3 = scale * jax.random.normal(ks[5], (11, 9, 10), jnp.float32)
    b3 = scale * jax.random.normal(ks[6], (1, 10), jnp.float32)
    wmu = scale * jax.random.normal(ks[7], (10, latent_dim), jnp.float32)
    bmu = scale * jax.random.normal(ks[8], (1, latent_dim), jnp.float32)
    wlv = scale * jax.random.normal(ks[9], (10, latent_dim), jnp.float32)
    blv = scale * jax.random.normal(ks[10], (1, latent_dim), jnp.float32)
    return (emb, w1, b1, w2, b2, w3, b3, wmu, bmu, wlv, blv)


def reference_forward(tokens, params):
    """Pure-JAX f32 reference with identical semantics (sanity check)."""
    (emb, w1, b1, w2, b2, w3, b3, wmu, bmu, wlv, blv) = params
    x = emb[tokens]                                             # (B, L, E)

    def conv_same(x, w, b, pad):
        K = w.shape[0]
        L = x.shape[1]
        xp = jnp.pad(x, ((0, 0), (pad, pad), (0, 0)))
        acc = jnp.zeros((x.shape[0], L, w.shape[2]), jnp.float32)
        for t in range(K):
            acc = acc + jnp.einsum("blc,co->blo", xp[:, t:t + L, :], w[t],
                                   precision=jax.lax.Precision.HIGHEST)
        return acc + b[None]

    h = jax.nn.relu(conv_same(x, w1, b1, 4))
    h = jax.nn.relu(conv_same(h, w2, b2, 4))
    h = jax.nn.relu(conv_same(h, w3, b3, 5))
    pooled = jnp.max(h, axis=1)                                 # (B, 10)
    mu = pooled @ wmu + bmu
    logvar = pooled @ wlv + blv
    return mu, logvar


if __name__ == "__main__":
    # Small, module-consistent shapes.
    VOCAB, EMBED, LATENT, PAD = 32, 8, 16, 0
    B, L = 2, 16

    key = jax.random.PRNGKey(0)
    kp, kt = jax.random.split(key)
    params = init_params(kp, VOCAB, EMBED, LATENT, PAD)
    tokens = jax.random.randint(kt, (B, L), 0, VOCAB, dtype=jnp.int32)
    tokens = tokens.at[:, -3:].set(PAD)                         # include pad tokens

    mu_ref, lv_ref = reference_forward(tokens, params)

    # Default path: bf16 MXU operands, f32 accumulation (~1e-4-level deviation
    # from the pure-f32 torch math; tolerance documents that).
    mu, logvar = encoder_forward(tokens, params)
    jax.block_until_ready((mu, logvar))
    assert mu.shape == (B, LATENT) and logvar.shape == (B, LATENT)
    assert jnp.allclose(mu, mu_ref, rtol=5e-3, atol=5e-3)
    assert jnp.allclose(logvar, lv_ref, rtol=5e-3, atol=5e-3)

    # f32-operand path (tighter agreement with the f32 reference).
    mu32, lv32 = encoder_forward(tokens, params, use_bf16=False)
    jax.block_until_ready((mu32, lv32))
    assert jnp.allclose(mu32, mu_ref, rtol=2e-3, atol=2e-3)
    assert jnp.allclose(lv32, lv_ref, rtol=2e-3, atol=2e-3)

    print("KERNEL_OK")
</pallas_src>

<mosaic_0001>
module attributes {stable_mosaic.version = 11 : i64} {
  func.func @_encoder_kernel(%arg0: i32, %arg1: memref<128x1xi32, #tpu.memory_space<vmem>>, %arg2: memref<32x8xbf16, #tpu.memory_space<vmem>>, %arg3: memref<9x8x9xbf16, #tpu.memory_space<vmem>>, %arg4: memref<1x9xf32, #tpu.memory_space<vmem>>, %arg5: memref<9x9x9xbf16, #tpu.memory_space<vmem>>, %arg6: memref<1x9xf32, #tpu.memory_space<vmem>>, %arg7: memref<11x9x10xbf16, #tpu.memory_space<vmem>>, %arg8: memref<1x10xf32, #tpu.memory_space<vmem>>, %arg9: memref<10x128xbf16, #tpu.memory_space<vmem>>, %arg10: memref<1x128xf32, #tpu.memory_space<vmem>>, %arg11: memref<8x128xf32, #tpu.memory_space<vmem>>) attributes {dimension_semantics = [#tpu.dimension_semantics<parallel>], iteration_bounds = array<i64: 1>, scalar_prefetch = 0 : i64, scratch_operands = 0 : i64, tpu.core_type = #tpu.core_type<tc>, window_params = [{transform_indices = @transform_0, window_bounds = array<i64: 128, 1>}, {pipeline_mode = #tpu.pipeline_mode<synchronous>, transform_indices = @transform_1, window_bounds = array<i64: 32, 8>}, {pipeline_mode = #tpu.pipeline_mode<synchronous>, transform_indices = @transform_2, window_bounds = array<i64: 9, 8, 9>}, {pipeline_mode = #tpu.pipeline_mode<synchronous>, transform_indices = @transform_3, window_bounds = array<i64: 1, 9>}, {pipeline_mode = #tpu.pipeline_mode<synchronous>, transform_indices = @transform_4, window_bounds = array<i64: 9, 9, 9>}, {pipeline_mode = #tpu.pipeline_mode<synchronous>, transform_indices = @transform_5, window_bounds = array<i64: 1, 9>}, {pipeline_mode = #tpu.pipeline_mode<synchronous>, transform_indices = @transform_6, window_bounds = array<i64: 11, 9, 10>}, {pipeline_mode = #tpu.pipeline_mode<synchronous>, transform_indices = @transform_7, window_bounds = array<i64: 1, 10>}, {pipeline_mode = #tpu.pipeline_mode<synchronous>, transform_indices = @transform_8, window_bounds = array<i64: 10, 128>}, {pipeline_mode = #tpu.pipeline_mode<synchronous>, transform_indices = @transform_9, window_bounds = array<i64: 1, 128>}, {transform_indices = @transform_10, window_bounds = array<i64: 8, 128>}]} {
    %c0 = arith.constant 0 : index
    %c0_0 = arith.constant 0 : index
    %0 = vector.load %arg1[%c0, %c0_0] : memref<128x1xi32, #tpu.memory_space<vmem>>, vector<128x1xi32>
    %1 = tpu.iota {dimensions = array<i32: 1>} : vector<128x32xi32>
    %2 = vector.broadcast %0 : vector<128x1xi32> to vector<128x32xi32>
    %3 = arith.cmpi eq, %2, %1 : vector<128x32xi32>
    %4 = arith.extui %3 : vector<128x32xi1> to vector<128x32xi32>
    %5 = arith.sitofp %4 : vector<128x32xi32> to vector<128x32xf32>
    %6 = arith.truncf %5 : vector<128x32xf32> to vector<128x32xbf16>
    %c0_1 = arith.constant 0 : index
    %c0_2 = arith.constant 0 : index
    %7 = vector.load %arg2[%c0_1, %c0_2] : memref<32x8xbf16, #tpu.memory_space<vmem>>, vector<32x8xbf16>
    %cst = arith.constant dense<0.000000e+00> : vector<128x8xf32>
    %8 = tpu.matmul %6, %7, %cst {dimension_numbers = #tpu.dot_dimension_numbers<[1], [0], [0], [1], [0, 0, 1, 1], [], []>} : vector<128x32xbf16>, vector<32x8xbf16>, vector<128x8xf32> -> vector<128x8xf32>
    %9 = vector.shape_cast %8 : vector<128x8xf32> to vector<8x16x8xf32>
    %cst_3 = arith.constant 0.000000e+00 : f32
    %10 = vector.broadcast %cst_3 : f32 to vector<128x9xf32>
    %cst_4 = arith.constant 0.000000e+00 : f32
    %11 = vector.broadcast %cst_4 : f32 to vector<8x4x8xf32>
    %12 = vector.extract_strided_slice %9 {offsets = [0, 0, 0], sizes = [8, 12, 8], strides = [1, 1, 1]} : vector<8x16x8xf32> to vector<8x12x8xf32>
    %13 = tpu.concatenate %11, %12 in 1 : vector<8x4x8xf32>, vector<8x12x8xf32> -> vector<8x16x8xf32>
    %14 = vector.shape_cast %13 : vector<8x16x8xf32> to vector<128x8xf32>
    %15 = arith.truncf %14 : vector<128x8xf32> to vector<128x8xbf16>
    %c0_5 = arith.constant 0 : index
    %c0_6 = arith.constant 0 : index
    %c0_7 = arith.constant 0 : index
    %16 = vector.load %arg3[%c0_5, %c0_6, %c0_7] : memref<9x8x9xbf16, #tpu.memory_space<vmem>>, vector<1x8x9xbf16>
    %17 = vector.shape_cast %16 : vector<1x8x9xbf16> to vector<8x9xbf16>
    %cst_8 = arith.constant dense<0.000000e+00> : vector<128x9xf32>
    %18 = tpu.matmul %15, %17, %cst_8 {dimension_numbers = #tpu.dot_dimension_numbers<[1], [0], [0], [1], [0, 0, 1, 1], [], []>} : vector<128x8xbf16>, vector<8x9xbf16>, vector<128x9xf32> -> vector<128x9xf32>
    %19 = arith.addf %10, %18 : vector<128x9xf32>
    %cst_9 = arith.constant 0.000000e+00 : f32
    %20 = vector.broadcast %cst_9 : f32 to vector<8x3x8xf32>
    %21 = vector.extract_strided_slice %9 {offsets = [0, 0, 0], sizes = [8, 13, 8], strides = [1, 1, 1]} : vector<8x16x8xf32> to vector<8x13x8xf32>
    %22 = tpu.concatenate %20, %21 in 1 : vector<8x3x8xf32>, vector<8x13x8xf32> -> vector<8x16x8xf32>
    %23 = vector.shape_cast %22 : vector<8x16x8xf32> to vector<128x8xf32>
    %24 = arith.truncf %23 : vector<128x8xf32> to vector<128x8xbf16>
    %c1 = arith.constant 1 : index
    %c0_10 = arith.constant 0 : index
    %c0_11 = arith.constant 0 : index
    %25 = vector.load %arg3[%c1, %c0_10, %c0_11] : memref<9x8x9xbf16, #tpu.memory_space<vmem>>, vector<1x8x9xbf16>
    %26 = vector.shape_cast %25 : vector<1x8x9xbf16> to vector<8x9xbf16>
    %cst_12 = arith.constant dense<0.000000e+00> : vector<128x9xf32>
    %27 = tpu.matmul %24, %26, %cst_12 {dimension_numbers = #tpu.dot_dimension_numbers<[1], [0], [0], [1], [0, 0, 1, 1], [], []>} : vector<128x8xbf16>, vector<8x9xbf16>, vector<128x9xf32> -> vector<128x9xf32>
    %28 = arith.addf %19, %27 : vector<128x9xf32>
    %cst_13 = arith.constant 0.000000e+00 : f32
    %29 = vector.broadcast %cst_13 : f32 to vector<8x2x8xf32>
    %30 = vector.extract_strided_slice %9 {offsets = [0, 0, 0], sizes = [8, 14, 8], strides = [1, 1, 1]} : vector<8x16x8xf32> to vector<8x14x8xf32>
    %31 = tpu.concatenate %29, %30 in 1 : vector<8x2x8xf32>, vector<8x14x8xf32> -> vector<8x16x8xf32>
    %32 = vector.shape_cast %31 : vector<8x16x8xf32> to vector<128x8xf32>
    %33 = arith.truncf %32 : vector<128x8xf32> to vector<128x8xbf16>
    %c2 = arith.constant 2 : index
    %c0_14 = arith.constant 0 : index
    %c0_15 = arith.constant 0 : index
    %34 = vector.load %arg3[%c2, %c0_14, %c0_15] : memref<9x8x9xbf16, #tpu.memory_space<vmem>>, vector<1x8x9xbf16>
    %35 = vector.shape_cast %34 : vector<1x8x9xbf16> to vector<8x9xbf16>
    %cst_16 = arith.constant dense<0.000000e+00> : vector<128x9xf32>
    %36 = tpu.matmul %33, %35, %cst_16 {dimension_numbers = #tpu.dot_dimension_numbers<[1], [0], [0], [1], [0, 0, 1, 1], [], []>} : vector<128x8xbf16>, vector<8x9xbf16>, vector<128x9xf32> -> vector<128x9xf32>
    %37 = arith.addf %28, %36 : vector<128x9xf32>
    %cst_17 = arith.constant 0.000000e+00 : f32
    %38 = vector.broadcast %cst_17 : f32 to vector<8x1x8xf32>
    %39 = vector.extract_strided_slice %9 {offsets = [0, 0, 0], sizes = [8, 15, 8], strides = [1, 1, 1]} : vector<8x16x8xf32> to vector<8x15x8xf32>
    %40 = tpu.concatenate %38, %39 in 1 : vector<8x1x8xf32>, vector<8x15x8xf32> -> vector<8x16x8xf32>
    %41 = vector.shape_cast %40 : vector<8x16x8xf32> to vector<128x8xf32>
    %42 = arith.truncf %41 : vector<128x8xf32> to vector<128x8xbf16>
    %c3 = arith.constant 3 : index
    %c0_18 = arith.constant 0 : index
    %c0_19 = arith.constant 0 : index
    %43 = vector.load %arg3[%c3, %c0_18, %c0_19] : memref<9x8x9xbf16, #tpu.memory_space<vmem>>, vector<1x8x9xbf16>
    %44 = vector.shape_cast %43 : vector<1x8x9xbf16> to vector<8x9xbf16>
    %cst_20 = arith.constant dense<0.000000e+00> : vector<128x9xf32>
    %45 = tpu.matmul %42, %44, %cst_20 {dimension_numbers = #tpu.dot_dimension_numbers<[1], [0], [0], [1], [0, 0, 1, 1], [], []>} : vector<128x8xbf16>, vector<8x9xbf16>, vector<128x9xf32> -> vector<128x9xf32>
    %46 = arith.addf %37, %45 : vector<128x9xf32>
    %47 = vector.shape_cast %9 : vector<8x16x8xf32> to vector<128x8xf32>
    %48 = arith.truncf %47 : vector<128x8xf32> to vector<128x8xbf16>
    %c4 = arith.constant 4 : index
    %c0_21 = arith.constant 0 : index
    %c0_22 = arith.constant 0 : index
    %49 = vector.load %arg3[%c4, %c0_21, %c0_22] : memref<9x8x9xbf16, #tpu.memory_space<vmem>>, vector<1x8x9xbf16>
    %50 = vector.shape_cast %49 : vector<1x8x9xbf16> to vector<8x9xbf16>
    %cst_23 = arith.constant dense<0.000000e+00> : vector<128x9xf32>
    %51 = tpu.matmul %48, %50, %cst_23 {dimension_numbers = #tpu.dot_dimension_numbers<[1], [0], [0], [1], [0, 0, 1, 1], [], []>} : vector<128x8xbf16>, vector<8x9xbf16>, vector<128x9xf32> -> vector<128x9xf32>
    %52 = arith.addf %46, %51 : vector<128x9xf32>
    %cst_24 = arith.constant 0.000000e+00 : f32
    %53 = vector.broadcast %cst_24 : f32 to vector<8x1x8xf32>
    %54 = vector.extract_strided_slice %9 {offsets = [0, 1, 0], sizes = [8, 15, 8], strides = [1, 1, 1]} : vector<8x16x8xf32> to vector<8x15x8xf32>
    %55 = tpu.concatenate %54, %53 in 1 : vector<8x15x8xf32>, vector<8x1x8xf32> -> vector<8x16x8xf32>
    %56 = vector.shape_cast %55 : vector<8x16x8xf32> to vector<128x8xf32>
    %57 = arith.truncf %56 : vector<128x8xf32> to vector<128x8xbf16>
    %c5 = arith.constant 5 : index
    %c0_25 = arith.constant 0 : index
    %c0_26 = arith.constant 0 : index
    %58 = vector.load %arg3[%c5, %c0_25, %c0_26] : memref<9x8x9xbf16, #tpu.memory_space<vmem>>, vector<1x8x9xbf16>
    %59 = vector.shape_cast %58 : vector<1x8x9xbf16> to vector<8x9xbf16>
    %cst_27 = arith.constant dense<0.000000e+00> : vector<128x9xf32>
    %60 = tpu.matmul %57, %59, %cst_27 {dimension_numbers = #tpu.dot_dimension_numbers<[1], [0], [0], [1], [0, 0, 1, 1], [], []>} : vector<128x8xbf16>, vector<8x9xbf16>, vector<128x9xf32> -> vector<128x9xf32>
    %61 = arith.addf %52, %60 : vector<128x9xf32>
    %cst_28 = arith.constant 0.000000e+00 : f32
    %62 = vector.broadcast %cst_28 : f32 to vector<8x2x8xf32>
    %63 = vector.extract_strided_slice %9 {offsets = [0, 2, 0], sizes = [8, 14, 8], strides = [1, 1, 1]} : vector<8x16x8xf32> to vector<8x14x8xf32>
    %64 = tpu.concatenate %63, %62 in 1 : vector<8x14x8xf32>, vector<8x2x8xf32> -> vector<8x16x8xf32>
    %65 = vector.shape_cast %64 : vector<8x16x8xf32> to vector<128x8xf32>
    %66 = arith.truncf %65 : vector<128x8xf32> to vector<128x8xbf16>
    %c6 = arith.constant 6 : index
    %c0_29 = arith.constant 0 : index
    %c0_30 = arith.constant 0 : index
    %67 = vector.load %arg3[%c6, %c0_29, %c0_30] : memref<9x8x9xbf16, #tpu.memory_space<vmem>>, vector<1x8x9xbf16>
    %68 = vector.shape_cast %67 : vector<1x8x9xbf16> to vector<8x9xbf16>
    %cst_31 = arith.constant dense<0.000000e+00> : vector<128x9xf32>
    %69 = tpu.matmul %66, %68, %cst_31 {dimension_numbers = #tpu.dot_dimension_numbers<[1], [0], [0], [1], [0, 0, 1, 1], [], []>} : vector<128x8xbf16>, vector<8x9xbf16>, vector<128x9xf32> -> vector<128x9xf32>
    %70 = arith.addf %61, %69 : vector<128x9xf32>
    %cst_32 = arith.constant 0.000000e+00 : f32
    %71 = vector.broadcast %cst_32 : f32 to vector<8x3x8xf32>
    %72 = vector.extract_strided_slice %9 {offsets = [0, 3, 0], sizes = [8, 13, 8], strides = [1, 1, 1]} : vector<8x16x8xf32> to vector<8x13x8xf32>
    %73 = tpu.concatenate %72, %71 in 1 : vector<8x13x8xf32>, vector<8x3x8xf32> -> vector<8x16x8xf32>
    %74 = vector.shape_cast %73 : vector<8x16x8xf32> to vector<128x8xf32>
    %75 = arith.truncf %74 : vector<128x8xf32> to vector<128x8xbf16>
    %c7 = arith.constant 7 : index
    %c0_33 = arith.constant 0 : index
    %c0_34 = arith.constant 0 : index
    %76 = vector.load %arg3[%c7, %c0_33, %c0_34] : memref<9x8x9xbf16, #tpu.memory_space<vmem>>, vector<1x8x9xbf16>
    %77 = vector.shape_cast %76 : vector<1x8x9xbf16> to vector<8x9xbf16>
    %cst_35 = arith.constant dense<0.000000e+00> : vector<128x9xf32>
    %78 = tpu.matmul %75, %77, %cst_35 {dimension_numbers = #tpu.dot_dimension_numbers<[1], [0], [0], [1], [0, 0, 1, 1], [], []>} : vector<128x8xbf16>, vector<8x9xbf16>, vector<128x9xf32> -> vector<128x9xf32>
    %79 = arith.addf %70, %78 : vector<128x9xf32>
    %cst_36 = arith.constant 0.000000e+00 : f32
    %80 = vector.broadcast %cst_36 : f32 to vector<8x4x8xf32>
    %81 = vector.extract_strided_slice %9 {offsets = [0, 4, 0], sizes = [8, 12, 8], strides = [1, 1, 1]} : vector<8x16x8xf32> to vector<8x12x8xf32>
    %82 = tpu.concatenate %81, %80 in 1 : vector<8x12x8xf32>, vector<8x4x8xf32> -> vector<8x16x8xf32>
    %83 = vector.shape_cast %82 : vector<8x16x8xf32> to vector<128x8xf32>
    %84 = arith.truncf %83 : vector<128x8xf32> to vector<128x8xbf16>
    %c8 = arith.constant 8 : index
    %c0_37 = arith.constant 0 : index
    %c0_38 = arith.constant 0 : index
    %85 = vector.load %arg3[%c8, %c0_37, %c0_38] : memref<9x8x9xbf16, #tpu.memory_space<vmem>>, vector<1x8x9xbf16>
    %86 = vector.shape_cast %85 : vector<1x8x9xbf16> to vector<8x9xbf16>
    %cst_39 = arith.constant dense<0.000000e+00> : vector<128x9xf32>
    %87 = tpu.matmul %84, %86, %cst_39 {dimension_numbers = #tpu.dot_dimension_numbers<[1], [0], [0], [1], [0, 0, 1, 1], [], []>} : vector<128x8xbf16>, vector<8x9xbf16>, vector<128x9xf32> -> vector<128x9xf32>
    %88 = arith.addf %79, %87 : vector<128x9xf32>
    %c0_40 = arith.constant 0 : index
    %c0_41 = arith.constant 0 : index
    %89 = vector.load %arg4[%c0_40, %c0_41] : memref<1x9xf32, #tpu.memory_space<vmem>>, vector<1x9xf32>
    %90 = vector.broadcast %89 : vector<1x9xf32> to vector<128x9xf32>
    %91 = arith.addf %88, %90 : vector<128x9xf32>
    %cst_42 = arith.constant 0.000000e+00 : f32
    %92 = vector.broadcast %cst_42 : f32 to vector<128x9xf32>
    %93 = arith.maximumf %91, %92 : vector<128x9xf32>
    %94 = vector.shape_cast %93 : vector<128x9xf32> to vector<8x16x9xf32>
    %cst_43 = arith.constant 0.000000e+00 : f32
    %95 = vector.broadcast %cst_43 : f32 to vector<128x9xf32>
    %cst_44 = arith.constant 0.000000e+00 : f32
    %96 = vector.broadcast %cst_44 : f32 to vector<8x4x9xf32>
    %97 = vector.extract_strided_slice %94 {offsets = [0, 0, 0], sizes = [8, 12, 9], strides = [1, 1, 1]} : vector<8x16x9xf32> to vector<8x12x9xf32>
    %98 = tpu.concatenate %96, %97 in 1 : vector<8x4x9xf32>, vector<8x12x9xf32> -> vector<8x16x9xf32>
    %99 = vector.shape_cast %98 : vector<8x16x9xf32> to vector<128x9xf32>
    %100 = arith.truncf %99 : vector<128x9xf32> to vector<128x9xbf16>
    %c0_45 = arith.constant 0 : index
    %c0_46 = arith.constant 0 : index
    %c0_47 = arith.constant 0 : index
    %101 = vector.load %arg5[%c0_45, %c0_46, %c0_47] : memref<9x9x9xbf16, #tpu.memory_space<vmem>>, vector<1x9x9xbf16>
    %102 = vector.shape_cast %101 : vector<1x9x9xbf16> to vector<9x9xbf16>
    %cst_48 = arith.constant dense<0.000000e+00> : vector<128x9xf32>
    %103 = tpu.matmul %100, %102, %cst_48 {dimension_numbers = #tpu.dot_dimension_numbers<[1], [0], [0], [1], [0, 0, 1, 1], [], []>} : vector<128x9xbf16>, vector<9x9xbf16>, vector<128x9xf32> -> vector<128x9xf32>
    %104 = arith.addf %95, %103 : vector<128x9xf32>
    %cst_49 = arith.constant 0.000000e+00 : f32
    %105 = vector.broadcast %cst_49 : f32 to vector<8x3x9xf32>
    %106 = vector.extract_strided_slice %94 {offsets = [0, 0, 0], sizes = [8, 13, 9], strides = [1, 1, 1]} : vector<8x16x9xf32> to vector<8x13x9xf32>
    %107 = tpu.concatenate %105, %106 in 1 : vector<8x3x9xf32>, vector<8x13x9xf32> -> vector<8x16x9xf32>
    %108 = vector.shape_cast %107 : vector<8x16x9xf32> to vector<128x9xf32>
    %109 = arith.truncf %108 : vector<128x9xf32> to vector<128x9xbf16>
    %c1_50 = arith.constant 1 : index
    %c0_51 = arith.constant 0 : index
    %c0_52 = arith.constant 0 : index
    %110 = vector.load %arg5[%c1_50, %c0_51, %c0_52] : memref<9x9x9xbf16, #tpu.memory_space<vmem>>, vector<1x9x9xbf16>
    %111 = vector.shape_cast %110 : vector<1x9x9xbf16> to vector<9x9xbf16>
    %cst_53 = arith.constant dense<0.000000e+00> : vector<128x9xf32>
    %112 = tpu.matmul %109, %111, %cst_53 {dimension_numbers = #tpu.dot_dimension_numbers<[1], [0], [0], [1], [0, 0, 1, 1], [], []>} : vector<128x9xbf16>, vector<9x9xbf16>, vector<128x9xf32> -> vector<128x9xf32>
    %113 = arith.addf %104, %112 : vector<128x9xf32>
    %cst_54 = arith.constant 0.000000e+00 : f32
    %114 = vector.broadcast %cst_54 : f32 to vector<8x2x9xf32>
    %115 = vector.extract_strided_slice %94 {offsets = [0, 0, 0], sizes = [8, 14, 9], strides = [1, 1, 1]} : vector<8x16x9xf32> to vector<8x14x9xf32>
    %116 = tpu.concatenate %114, %115 in 1 : vector<8x2x9xf32>, vector<8x14x9xf32> -> vector<8x16x9xf32>
    %117 = vector.shape_cast %116 : vector<8x16x9xf32> to vector<128x9xf32>
    %118 = arith.truncf %117 : vector<128x9xf32> to vector<128x9xbf16>
    %c2_55 = arith.constant 2 : index
    %c0_56 = arith.constant 0 : index
    %c0_57 = arith.constant 0 : index
    %119 = vector.load %arg5[%c2_55, %c0_56, %c0_57] : memref<9x9x9xbf16, #tpu.memory_space<vmem>>, vector<1x9x9xbf16>
    %120 = vector.shape_cast %119 : vector<1x9x9xbf16> to vector<9x9xbf16>
    %cst_58 = arith.constant dense<0.000000e+00> : vector<128x9xf32>
    %121 = tpu.matmul %118, %120, %cst_58 {dimension_numbers = #tpu.dot_dimension_numbers<[1], [0], [0], [1], [0, 0, 1, 1], [], []>} : vector<128x9xbf16>, vector<9x9xbf16>, vector<128x9xf32> -> vector<128x9xf32>
    %122 = arith.addf %113, %121 : vector<128x9xf32>
    %cst_59 = arith.constant 0.000000e+00 : f32
    %123 = vector.broadcast %cst_59 : f32 to vector<8x1x9xf32>
    %124 = vector.extract_strided_slice %94 {offsets = [0, 0, 0], sizes = [8, 15, 9], strides = [1, 1, 1]} : vector<8x16x9xf32> to vector<8x15x9xf32>
    %125 = tpu.concatenate %123, %124 in 1 : vector<8x1x9xf32>, vector<8x15x9xf32> -> vector<8x16x9xf32>
    %126 = vector.shape_cast %125 : vector<8x16x9xf32> to vector<128x9xf32>
    %127 = arith.truncf %126 : vector<128x9xf32> to vector<128x9xbf16>
    %c3_60 = arith.constant 3 : index
    %c0_61 = arith.constant 0 : index
    %c0_62 = arith.constant 0 : index
    %128 = vector.load %arg5[%c3_60, %c0_61, %c0_62] : memref<9x9x9xbf16, #tpu.memory_space<vmem>>, vector<1x9x9xbf16>
    %129 = vector.shape_cast %128 : vector<1x9x9xbf16> to vector<9x9xbf16>
    %cst_63 = arith.constant dense<0.000000e+00> : vector<128x9xf32>
    %130 = tpu.matmul %127, %129, %cst_63 {dimension_numbers = #tpu.dot_dimension_numbers<[1], [0], [0], [1], [0, 0, 1, 1], [], []>} : vector<128x9xbf16>, vector<9x9xbf16>, vector<128x9xf32> -> vector<128x9xf32>
    %131 = arith.addf %122, %130 : vector<128x9xf32>
    %132 = vector.shape_cast %94 : vector<8x16x9xf32> to vector<128x9xf32>
    %133 = arith.truncf %132 : vector<128x9xf32> to vector<128x9xbf16>
    %c4_64 = arith.constant 4 : index
    %c0_65 = arith.constant 0 : index
    %c0_66 = arith.constant 0 : index
    %134 = vector.load %arg5[%c4_64, %c0_65, %c0_66] : memref<9x9x9xbf16, #tpu.memory_space<vmem>>, vector<1x9x9xbf16>
    %135 = vector.shape_cast %134 : vector<1x9x9xbf16> to vector<9x9xbf16>
    %cst_67 = arith.constant dense<0.000000e+00> : vector<128x9xf32>
    %136 = tpu.matmul %133, %135, %cst_67 {dimension_numbers = #tpu.dot_dimension_numbers<[1], [0], [0], [1], [0, 0, 1, 1], [], []>} : vector<128x9xbf16>, vector<9x9xbf16>, vector<128x9xf32> -> vector<128x9xf32>
    %137 = arith.addf %131, %136 : vector<128x9xf32>
    %cst_68 = arith.constant 0.000000e+00 : f32
    %138 = vector.broadcast %cst_68 : f32 to vector<8x1x9xf32>
    %139 = vector.extract_strided_slice %94 {offsets = [0, 1, 0], sizes = [8, 15, 9], strides = [1, 1, 1]} : vector<8x16x9xf32> to vector<8x15x9xf32>
    %140 = tpu.concatenate %139, %138 in 1 : vector<8x15x9xf32>, vector<8x1x9xf32> -> vector<8x16x9xf32>
    %141 = vector.shape_cast %140 : vector<8x16x9xf32> to vector<128x9xf32>
    %142 = arith.truncf %141 : vector<128x9xf32> to vector<128x9xbf16>
    %c5_69 = arith.constant 5 : index
    %c0_70 = arith.constant 0 : index
    %c0_71 = arith.constant 0 : index
    %143 = vector.load %arg5[%c5_69, %c0_70, %c0_71] : memref<9x9x9xbf16, #tpu.memory_space<vmem>>, vector<1x9x9xbf16>
    %144 = vector.shape_cast %143 : vector<1x9x9xbf16> to vector<9x9xbf16>
    %cst_72 = arith.constant dense<0.000000e+00> : vector<128x9xf32>
    %145 = tpu.matmul %142, %144, %cst_72 {dimension_numbers = #tpu.dot_dimension_numbers<[1], [0], [0], [1], [0, 0, 1, 1], [], []>} : vector<128x9xbf16>, vector<9x9xbf16>, vector<128x9xf32> -> vector<128x9xf32>
    %146 = arith.addf %137, %145 : vector<128x9xf32>
    %cst_73 = arith.constant 0.000000e+00 : f32
    %147 = vector.broadcast %cst_73 : f32 to vector<8x2x9xf32>
    %148 = vector.extract_strided_slice %94 {offsets = [0, 2, 0], sizes = [8, 14, 9], strides = [1, 1, 1]} : vector<8x16x9xf32> to vector<8x14x9xf32>
    %149 = tpu.concatenate %148, %147 in 1 : vector<8x14x9xf32>, vector<8x2x9xf32> -> vector<8x16x9xf32>
    %150 = vector.shape_cast %149 : vector<8x16x9xf32> to vector<128x9xf32>
    %151 = arith.truncf %150 : vector<128x9xf32> to vector<128x9xbf16>
    %c6_74 = arith.constant 6 : index
    %c0_75 = arith.constant 0 : index
    %c0_76 = arith.constant 0 : index
    %152 = vector.load %arg5[%c6_74, %c0_75, %c0_76] : memref<9x9x9xbf16, #tpu.memory_space<vmem>>, vector<1x9x9xbf16>
    %153 = vector.shape_cast %152 : vector<1x9x9xbf16> to vector<9x9xbf16>
    %cst_77 = arith.constant dense<0.000000e+00> : vector<128x9xf32>
    %154 = tpu.matmul %151, %153, %cst_77 {dimension_numbers = #tpu.dot_dimension_numbers<[1], [0], [0], [1], [0, 0, 1, 1], [], []>} : vector<128x9xbf16>, vector<9x9xbf16>, vector<128x9xf32> -> vector<128x9xf32>
    %155 = arith.addf %146, %154 : vector<128x9xf32>
    %cst_78 = arith.constant 0.000000e+00 : f32
    %156 = vector.broadcast %cst_78 : f32 to vector<8x3x9xf32>
    %157 = vector.extract_strided_slice %94 {offsets = [0, 3, 0], sizes = [8, 13, 9], strides = [1, 1, 1]} : vector<8x16x9xf32> to vector<8x13x9xf32>
    %158 = tpu.concatenate %157, %156 in 1 : vector<8x13x9xf32>, vector<8x3x9xf32> -> vector<8x16x9xf32>
    %159 = vector.shape_cast %158 : vector<8x16x9xf32> to vector<128x9xf32>
    %160 = arith.truncf %159 : vector<128x9xf32> to vector<128x9xbf16>
    %c7_79 = arith.constant 7 : index
    %c0_80 = arith.constant 0 : index
    %c0_81 = arith.constant 0 : index
    %161 = vector.load %arg5[%c7_79, %c0_80, %c0_81] : memref<9x9x9xbf16, #tpu.memory_space<vmem>>, vector<1x9x9xbf16>
    %162 = vector.shape_cast %161 : vector<1x9x9xbf16> to vector<9x9xbf16>
    %cst_82 = arith.constant dense<0.000000e+00> : vector<128x9xf32>
    %163 = tpu.matmul %160, %162, %cst_82 {dimension_numbers = #tpu.dot_dimension_numbers<[1], [0], [0], [1], [0, 0, 1, 1], [], []>} : vector<128x9xbf16>, vector<9x9xbf16>, vector<128x9xf32> -> vector<128x9xf32>
    %164 = arith.addf %155, %163 : vector<128x9xf32>
    %cst_83 = arith.constant 0.000000e+00 : f32
    %165 = vector.broadcast %cst_83 : f32 to vector<8x4x9xf32>
    %166 = vector.extract_strided_slice %94 {offsets = [0, 4, 0], sizes = [8, 12, 9], strides = [1, 1, 1]} : vector<8x16x9xf32> to vector<8x12x9xf32>
    %167 = tpu.concatenate %166, %165 in 1 : vector<8x12x9xf32>, vector<8x4x9xf32> -> vector<8x16x9xf32>
    %168 = vector.shape_cast %167 : vector<8x16x9xf32> to vector<128x9xf32>
    %169 = arith.truncf %168 : vector<128x9xf32> to vector<128x9xbf16>
    %c8_84 = arith.constant 8 : index
    %c0_85 = arith.constant 0 : index
    %c0_86 = arith.constant 0 : index
    %170 = vector.load %arg5[%c8_84, %c0_85, %c0_86] : memref<9x9x9xbf16, #tpu.memory_space<vmem>>, vector<1x9x9xbf16>
    %171 = vector.shape_cast %170 : vector<1x9x9xbf16> to vector<9x9xbf16>
    %cst_87 = arith.constant dense<0.000000e+00> : vector<128x9xf32>
    %172 = tpu.matmul %169, %171, %cst_87 {dimension_numbers = #tpu.dot_dimension_numbers<[1], [0], [0], [1], [0, 0, 1, 1], [], []>} : vector<128x9xbf16>, vector<9x9xbf16>, vector<128x9xf32> -> vector<128x9xf32>
    %173 = arith.addf %164, %172 : vector<128x9xf32>
    %c0_88 = arith.constant 0 : index
    %c0_89 = arith.constant 0 : index
    %174 = vector.load %arg6[%c0_88, %c0_89] : memref<1x9xf32, #tpu.memory_space<vmem>>, vector<1x9xf32>
    %175 = vector.broadcast %174 : vector<1x9xf32> to vector<128x9xf32>
    %176 = arith.addf %173, %175 : vector<128x9xf32>
    %cst_90 = arith.constant 0.000000e+00 : f32
    %177 = vector.broadcast %cst_90 : f32 to vector<128x9xf32>
    %178 = arith.maximumf %176, %177 : vector<128x9xf32>
    %179 = vector.shape_cast %178 : vector<128x9xf32> to vector<8x16x9xf32>
    %cst_91 = arith.constant 0.000000e+00 : f32
    %180 = vector.broadcast %cst_91 : f32 to vector<128x10xf32>
    %cst_92 = arith.constant 0.000000e+00 : f32
    %181 = vector.broadcast %cst_92 : f32 to vector<8x5x9xf32>
    %182 = vector.extract_strided_slice %179 {offsets = [0, 0, 0], sizes = [8, 11, 9], strides = [1, 1, 1]} : vector<8x16x9xf32> to vector<8x11x9xf32>
    %183 = tpu.concatenate %181, %182 in 1 : vector<8x5x9xf32>, vector<8x11x9xf32> -> vector<8x16x9xf32>
    %184 = vector.shape_cast %183 : vector<8x16x9xf32> to vector<128x9xf32>
    %185 = arith.truncf %184 : vector<128x9xf32> to vector<128x9xbf16>
    %c0_93 = arith.constant 0 : index
    %c0_94 = arith.constant 0 : index
    %c0_95 = arith.constant 0 : index
    %186 = vector.load %arg7[%c0_93, %c0_94, %c0_95] : memref<11x9x10xbf16, #tpu.memory_space<vmem>>, vector<1x9x10xbf16>
    %187 = vector.shape_cast %186 : vector<1x9x10xbf16> to vector<9x10xbf16>
    %cst_96 = arith.constant dense<0.000000e+00> : vector<128x10xf32>
    %188 = tpu.matmul %185, %187, %cst_96 {dimension_numbers = #tpu.dot_dimension_numbers<[1], [0], [0], [1], [0, 0, 1, 1], [], []>} : vector<128x9xbf16>, vector<9x10xbf16>, vector<128x10xf32> -> vector<128x10xf32>
    %189 = arith.addf %180, %188 : vector<128x10xf32>
    %cst_97 = arith.constant 0.000000e+00 : f32
    %190 = vector.broadcast %cst_97 : f32 to vector<8x4x9xf32>
    %191 = vector.extract_strided_slice %179 {offsets = [0, 0, 0], sizes = [8, 12, 9], strides = [1, 1, 1]} : vector<8x16x9xf32> to vector<8x12x9xf32>
    %192 = tpu.concatenate %190, %191 in 1 : vector<8x4x9xf32>, vector<8x12x9xf32> -> vector<8x16x9xf32>
    %193 = vector.shape_cast %192 : vector<8x16x9xf32> to vector<128x9xf32>
    %194 = arith.truncf %193 : vector<128x9xf32> to vector<128x9xbf16>
    %c1_98 = arith.constant 1 : index
    %c0_99 = arith.constant 0 : index
    %c0_100 = arith.constant 0 : index
    %195 = vector.load %arg7[%c1_98, %c0_99, %c0_100] : memref<11x9x10xbf16, #tpu.memory_space<vmem>>, vector<1x9x10xbf16>
    %196 = vector.shape_cast %195 : vector<1x9x10xbf16> to vector<9x10xbf16>
    %cst_101 = arith.constant dense<0.000000e+00> : vector<128x10xf32>
    %197 = tpu.matmul %194, %196, %cst_101 {dimension_numbers = #tpu.dot_dimension_numbers<[1], [0], [0], [1], [0, 0, 1, 1], [], []>} : vector<128x9xbf16>, vector<9x10xbf16>, vector<128x10xf32> -> vector<128x10xf32>
    %198 = arith.addf %189, %197 : vector<128x10xf32>
    %cst_102 = arith.constant 0.000000e+00 : f32
    %199 = vector.broadcast %cst_102 : f32 to vector<8x3x9xf32>
    %200 = vector.extract_strided_slice %179 {offsets = [0, 0, 0], sizes = [8, 13, 9], strides = [1, 1, 1]} : vector<8x16x9xf32> to vector<8x13x9xf32>
    %201 = tpu.concatenate %199, %200 in 1 : vector<8x3x9xf32>, vector<8x13x9xf32> -> vector<8x16x9xf32>
    %202 = vector.shape_cast %201 : vector<8x16x9xf32> to vector<128x9xf32>
    %203 = arith.truncf %202 : vector<128x9xf32> to vector<128x9xbf16>
    %c2_103 = arith.constant 2 : index
    %c0_104 = arith.constant 0 : index
    %c0_105 = arith.constant 0 : index
    %204 = vector.load %arg7[%c2_103, %c0_104, %c0_105] : memref<11x9x10xbf16, #tpu.memory_space<vmem>>, vector<1x9x10xbf16>
    %205 = vector.shape_cast %204 : vector<1x9x10xbf16> to vector<9x10xbf16>
    %cst_106 = arith.constant dense<0.000000e+00> : vector<128x10xf32>
    %206 = tpu.matmul %203, %205, %cst_106 {dimension_numbers = #tpu.dot_dimension_numbers<[1], [0], [0], [1], [0, 0, 1, 1], [], []>} : vector<128x9xbf16>, vector<9x10xbf16>, vector<128x10xf32> -> vector<128x10xf32>
    %207 = arith.addf %198, %206 : vector<128x10xf32>
    %cst_107 = arith.constant 0.000000e+00 : f32
    %208 = vector.broadcast %cst_107 : f32 to vector<8x2x9xf32>
    %209 = vector.extract_strided_slice %179 {offsets = [0, 0, 0], sizes = [8, 14, 9], strides = [1, 1, 1]} : vector<8x16x9xf32> to vector<8x14x9xf32>
    %210 = tpu.concatenate %208, %209 in 1 : vector<8x2x9xf32>, vector<8x14x9xf32> -> vector<8x16x9xf32>
    %211 = vector.shape_cast %210 : vector<8x16x9xf32> to vector<128x9xf32>
    %212 = arith.truncf %211 : vector<128x9xf32> to vector<128x9xbf16>
    %c3_108 = arith.constant 3 : index
    %c0_109 = arith.constant 0 : index
    %c0_110 = arith.constant 0 : index
    %213 = vector.load %arg7[%c3_108, %c0_109, %c0_110] : memref<11x9x10xbf16, #tpu.memory_space<vmem>>, vector<1x9x10xbf16>
    %214 = vector.shape_cast %213 : vector<1x9x10xbf16> to vector<9x10xbf16>
    %cst_111 = arith.constant dense<0.000000e+00> : vector<128x10xf32>
    %215 = tpu.matmul %212, %214, %cst_111 {dimension_numbers = #tpu.dot_dimension_numbers<[1], [0], [0], [1], [0, 0, 1, 1], [], []>} : vector<128x9xbf16>, vector<9x10xbf16>, vector<128x10xf32> -> vector<128x10xf32>
    %216 = arith.addf %207, %215 : vector<128x10xf32>
    %cst_112 = arith.constant 0.000000e+00 : f32
    %217 = vector.broadcast %cst_112 : f32 to vector<8x1x9xf32>
    %218 = vector.extract_strided_slice %179 {offsets = [0, 0, 0], sizes = [8, 15, 9], strides = [1, 1, 1]} : vector<8x16x9xf32> to vector<8x15x9xf32>
    %219 = tpu.concatenate %217, %218 in 1 : vector<8x1x9xf32>, vector<8x15x9xf32> -> vector<8x16x9xf32>
    %220 = vector.shape_cast %219 : vector<8x16x9xf32> to vector<128x9xf32>
    %221 = arith.truncf %220 : vector<128x9xf32> to vector<128x9xbf16>
    %c4_113 = arith.constant 4 : index
    %c0_114 = arith.constant 0 : index
    %c0_115 = arith.constant 0 : index
    %222 = vector.load %arg7[%c4_113, %c0_114, %c0_115] : memref<11x9x10xbf16, #tpu.memory_space<vmem>>, vector<1x9x10xbf16>
    %223 = vector.shape_cast %222 : vector<1x9x10xbf16> to vector<9x10xbf16>
    %cst_116 = arith.constant dense<0.000000e+00> : vector<128x10xf32>
    %224 = tpu.matmul %221, %223, %cst_116 {dimension_numbers = #tpu.dot_dimension_numbers<[1], [0], [0], [1], [0, 0, 1, 1], [], []>} : vector<128x9xbf16>, vector<9x10xbf16>, vector<128x10xf32> -> vector<128x10xf32>
    %225 = arith.addf %216, %224 : vector<128x10xf32>
    %226 = vector.shape_cast %179 : vector<8x16x9xf32> to vector<128x9xf32>
    %227 = arith.truncf %226 : vector<128x9xf32> to vector<128x9xbf16>
    %c5_117 = arith.constant 5 : index
    %c0_118 = arith.constant 0 : index
    %c0_119 = arith.constant 0 : index
    %228 = vector.load %arg7[%c5_117, %c0_118, %c0_119] : memref<11x9x10xbf16, #tpu.memory_space<vmem>>, vector<1x9x10xbf16>
    %229 = vector.shape_cast %228 : vector<1x9x10xbf16> to vector<9x10xbf16>
    %cst_120 = arith.constant dense<0.000000e+00> : vector<128x10xf32>
    %230 = tpu.matmul %227, %229, %cst_120 {dimension_numbers = #tpu.dot_dimension_numbers<[1], [0], [0], [1], [0, 0, 1, 1], [], []>} : vector<128x9xbf16>, vector<9x10xbf16>, vector<128x10xf32> -> vector<128x10xf32>
    %231 = arith.addf %225, %230 : vector<128x10xf32>
    %cst_121 = arith.constant 0.000000e+00 : f32
    %232 = vector.broadcast %cst_121 : f32 to vector<8x1x9xf32>
    %233 = vector.extract_strided_slice %179 {offsets = [0, 1, 0], sizes = [8, 15, 9], strides = [1, 1, 1]} : vector<8x16x9xf32> to vector<8x15x9xf32>
    %234 = tpu.concatenate %233, %232 in 1 : vector<8x15x9xf32>, vector<8x1x9xf32> -> vector<8x16x9xf32>
    %235 = vector.shape_cast %234 : vector<8x16x9xf32> to vector<128x9xf32>
    %236 = arith.truncf %235 : vector<128x9xf32> to vector<128x9xbf16>
    %c6_122 = arith.constant 6 : index
    %c0_123 = arith.constant 0 : index
    %c0_124 = arith.constant 0 : index
    %237 = vector.load %arg7[%c6_122, %c0_123, %c0_124] : memref<11x9x10xbf16, #tpu.memory_space<vmem>>, vector<1x9x10xbf16>
    %238 = vector.shape_cast %237 : vector<1x9x10xbf16> to vector<9x10xbf16>
    %cst_125 = arith.constant dense<0.000000e+00> : vector<128x10xf32>
    %239 = tpu.matmul %236, %238, %cst_125 {dimension_numbers = #tpu.dot_dimension_numbers<[1], [0], [0], [1], [0, 0, 1, 1], [], []>} : vector<128x9xbf16>, vector<9x10xbf16>, vector<128x10xf32> -> vector<128x10xf32>
    %240 = arith.addf %231, %239 : vector<128x10xf32>
    %cst_126 = arith.constant 0.000000e+00 : f32
    %241 = vector.broadcast %cst_126 : f32 to vector<8x2x9xf32>
    %242 = vector.extract_strided_slice %179 {offsets = [0, 2, 0], sizes = [8, 14, 9], strides = [1, 1, 1]} : vector<8x16x9xf32> to vector<8x14x9xf32>
    %243 = tpu.concatenate %242, %241 in 1 : vector<8x14x9xf32>, vector<8x2x9xf32> -> vector<8x16x9xf32>
    %244 = vector.shape_cast %243 : vector<8x16x9xf32> to vector<128x9xf32>
    %245 = arith.truncf %244 : vector<128x9xf32> to vector<128x9xbf16>
    %c7_127 = arith.constant 7 : index
    %c0_128 = arith.constant 0 : index
    %c0_129 = arith.constant 0 : index
    %246 = vector.load %arg7[%c7_127, %c0_128, %c0_129] : memref<11x9x10xbf16, #tpu.memory_space<vmem>>, vector<1x9x10xbf16>
    %247 = vector.shape_cast %246 : vector<1x9x10xbf16> to vector<9x10xbf16>
    %cst_130 = arith.constant dense<0.000000e+00> : vector<128x10xf32>
    %248 = tpu.matmul %245, %247, %cst_130 {dimension_numbers = #tpu.dot_dimension_numbers<[1], [0], [0], [1], [0, 0, 1, 1], [], []>} : vector<128x9xbf16>, vector<9x10xbf16>, vector<128x10xf32> -> vector<128x10xf32>
    %249 = arith.addf %240, %248 : vector<128x10xf32>
    %cst_131 = arith.constant 0.000000e+00 : f32
    %250 = vector.broadcast %cst_131 : f32 to vector<8x3x9xf32>
    %251 = vector.extract_strided_slice %179 {offsets = [0, 3, 0], sizes = [8, 13, 9], strides = [1, 1, 1]} : vector<8x16x9xf32> to vector<8x13x9xf32>
    %252 = tpu.concatenate %251, %250 in 1 : vector<8x13x9xf32>, vector<8x3x9xf32> -> vector<8x16x9xf32>
    %253 = vector.shape_cast %252 : vector<8x16x9xf32> to vector<128x9xf32>
    %254 = arith.truncf %253 : vector<128x9xf32> to vector<128x9xbf16>
    %c8_132 = arith.constant 8 : index
    %c0_133 = arith.constant 0 : index
    %c0_134 = arith.constant 0 : index
    %255 = vector.load %arg7[%c8_132, %c0_133, %c0_134] : memref<11x9x10xbf16, #tpu.memory_space<vmem>>, vector<1x9x10xbf16>
    %256 = vector.shape_cast %255 : vector<1x9x10xbf16> to vector<9x10xbf16>
    %cst_135 = arith.constant dense<0.000000e+00> : vector<128x10xf32>
    %257 = tpu.matmul %254, %256, %cst_135 {dimension_numbers = #tpu.dot_dimension_numbers<[1], [0], [0], [1], [0, 0, 1, 1], [], []>} : vector<128x9xbf16>, vector<9x10xbf16>, vector<128x10xf32> -> vector<128x10xf32>
    %258 = arith.addf %249, %257 : vector<128x10xf32>
    %cst_136 = arith.constant 0.000000e+00 : f32
    %259 = vector.broadcast %cst_136 : f32 to vector<8x4x9xf32>
    %260 = vector.extract_strided_slice %179 {offsets = [0, 4, 0], sizes = [8, 12, 9], strides = [1, 1, 1]} : vector<8x16x9xf32> to vector<8x12x9xf32>
    %261 = tpu.concatenate %260, %259 in 1 : vector<8x12x9xf32>, vector<8x4x9xf32> -> vector<8x16x9xf32>
    %262 = vector.shape_cast %261 : vector<8x16x9xf32> to vector<128x9xf32>
    %263 = arith.truncf %262 : vector<128x9xf32> to vector<128x9xbf16>
    %c9 = arith.constant 9 : index
    %c0_137 = arith.constant 0 : index
    %c0_138 = arith.constant 0 : index
    %264 = vector.load %arg7[%c9, %c0_137, %c0_138] : memref<11x9x10xbf16, #tpu.memory_space<vmem>>, vector<1x9x10xbf16>
    %265 = vector.shape_cast %264 : vector<1x9x10xbf16> to vector<9x10xbf16>
    %cst_139 = arith.constant dense<0.000000e+00> : vector<128x10xf32>
    %266 = tpu.matmul %263, %265, %cst_139 {dimension_numbers = #tpu.dot_dimension_numbers<[1], [0], [0], [1], [0, 0, 1, 1], [], []>} : vector<128x9xbf16>, vector<9x10xbf16>, vector<128x10xf32> -> vector<128x10xf32>
    %267 = arith.addf %258, %266 : vector<128x10xf32>
    %cst_140 = arith.constant 0.000000e+00 : f32
    %268 = vector.broadcast %cst_140 : f32 to vector<8x5x9xf32>
    %269 = vector.extract_strided_slice %179 {offsets = [0, 5, 0], sizes = [8, 11, 9], strides = [1, 1, 1]} : vector<8x16x9xf32> to vector<8x11x9xf32>
    %270 = tpu.concatenate %269, %268 in 1 : vector<8x11x9xf32>, vector<8x5x9xf32> -> vector<8x16x9xf32>
    %271 = vector.shape_cast %270 : vector<8x16x9xf32> to vector<128x9xf32>
    %272 = arith.truncf %271 : vector<128x9xf32> to vector<128x9xbf16>
    %c10 = arith.constant 10 : index
    %c0_141 = arith.constant 0 : index
    %c0_142 = arith.constant 0 : index
    %273 = vector.load %arg7[%c10, %c0_141, %c0_142] : memref<11x9x10xbf16, #tpu.memory_space<vmem>>, vector<1x9x10xbf16>
    %274 = vector.shape_cast %273 : vector<1x9x10xbf16> to vector<9x10xbf16>
    %cst_143 = arith.constant dense<0.000000e+00> : vector<128x10xf32>
    %275 = tpu.matmul %272, %274, %cst_143 {dimension_numbers = #tpu.dot_dimension_numbers<[1], [0], [0], [1], [0, 0, 1, 1], [], []>} : vector<128x9xbf16>, vector<9x10xbf16>, vector<128x10xf32> -> vector<128x10xf32>
    %276 = arith.addf %267, %275 : vector<128x10xf32>
    %c0_144 = arith.constant 0 : index
    %c0_145 = arith.constant 0 : index
    %277 = vector.load %arg8[%c0_144, %c0_145] : memref<1x10xf32, #tpu.memory_space<vmem>>, vector<1x10xf32>
    %278 = vector.broadcast %277 : vector<1x10xf32> to vector<128x10xf32>
    %279 = arith.addf %276, %278 : vector<128x10xf32>
    %cst_146 = arith.constant 0.000000e+00 : f32
    %280 = vector.broadcast %cst_146 : f32 to vector<128x10xf32>
    %281 = arith.maximumf %279, %280 : vector<128x10xf32>
    %282 = vector.shape_cast %281 : vector<128x10xf32> to vector<8x16x10xf32>
    %cst_147 = arith.constant dense<0xFF800000> : vector<8x10xf32>
    %283 = vector.multi_reduction <maximumf>, %282, %cst_147 [1] : vector<8x16x10xf32> to vector<8x10xf32>
    %284 = arith.truncf %283 : vector<8x10xf32> to vector<8x10xbf16>
    %c0_148 = arith.constant 0 : index
    %c0_149 = arith.constant 0 : index
    %285 = vector.load %arg9[%c0_148, %c0_149] : memref<10x128xbf16, #tpu.memory_space<vmem>>, vector<10x128xbf16>
    %cst_150 = arith.constant dense<0.000000e+00> : vector<8x128xf32>
    %286 = tpu.matmul %284, %285, %cst_150 {dimension_numbers = #tpu.dot_dimension_numbers<[1], [0], [0], [1], [0, 0, 1, 1], [], []>} : vector<8x10xbf16>, vector<10x128xbf16>, vector<8x128xf32> -> vector<8x128xf32>
    %c0_151 = arith.constant 0 : index
    %c0_152 = arith.constant 0 : index
    %287 = vector.load %arg10[%c0_151, %c0_152] : memref<1x128xf32, #tpu.memory_space<vmem>>, vector<1x128xf32>
    %288 = vector.broadcast %287 : vector<1x128xf32> to vector<8x128xf32>
    %289 = arith.addf %286, %288 : vector<8x128xf32>
    %c0_153 = arith.constant 0 : index
    %c0_154 = arith.constant 0 : index
    %290 = vector.load %arg11[%c0_153, %c0_154] : memref<8x128xf32, #tpu.memory_space<vmem>>, vector<8x128xf32>
    tpu.vector_store %arg11[%c0_153, %c0_154], %289 {strides = array<i32>} : memref<8x128xf32, #tpu.memory_space<vmem>>, vector<8x128xf32>,
    return
  }
  func.func @transform_0(%arg0: i32) -> (i32, i32) {
    %c0_i32 = arith.constant 0 : i32
    %c0_i32_0 = arith.constant 0 : i32
    return %arg0, %c0_i32 : i32, i32
  }
  func.func @transform_1(%arg0: i32) -> (i32, i32) {
    %c0_i32 = arith.constant 0 : i32
    %c0_i32_0 = arith.constant 0 : i32
    %c0_i32_1 = arith.constant 0 : i32
    return %c0_i32, %c0_i32_0 : i32, i32
  }
  func.func @transform_2(%arg0: i32) -> (i32, i32, i32) {
    %c0_i32 = arith.constant 0 : i32
    %c0_i32_0 = arith.constant 0 : i32
    %c0_i32_1 = arith.constant 0 : i32
    %c0_i32_2 = arith.constant 0 : i32
    return %c0_i32, %c0_i32_0, %c0_i32_1 : i32, i32, i32
  }
  func.func @transform_3(%arg0: i32) -> (i32, i32) {
    %c0_i32 = arith.constant 0 : i32
    %c0_i32_0 = arith.constant 0 : i32
    %c0_i32_1 = arith.constant 0 : i32
    return %c0_i32, %c0_i32_0 : i32, i32
  }
  func.func @transform_4(%arg0: i32) -> (i32, i32, i32) {
    %c0_i32 = arith.constant 0 : i32
    %c0_i32_0 = arith.constant 0 : i32
    %c0_i32_1 = arith.constant 0 : i32
    %c0_i32_2 = arith.constant 0 : i32
    return %c0_i32, %c0_i32_0, %c0_i32_1 : i32, i32, i32
  }
  func.func @transform_5(%arg0: i32) -> (i32, i32) {
    %c0_i32 = arith.constant 0 : i32
    %c0_i32_0 = arith.constant 0 : i32
    %c0_i32_1 = arith.constant 0 : i32
    return %c0_i32, %c0_i32_0 : i32, i32
  }
  func.func @transform_6(%arg0: i32) -> (i32, i32, i32) {
    %c0_i32 = arith.constant 0 : i32
    %c0_i32_0 = arith.constant 0 : i32
    %c0_i32_1 = arith.constant 0 : i32
    %c0_i32_2 = arith.constant 0 : i32
    return %c0_i32, %c0_i32_0, %c0_i32_1 : i32, i32, i32
  }
  func.func @transform_7(%arg0: i32) -> (i32, i32) {
    %c0_i32 = arith.constant 0 : i32
    %c0_i32_0 = arith.constant 0 : i32
    %c0_i32_1 = arith.constant 0 : i32
    return %c0_i32, %c0_i32_0 : i32, i32
  }
  func.func @transform_8(%arg0: i32) -> (i32, i32) {
    %c0_i32 = arith.constant 0 : i32
    %c0_i32_0 = arith.constant 0 : i32
    %c0_i32_1 = arith.constant 0 : i32
    return %c0_i32, %c0_i32_0 : i32, i32
  }
  func.func @transform_9(%arg0: i32) -> (i32, i32) {
    %c0_i32 = arith.constant 0 : i32
    %c0_i32_0 = arith.constant 0 : i32
    %c0_i32_1 = arith.constant 0 : i32
    return %c0_i32, %c0_i32_0 : i32, i32
  }
  func.func @transform_10(%arg0: i32) -> (i32, i32) {
    %c0_i32 = arith.constant 0 : i32
    %c0_i32_0 = arith.constant 0 : i32
    return %arg0, %c0_i32 : i32, i32
  }
}

</mosaic_0001>

<bundles_post_ra>
// kernel: encoder_forward.1
= control target key start
LH: loop header
LB: loop body
LE: loop exit
PB: predicated region body
PF: predicated region fallthrough
CT: control target
= control target key end

     0   :  { %v5057_v0 = vmov 0   ;;  %v52_v21 = vlaneseq  ;;  %v5058_v24 = vmov 0.0   ;;  %vm174_vm4 = vcmask 261120   ;;  %s7872_s0 = inlined_call_operand.vmem [shape: s32[128,1], index: 0, kind: input, shape index: {}]   ;;  %s7873_s1 = inlined_call_operand.vmem [shape: bf16[32,8], index: 1, kind: input, shape index: {}]   ;;  %s7874_s2 = inlined_call_operand.vmem [shape: bf16[9,8,9], index: 2, kind: input, shape index: {}]   ;;  %s7875_s4 = inlined_call_operand.vmem [shape: bf16[9,9,9], index: 4, kind: input, shape index: {}]   ;;  %s7876_s3 = inlined_call_operand.vmem [shape: f32[1,9], index: 3, kind: input, shape index: {}]   ;;  %s7877_s6 = inlined_call_operand.vmem [shape: bf16[11,9,10], index: 6, kind: input, shape index: {}]   ;;  %s7878_s5 = inlined_call_operand.vmem [shape: f32[1,9], index: 5, kind: input, shape index: {}]   ;;  %s7879_s7 = inlined_call_operand.vmem [shape: f32[1,10], index: 7, kind: input, shape index: {}]   ;;  %s7880_s8 = inlined_call_operand.vmem [shape: bf16[10,128], index: 8, kind: input, shape index: {}]   ;;  %s7881_s9 = inlined_call_operand.vmem [shape: f32[1,128], index: 9, kind: input, shape index: {}]   ;;  %s7882_s10 = inlined_call_operand.vmem [shape: f32[8,128], index: 10, kind: output, shape index: {}]  }
   0x1   :  { %5051 = vset.pattern.permute.xlu1 %v5057_v0  ;;  %5050 = vset.pattern.permute.xlu0 %v5057_v0  ;;  %v38_v1 = vld [vmem:[%s7872_s0 + $0x10] sm:$0xff]  ;;  %v36_v2 = vld [vmem:[%s7872_s0] sm:$0xff]  ;;  %v39_v4 = vld [vmem:[%s7872_s0 + $0x18] sm:$0xff] }
   0x2   :  { %61 = vperm.xlu1 %5051, %v38_v1   ;;  %55 = vperm.xlu0 %5050, %v36_v2   ;;  %v40_v3 = vld [vmem:[%s7872_s0 + $0x20] sm:$0xff]  ;;  %v37_v5 = vld [vmem:[%s7872_s0 + $0x8] sm:$0xff]  ;;  %v43_v7 = vld [vmem:[%s7872_s0 + $0x38] sm:$0xff]  ;;  %v53_v22 = vand.u32 127, %v52_v21 }
   0x3   :  { %5052 = vset.pattern.permute.xlu2 %v5057_v0  ;;  %v41_v6 = vld [vmem:[%s7872_s0 + $0x28] sm:$0xff]  ;;  %v42_v8 = vld [vmem:[%s7872_s0 + $0x30] sm:$0xff]  ;;  %v44_v9 = vld [vmem:[%s7872_s0 + $0x40] sm:$0xff] }
   0x4   :  { %67 = vperm.xlu2 %5052, %v40_v3   ;;  %v46_v10 = vld [vmem:[%s7872_s0 + $0x50] sm:$0xff]  ;;  %v45_v11 = vld [vmem:[%s7872_s0 + $0x48] sm:$0xff]  ;;  %v47_v12 = vld [vmem:[%s7872_s0 + $0x58] sm:$0xff] }
   0x5   :  { %v49_v13 = vld [vmem:[%s7872_s0 + $0x68] sm:$0xff]  ;;  %v48_v14 = vld [vmem:[%s7872_s0 + $0x60] sm:$0xff]  ;;  %v50_v15 = vld [vmem:[%s7872_s0 + $0x70] sm:$0xff] }
   0x6   :  { %v51_v16 = vld [vmem:[%s7872_s0 + $0x78] sm:$0xff]  ;;  %v5023_v17 = vld [vmem:[%s7873_s1 + $0x8] sm:$0xff]  ;;  %v5022_v18 = vld [vmem:[%s7873_s1] sm:$0xff] }
   0x7   :  { %205 = vmatpush.bf16.msra.mxu0 %v5023_v17  ;;  %v4661_v62 = vld [vmem:[%s7874_s2 + $0x4] sm:$0xf]  ;;  %v321_v63 = vld [vmem:[%s7874_s2] sm:$0xf] }
   0xa   :  { %64 = vperm.xlu1 %5051, %v39_v4   ;;  %58 = vperm.xlu0 %5050, %v37_v5  }
   0xb   :  { %206 = vmatpush.bf16.msra.mxu0 %v5022_v18 }
   0xc   :  { %70 = vperm.xlu2 %5052, %v41_v6  }
  0x12   :  { %76 = vperm.xlu1 %5051, %v43_v7   ;;  %73 = vperm.xlu0 %5050, %v42_v8  }
  0x14   :  { %79 = vperm.xlu2 %5052, %v44_v9  }
  0x1a   :  { %85 = vperm.xlu1 %5051, %v46_v10   ;;  %82 = vperm.xlu0 %5050, %v45_v11  }
  0x1c   :  { %88 = vperm.xlu2 %5052, %v47_v12  }
  0x22   :  { %94 = vperm.xlu1 %5051, %v49_v13   ;;  %91 = vperm.xlu0 %5050, %v48_v14  }
  0x24   :  { %97 = vperm.xlu2 %5052, %v50_v15  }
  0x2a   :  { %100 = vperm.xlu0 %5050, %v51_v16  }
  0x5e   :  { %v68_v19 = vpop.permute.xlu2 %67 }
  0x5f   :  { %vm106_vm12 = vcmp.eq.s32.totalorder %v68_v19, %v53_v22 }
  0x60   :  { %v4633_v53 = vsel %vm106_vm12, 1.0, %v5058_v24  ;;  %vm4587_vm12 = vcmask 1042434  }
  0x66   :  { %v71_v20 = vpop.permute.xlu2 %70 }
  0x67   :  { %vm107_vm13 = vcmp.eq.s32.totalorder %v71_v20, %v53_v22  ;;  %v4714_v20 = vld [vmem:[%s7874_s2 + $0x18] sm:$0xf] }
  0x68   :  { %v4634_v54 = vsel %vm107_vm13, 1.0, %v5058_v24  ;;  %vm4589_vm13 = vcmask 1043459  }
  0x69   :  { %v152_v57 = vpack.c.bf16 %v4634_v54, %v4633_v53 }
  0x6e   :  { %v80_v23 = vpop.permute.xlu2 %79 }
  0x6f   :  { %vm110_vm0 = vcmp.eq.s32.totalorder %v80_v23, %v53_v22 }
  0x70   :  { %v4637_v25 = vsel %vm110_vm0, 1.0, %v5058_v24 }
  0x74   :  { %v62_v26 = vpop.permute.xlu1 %61  ;;  %v56_v27 = vpop.permute.xlu0 %55 }
  0x75   :  { %vm102_vm2 = vcmp.eq.s32.totalorder %v56_v27, %v53_v22  ;;  %vm104_vm6 = vcmp.eq.s32.totalorder %v62_v26, %v53_v22 }
  0x76   :  { %v89_v28 = vpop.permute.xlu2 %88  ;;  %v4629_v32 = vsel %vm102_vm2, 1.0, %v5058_v24  ;;  %v4631_v39 = vsel %vm104_vm6, 1.0, %v5058_v24  ;;  %vm322_vm2 = vcmask 1042432   ;;  %vm685_vm6 = vcmask 1040384  }
  0x77   :  { %vm113_vm1 = vcmp.eq.s32.totalorder %v89_v28, %v53_v22 }
  0x78   :  { %v4640_v29 = vsel %vm113_vm1, 1.0, %v5058_v24  ;;  %vm264_vm1 = vcmask 1043456  }
  0x79   :  { %v407_v0 = vsel %vm264_vm1, %v4661_v62, 0  ;;  %v483_v1 = vsel %vm264_vm1, %v321_v63, 0  ;;  %v1173_v23 = vsel %vm264_vm1, %v4714_v20, 0 }
  0x7a   :  { %416 = vmatpush.bf16.msrb.mxu0 %v407_v0  ;;  %492 = vmatpush.bf16.msra.mxu2 %v483_v1 }
  0x7b   :  { %5045 = vmatpush.bf16.msra.mxu1 %v407_v0  ;;  %5046 = vmatpush.bf16.msra.mxu3 %v483_v1 }
  0x7c   :  { %v65_v30 = vpop.permute.xlu1 %64  ;;  %v59_v31 = vpop.permute.xlu0 %58 }
  0x7d   :  { %vm103_vm3 = vcmp.eq.s32.totalorder %v59_v31, %v53_v22  ;;  %vm105_vm7 = vcmp.eq.s32.totalorder %v65_v30, %v53_v22 }
  0x7e   :  { %v4630_v33 = vsel %vm103_vm3, 1.0, %v5058_v24  ;;  %v98_v34 = vpop.permute.xlu2 %97  ;;  %v4632_v40 = vsel %vm105_vm7, 1.0, %v5058_v24  ;;  %vm381_vm3 = vcmask 64512   ;;  %vm938_vm7 = vcmask 1046528  }
  0x7f   :  { %v150_v35 = vpack.c.bf16 %v4630_v33, %v4629_v32  ;;  %vm116_vm5 = vcmp.eq.s32.totalorder %v98_v34, %v53_v22  ;;  %v151_v45 = vpack.c.bf16 %v4632_v40, %v4631_v39  ;;  %v4696_v33 = vld [vmem:[%s7874_s2 + $0x10] sm:$0xf] }
  0x80   :  { %v4643_v36 = vsel %vm116_vm5, 1.0, %v5058_v24  ;;  %v871_v34 = vsel %vm264_vm1, %v4696_v33, 0  ;;  %vm534_vm5 = vcmask 1041408  }
  0x81   :  { %4653 = vmatmul.msk.bf16.vlgmr.msra.gmra.mxu0 %vm174_vm4, %v150_v35  ;;  %880 = vmatpush.bf16.msrb.mxu2 %v871_v34 }
  0x82   :  { %1182 = vmatpush.bf16.msra.mxu0 %v1173_v23 }
  0x84   :  { %v77_v37 = vpop.permute.xlu1 %76  ;;  %v74_v38 = vpop.permute.xlu0 %73 }
  0x85   :  { %vm109_vm15 = vcmp.eq.s32.totalorder %v77_v37, %v53_v22  ;;  %vm108_vm0 = vcmp.eq.s32.totalorder %v74_v38, %v53_v22  ;;  %v4687_v38 = vld [vmem:[%s7874_s2 + $0xc] sm:$0xf] }
  0x86   :  { %v4636_v59 = vsel %vm109_vm15, 1.0, %v5058_v24  ;;  %v4635_v60 = vsel %vm108_vm0, 1.0, %v5058_v24  ;;  %vm4593_vm15 = vcmask 1045509   ;;  %vm4595_vm0 = vcmask 1046534  }
  0x87   :  { %v153_v61 = vpack.c.bf16 %v4636_v59, %v4635_v60 }
  0x8c   :  { %v86_v41 = vpop.permute.xlu1 %85  ;;  %v83_v42 = vpop.permute.xlu0 %82 }
  0x8d   :  { %vm112_vm8 = vcmp.eq.s32.totalorder %v86_v41, %v53_v22  ;;  %vm111_vm9 = vcmp.eq.s32.totalorder %v83_v42, %v53_v22  ;;  %v769_v41 = vsel %vm264_vm1, %v4687_v38, 0 }
  0x8e   :  { %v4639_v43 = vsel %vm112_vm8, 1.0, %v5058_v24  ;;  %v4638_v44 = vsel %vm111_vm9, 1.0, %v5058_v24  ;;  %778 = vmatpush.bf16.msrb.mxu1 %v769_v41  ;;  %vm1240_vm8 = vcmask 1044480   ;;  %vm1683_vm9 = vcmask 72704  }
  0x8f   :  { %v155_v46 = vpack.c.bf16 %v4640_v29, %v4639_v43  ;;  %v154_v47 = vpack.c.bf16 %v4638_v44, %v4637_v25 }
  0x91   :  { %4654 = vmatmul.msk.bf16.gmra.mxu0 %vm174_vm4, %v151_v45 }
  0x94   :  { %v95_v48 = vpop.permute.xlu1 %94  ;;  %v92_v49 = vpop.permute.xlu0 %91 }
  0x95   :  { %vm115_vm10 = vcmp.eq.s32.totalorder %v95_v48, %v53_v22  ;;  %vm114_vm11 = vcmp.eq.s32.totalorder %v92_v49, %v53_v22 }
  0x96   :  { %v4642_v50 = vsel %vm115_vm10, 1.0, %v5058_v24  ;;  %v4641_v51 = vsel %vm114_vm11, 1.0, %v5058_v24  ;;  %vm4482_vm10 = vcmask 80896   ;;  %vm4585_vm11 = vcmask 1041409  }
  0x97   :  { %v156_v52 = vpack.c.bf16 %v4642_v50, %v4641_v51 }
  0x9c   :  { %v101_v55 = vpop.permute.xlu0 %100 }
  0x9d   :  { %vm117_vm14 = vcmp.eq.s32.totalorder %v101_v55, %v53_v22 }
  0x9e   :  { %v4644_v56 = vsel %vm117_vm14, 1.0, %v5058_v24  ;;  %vm4591_vm14 = vcmask 1044484  }
  0x9f   :  { %v157_v58 = vpack.c.bf16 %v4644_v56, %v4643_v36 }
  0xa1   :  { %4655 = vmatmul.msk.bf16.gmra.mxu0 %vm174_vm4, %v152_v57 }
  0xb1   :  { %4656 = vmatmul.msk.bf16.gmra.mxu0 %vm174_vm4, %v153_v61 }
  0xc1   :  { %4657 = vmatmul.msk.bf16.gmra.mxu0 %vm174_vm4, %v154_v47 }
  0xd1   :  { %4658 = vmatmul.msk.bf16.gmra.mxu0 %vm174_vm4, %v155_v46 }
  0xe1   :  { %4659 = vmatmul.msk.bf16.gmra.mxu0 %vm174_vm4, %v156_v52 }
  0xf1   :  { %4660 = vmatmul.msk.bf16.gmra.mxu0 %vm174_vm4, %v157_v58  ;;  %vm1089_vm4 = vcmask 1045504  }
  0xfe   :  { %v5185_v2 = vpop.f32.mrf.mxu0 }
  0xff   :  { %v323_v3 = vrot.slane %v5185_v2, 5  ;;  %v265_v4 = vrot.slane %v5185_v2, 4  ;;  %v1090_v55 = vrot.slane %v5185_v2, 2 }
 0x101   :  { %v363_v8 = vsel %vm322_vm2, 0.0, %v323_v3  ;;  %v305_v11 = vsel %vm264_vm1, 0.0, %v265_v4 }
 0x106   :  { %v5189_v5 = vpop.f32.mrf.mxu0 }
 0x107   :  { %v324_v6 = vrot.slane %v5189_v5, 5  ;;  %v266_v7 = vrot.slane %v5189_v5, 4  ;;  %v1091_v52 = vrot.slane %v5189_v5, 2 }
 0x109   :  { %v325_v9 = vsel %vm322_vm2, %v323_v3, %v324_v6  ;;  %v5196_v10 = vsel %vm264_vm1, %v265_v4, %v266_v7  ;;  %v5200_v12 = vsel %vm264_vm1, %v266_v7, 0.0  ;;  %v1092_v59 = vsel %vm1089_vm4, %v1090_v55, %v1091_v52  ;;  %v4678_v7 = vld [vmem:[%s7874_s2 + $0x8] sm:$0xf] }
 0x10a   :  { %v371_v13 = vpack.c.bf16 %v325_v9, %v363_v8  ;;  %v313_v14 = vpack.c.bf16 %v5196_v10, %v305_v11  ;;  %v1407_v15 = vpack.c.bf16 %v5200_v12, %v5196_v10  ;;  %v1130_v60 = vsel %vm1089_vm4, %v1091_v52, 0.0 }
 0x10b   :  { %v1138_v6 = vpack.c.bf16 %v1130_v60, %v1092_v59  ;;  %v618_v8 = vsel %vm264_vm1, %v4678_v7, 0  ;;  %v5059_v60 = vmov 65535  }
 0x10c   :  { %4662 = vmatmul.msk.bf16.vlgmr.msrb.gmra.mxu0 %vm381_vm3, %v371_v13  ;;  %4670 = vmatmul.msk.bf16.vlgmr.msra.gmra.mxu2 %vm381_vm3, %v313_v14 }
 0x10d   :  { %627 = vmatpush.bf16.msrb.mxu3 %v618_v8 }
 0x10e   :  { %v5207_v16 = vpop.f32.mrf.mxu0 }
 0x10f   :  { %v326_v17 = vrot.slane %v5207_v16, 5  ;;  %v268_v18 = vrot.slane %v5207_v16, 4 }
 0x111   :  { %v364_v24 = vsel %vm322_vm2, 0.0, %v326_v17  ;;  %v306_v27 = vsel %vm264_vm1, 0.0, %v268_v18 }
 0x116   :  { %v5211_v19 = vpop.f32.mrf.mxu0 }
 0x117   :  { %v327_v21 = vrot.slane %v5211_v19, 5  ;;  %v269_v22 = vrot.slane %v5211_v19, 4  ;;  %v1094_v13 = vrot.slane %v5211_v19, 2 }
 0x119   :  { %v328_v25 = vsel %vm322_vm2, %v326_v17, %v327_v21  ;;  %v5222_v26 = vsel %vm264_vm1, %v268_v18, %v269_v22  ;;  %v5226_v28 = vsel %vm264_vm1, %v269_v22, 0.0  ;;  %v1093_v18 = vrot.slane %v5207_v16, 2 }
 0x11a   :  { %v372_v29 = vpack.c.bf16 %v328_v25, %v364_v24  ;;  %v314_v30 = vpack.c.bf16 %v5222_v26, %v306_v27  ;;  %v1408_v31 = vpack.c.bf16 %v5226_v28, %v5222_v26  ;;  %v1131_v24 = vsel %vm1089_vm4, %v1094_v13, 0.0 }
 0x11b   :  { %v1095_v23 = vsel %vm1089_vm4, %v1093_v18, %v1094_v13 }
 0x11c   :  { %4663 = vmatmul.msk.bf16.gmra.mxu0 %vm381_vm3, %v372_v29  ;;  %4671 = vmatmul.msk.bf16.gmra.mxu2 %vm381_vm3, %v314_v30 }
 0x11e   :  { %v5233_v32 = vpop.f32.mrf.mxu0 }
 0x11f   :  { %v329_v35 = vrot.slane %v5233_v32, 5  ;;  %v271_v36 = vrot.slane %v5233_v32, 4 }
 0x121   :  { %v365_v42 = vsel %vm322_vm2, 0.0, %v329_v35  ;;  %v307_v45 = vsel %vm264_vm1, 0.0, %v271_v36 }
 0x126   :  { %v5241_v37 = vpop.f32.mrf.mxu0 }
 0x127   :  { %v330_v39 = vrot.slane %v5241_v37, 5  ;;  %v272_v40 = vrot.slane %v5241_v37, 4 }
 0x129   :  { %v331_v43 = vsel %vm322_vm2, %v329_v35, %v330_v39  ;;  %v5252_v44 = vsel %vm264_vm1, %v271_v36, %v272_v40  ;;  %v5256_v46 = vsel %vm264_vm1, %v272_v40, 0.0  ;;  %v1139_v36 = vpack.c.bf16 %v1131_v24, %v1095_v23 }
 0x12a   :  { %v373_v47 = vpack.c.bf16 %v331_v43, %v365_v42  ;;  %v315_v48 = vpack.c.bf16 %v5252_v44, %v307_v45  ;;  %v1409_v49 = vpack.c.bf16 %v5256_v46, %v5252_v44  ;;  %v1097_v40 = vrot.slane %v5241_v37, 2 }
 0x12b   :  { %v1096_v43 = vrot.slane %v5233_v32, 2 }
 0x12c   :  { %4664 = vmatmul.msk.bf16.gmra.mxu0 %vm381_vm3, %v373_v47  ;;  %4672 = vmatmul.msk.bf16.gmra.mxu2 %vm381_vm3, %v315_v48  ;;  %v1132_v52 = vsel %vm1089_vm4, %v1097_v40, 0.0 }
 0x12e   :  { %v5263_v50 = vpop.f32.mrf.mxu0 }
 0x12f   :  { %v332_v51 = vrot.slane %v5263_v50, 5  ;;  %v274_v53 = vrot.slane %v5263_v50, 4 }
 0x131   :  { %v366_v58 = vsel %vm322_vm2, 0.0, %v332_v51  ;;  %v308_v63 = vsel %vm264_vm1, 0.0, %v274_v53 }
 0x136   :  { %v5268_v54 = vpop.f32.mrf.mxu0 }
 0x137   :  { %v333_v56 = vrot.slane %v5268_v54, 5  ;;  %v275_v57 = vrot.slane %v5268_v54, 4 }
 0x139   :  { %v334_v61 = vsel %vm322_vm2, %v332_v51, %v333_v56  ;;  %v5278_v62 = vsel %vm264_vm1, %v274_v53, %v275_v57  ;;  %v5282_v0 = vsel %vm264_vm1, %v275_v57, 0.0  ;;  %v1098_v51 = vsel %vm1089_vm4, %v1096_v43, %v1097_v40  ;;  %v4705_v40 = vld [vmem:[%s7874_s2 + $0x14] sm:$0xf] }
 0x13a   :  { %v374_v1 = vpack.c.bf16 %v334_v61, %v366_v58  ;;  %v316_v3 = vpack.c.bf16 %v5278_v62, %v308_v63  ;;  %v1410_v4 = vpack.c.bf16 %v5282_v0, %v5278_v62  ;;  %v836_v61 = vpack.c.bf16 %v5189_v5, %v5185_v2 }
 0x13b   :  { %v1140_v63 = vpack.c.bf16 %v1132_v52, %v1098_v51  ;;  %v1022_v43 = vsel %vm264_vm1, %v4705_v40, 0  ;;  %v535_v40 = vrot.slane %v5185_v2, 6  ;;  %v942_v62 = vrot.slane %v5207_v16, 1 }
 0x13c   :  { %4665 = vmatmul.msk.bf16.vlgmr.msra.gmra.mxu1 %vm381_vm3, %v374_v1  ;;  %4673 = vmatmul.msk.bf16.gmra.mxu2 %vm381_vm3, %v316_v3  ;;  %v1244_v0 = vrot.slane %v5207_v16, 3 }
 0x13d   :  { %4715 = vmatmul.msk.bf16.vlgmr.msra.gmra.mxu0 %vm381_vm3, %v1138_v6  ;;  %v1100_v6 = vrot.slane %v5268_v54, 2 }
 0x13e   :  { %v5294_v9 = vpop.f32.mrf.mxu0 }
 0x13f   :  { %v335_v11 = vrot.slane %v5294_v9, 5  ;;  %v277_v14 = vrot.slane %v5294_v9, 4 }
 0x141   :  { %v367_v22 = vsel %vm322_vm2, 0.0, %v335_v11  ;;  %v309_v29 = vsel %vm264_vm1, 0.0, %v277_v14 }
 0x146   :  { %v5299_v17 = vpop.f32.mrf.mxu0 }
 0x147   :  { %v336_v20 = vrot.slane %v5299_v17, 5  ;;  %v278_v21 = vrot.slane %v5299_v17, 4 }
 0x149   :  { %v337_v25 = vsel %vm322_vm2, %v335_v11, %v336_v20  ;;  %v5309_v27 = vsel %vm264_vm1, %v277_v14, %v278_v21  ;;  %v5313_v30 = vsel %vm264_vm1, %v278_v21, 0.0  ;;  %v1099_v11 = vrot.slane %v5263_v50, 2 }
 0x14a   :  { %v375_v33 = vpack.c.bf16 %v337_v25, %v367_v22  ;;  %v317_v34 = vpack.c.bf16 %v5309_v27, %v309_v29  ;;  %v1411_v35 = vpack.c.bf16 %v5313_v30, %v5309_v27  ;;  %v1133_v21 = vsel %vm1089_vm4, %v1100_v6, 0.0 }
 0x14b   :  { %v1101_v20 = vsel %vm1089_vm4, %v1099_v11, %v1100_v6  ;;  %v1247_v27 = vrot.slane %v5233_v32, 3 }
 0x14c   :  { %4666 = vmatmul.msk.bf16.gmra.mxu1 %vm381_vm3, %v375_v33  ;;  %4674 = vmatmul.msk.bf16.gmra.mxu2 %vm381_vm3, %v317_v34 }
 0x14d   :  { %4716 = vmatmul.msk.bf16.gmra.mxu0 %vm381_vm3, %v1139_v36  ;;  %v837_v36 = vpack.c.bf16 %v5211_v19, %v5207_v16 }
 0x14e   :  { %v5321_v38 = vpop.f32.mrf.mxu0 }
 0x14f   :  { %v338_v39 = vrot.slane %v5321_v38, 5  ;;  %v280_v41 = vrot.slane %v5321_v38, 4 }
 0x151   :  { %v368_v48 = vsel %vm322_vm2, 0.0, %v338_v39  ;;  %v310_v56 = vsel %vm264_vm1, 0.0, %v280_v41 }
 0x156   :  { %v5326_v42 = vpop.f32.mrf.mxu0 }
 0x157   :  { %v339_v45 = vrot.slane %v5326_v42, 5  ;;  %v281_v47 = vrot.slane %v5326_v42, 4 }
 0x159   :  { %v340_v53 = vsel %vm322_vm2, %v338_v39, %v339_v45  ;;  %v5336_v55 = vsel %vm264_vm1, %v280_v41, %v281_v47  ;;  %v5340_v57 = vsel %vm264_vm1, %v281_v47, 0.0  ;;  %v1141_v39 = vpack.c.bf16 %v1133_v21, %v1101_v20  ;;  %v4732_v45 = vld [vmem:[%s7874_s2 + $0x20] sm:$0xf]  ;;  %v4723_v47 = vld [vmem:[%s7874_s2 + $0x1c] sm:$0xf] }
 0x15a   :  { %v376_v58 = vpack.c.bf16 %v340_v53, %v368_v48  ;;  %v318_v59 = vpack.c.bf16 %v5336_v55, %v310_v56  ;;  %v1442_v48 = vsel %vm264_vm1, %v4732_v45, 0  ;;  %v1324_v51 = vsel %vm264_vm1, %v4723_v47, 0 }
 0x15b   :  { %1451 = vmatpush.bf16.msra.mxu2 %v1442_v48  ;;  %1333 = vmatpush.bf16.msra.mxu1 %v1324_v51  ;;  %v1103_v53 = vrot.slane %v5299_v17, 2  ;;  %v1105_v45 = vrot.slane %v5321_v38, 2 }
 0x15c   :  { %4667 = vmatmul.msk.bf16.gmra.mxu1 %vm381_vm3, %v376_v58  ;;  %4675 = vmatmul.msk.bf16.vlgmr.msra.gmra.mxu3 %vm381_vm3, %v318_v59  ;;  %v1102_v59 = vrot.slane %v5294_v9, 2 }
 0x15d   :  { %4697 = vmatmul.msk.bf16.vlgmr.msrb.gmra.mxu2 %vm381_vm3, %v836_v61  ;;  %4717 = vmatmul.msk.bf16.gmra.mxu0 %vm381_vm3, %v1140_v63 }
 0x15e   :  { %v5351_v1 = vpop.f32.mrf.mxu0  ;;  %1031 = vmatpush.bf16.msra.mxu3 %v1022_v43  ;;  %v1104_v6 = vsel %vm1089_vm4, %v1102_v59, %v1103_v53  ;;  %v686_v43 = vrot.slane %v5185_v2, 7 }
 0x15f   :  { %v341_v3 = vrot.slane %v5351_v1, 5  ;;  %v283_v7 = vrot.slane %v5351_v1, 4 }
 0x161   :  { %v369_v18 = vsel %vm322_vm2, 0.0, %v341_v3  ;;  %v311_v24 = vsel %vm264_vm1, 0.0, %v283_v7 }
 0x166   :  { %v5356_v8 = vpop.f32.mrf.mxu0 }
 0x167   :  { %v342_v13 = vrot.slane %v5356_v8, 5  ;;  %v284_v14 = vrot.slane %v5356_v8, 4 }
 0x169   :  { %v343_v22 = vsel %vm322_vm2, %v341_v3, %v342_v13  ;;  %v5366_v23 = vsel %vm264_vm1, %v283_v7, %v284_v14  ;;  %v5370_v25 = vsel %vm264_vm1, %v284_v14, 0.0  ;;  %v1134_v7 = vsel %vm1089_vm4, %v1103_v53, 0.0 }
 0x16a   :  { %v377_v29 = vpack.c.bf16 %v343_v22, %v369_v18  ;;  %v319_v33 = vpack.c.bf16 %v5366_v23, %v311_v24  ;;  %v838_v24 = vpack.c.bf16 %v5241_v37, %v5233_v32  ;;  %v575_v53 = vsel %vm534_vm5, 0.0, %v535_v40 }
 0x16c   :  { %4668 = vmatmul.msk.bf16.gmra.mxu1 %vm381_vm3, %v377_v29  ;;  %4676 = vmatmul.msk.bf16.gmra.mxu3 %vm381_vm3, %v319_v33  ;;  %v1142_v29 = vpack.c.bf16 %v1134_v7, %v1104_v6  ;;  %v536_v33 = vrot.slane %v5189_v5, 6  ;;  %v539_v7 = vrot.slane %v5211_v19, 6 }
 0x16d   :  { %4698 = vmatmul.msk.bf16.gmra.mxu2 %vm381_vm3, %v837_v36  ;;  %4718 = vmatmul.msk.bf16.gmra.mxu0 %vm381_vm3, %v1141_v39  ;;  %v687_v36 = vrot.slane %v5189_v5, 7  ;;  %v1106_v39 = vrot.slane %v5326_v42, 2 }
 0x16e   :  { %v5384_v41 = vpop.f32.mrf.mxu0  ;;  %v537_v47 = vsel %vm534_vm5, %v535_v40, %v536_v33 }
 0x16f   :  { %v344_v52 = vrot.slane %v5384_v41, 5  ;;  %v286_v56 = vrot.slane %v5384_v41, 4  ;;  %v688_v48 = vsel %vm685_vm6, %v686_v43, %v687_v36  ;;  %v1107_v51 = vsel %vm1089_vm4, %v1105_v45, %v1106_v39 }
 0x170   :  { %v583_v59 = vpack.c.bf16 %v537_v47, %v575_v53 }
 0x171   :  { %v370_v3 = vsel %vm322_vm2, 0.0, %v344_v52  ;;  %v312_v14 = vsel %vm264_vm1, 0.0, %v286_v56 }
 0x176   :  { %v5398_v58 = vpop.f32.mrf.mxu0 }
 0x177   :  { %v345_v61 = vrot.slane %v5398_v58, 5  ;;  %v287_v63 = vrot.slane %v5398_v58, 4 }
 0x179   :  { %v346_v11 = vsel %vm322_vm2, %v344_v52, %v345_v61  ;;  %v5408_v13 = vsel %vm264_vm1, %v286_v56, %v287_v63  ;;  %v5412_v18 = vsel %vm264_vm1, %v287_v63, 0.0  ;;  %v1135_v52 = vsel %vm1089_vm4, %v1106_v39, 0.0 }
 0x17a   :  { %v378_v20 = vpack.c.bf16 %v346_v11, %v370_v3  ;;  %v320_v21 = vpack.c.bf16 %v5408_v13, %v312_v14  ;;  %v726_v56 = vsel %vm685_vm6, 0.0, %v686_v43  ;;  %v839_v63 = vpack.c.bf16 %v5268_v54, %v5263_v50 }
 0x17b   :  { %v734_v61 = vpack.c.bf16 %v688_v48, %v726_v56  ;;  %v1143_v3 = vpack.c.bf16 %v1135_v52, %v1107_v51  ;;  %v690_v11 = vrot.slane %v5211_v19, 7  ;;  %v1109_v14 = vrot.slane %v5356_v8, 2 }
 0x17c   :  { %4669 = vmatmul.msk.bf16.gmra.mxu1 %vm381_vm3, %v378_v20  ;;  %4677 = vmatmul.msk.bf16.gmra.mxu3 %vm381_vm3, %v320_v21  ;;  %v538_v20 = vrot.slane %v5207_v16, 6  ;;  %v689_v21 = vrot.slane %v5207_v16, 7  ;;  %v840_v51 = vpack.c.bf16 %v5299_v17, %v5294_v9  ;;  %v542_v56 = vrot.slane %v5241_v37, 6 }
 0x17d   :  { %4699 = vmatmul.msk.bf16.gmra.mxu2 %vm381_vm3, %v838_v24  ;;  %4719 = vmatmul.msk.bf16.gmra.mxu0 %vm381_vm3, %v1142_v29  ;;  %v1108_v24 = vrot.slane %v5351_v1, 2  ;;  %v1136_v40 = vsel %vm1089_vm4, %v1109_v14, 0.0 }
 0x17e   :  { %v540_v33 = vsel %vm534_vm5, %v538_v20, %v539_v7  ;;  %v691_v36 = vsel %vm685_vm6, %v689_v21, %v690_v11  ;;  %v576_v43 = vsel %vm534_vm5, 0.0, %v538_v20  ;;  %v727_v45 = vsel %vm685_vm6, 0.0, %v689_v21 }
 0x17f   :  { %v1110_v39 = vsel %vm1089_vm4, %v1108_v24, %v1109_v14  ;;  %v584_v47 = vpack.c.bf16 %v540_v33, %v576_v43  ;;  %v735_v48 = vpack.c.bf16 %v691_v36, %v727_v45  ;;  %v1111_v7 = vrot.slane %v5384_v41, 2 }
 0x180   :  { %v1144_v52 = vpack.c.bf16 %v1136_v40, %v1110_v39  ;;  %v841_v43 = vpack.c.bf16 %v5326_v42, %v5321_v38 }
 0x18c   :  { %4679 = vmatmul.msk.bf16.vlgmr.msrb.gmra.mxu3 %vm381_vm3, %v583_v59  ;;  %4688 = vmatmul.msk.bf16.vlgmr.msrb.gmra.mxu1 %vm381_vm3, %v734_v61  ;;  %v693_v59 = vrot.slane %v5241_v37, 7  ;;  %v1112_v61 = vrot.slane %v5398_v58, 2 }
 0x18d   :  { %4700 = vmatmul.msk.bf16.gmra.mxu2 %vm381_vm3, %v839_v63  ;;  %4720 = vmatmul.msk.bf16.gmra.mxu0 %vm381_vm3, %v1143_v3  ;;  %v541_v63 = vrot.slane %v5233_v32, 6  ;;  %v692_v3 = vrot.slane %v5233_v32, 7 }
 0x18e   :  { %v1113_v21 = vsel %vm1089_vm4, %v1111_v7, %v1112_v61  ;;  %v1137_v24 = vsel %vm1089_vm4, %v1112_v61, 0.0 }
 0x18f   :  { %v5441_v6 = vpop.f32.mrf.mxu2  ;;  %v543_v14 = vsel %vm534_vm5, %v541_v63, %v542_v56  ;;  %v694_v20 = vsel %vm685_vm6, %v692_v3, %v693_v59  ;;  %v577_v33 = vsel %vm534_vm5, 0.0, %v541_v63  ;;  %v728_v36 = vsel %vm685_vm6, 0.0, %v692_v3 }
 0x190   :  { %v585_v39 = vpack.c.bf16 %v543_v14, %v577_v33  ;;  %v736_v40 = vpack.c.bf16 %v694_v20, %v728_v36  ;;  %v1145_v45 = vpack.c.bf16 %v1137_v24, %v1113_v21  ;;  %v695_v56 = vrot.slane %v5263_v50, 7 }
 0x191   :  { %v842_v24 = vpack.c.bf16 %v5356_v8, %v5351_v1 }
 0x192   :  { %v729_v14 = vsel %vm685_vm6, 0.0, %v695_v56 }
 0x197   :  { %v5449_v29 = vpop.f32.mrf.mxu2 }
 0x19c   :  { %4680 = vmatmul.msk.bf16.gmra.mxu3 %vm381_vm3, %v584_v47  ;;  %4689 = vmatmul.msk.bf16.gmra.mxu1 %vm381_vm3, %v735_v48  ;;  %v545_v48 = vrot.slane %v5268_v54, 6 }
 0x19d   :  { %4701 = vmatmul.msk.bf16.gmra.mxu2 %vm381_vm3, %v840_v51  ;;  %4721 = vmatmul.msk.bf16.gmra.mxu0 %vm381_vm3, %v1144_v52  ;;  %v696_v51 = vrot.slane %v5268_v54, 7  ;;  %v544_v52 = vrot.slane %v5263_v50, 6 }
 0x19f   :  { %v5463_v53 = vpop.f32.mrf.mxu2  ;;  %v546_v61 = vsel %vm534_vm5, %v544_v52, %v545_v48  ;;  %v697_v63 = vsel %vm685_vm6, %v695_v56, %v696_v51  ;;  %v578_v7 = vsel %vm534_vm5, 0.0, %v544_v52  ;;  %v698_v48 = vrot.slane %v5294_v9, 7 }
 0x1a0   :  { %v586_v20 = vpack.c.bf16 %v546_v61, %v578_v7  ;;  %v737_v21 = vpack.c.bf16 %v697_v63, %v729_v14 }
 0x1a1   :  { %v730_v7 = vsel %vm685_vm6, 0.0, %v698_v48 }
 0x1a7   :  { %v5471_v11 = vpop.f32.mrf.mxu2 }
 0x1ac   :  { %4681 = vmatmul.msk.bf16.gmra.mxu3 %vm381_vm3, %v585_v39  ;;  %4690 = vmatmul.msk.bf16.gmra.mxu1 %vm381_vm3, %v736_v40  ;;  %v548_v40 = vrot.slane %v5299_v17, 6 }
 0x1ad   :  { %4702 = vmatmul.msk.bf16.gmra.mxu2 %vm381_vm3, %v841_v43  ;;  %4722 = vmatmul.msk.bf16.gmra.mxu0 %vm381_vm3, %v1145_v45  ;;  %v699_v43 = vrot.slane %v5299_v17, 7  ;;  %v547_v45 = vrot.slane %v5294_v9, 6 }
 0x1af   :  { %v5485_v47 = vpop.f32.mrf.mxu2  ;;  %v549_v52 = vsel %vm534_vm5, %v547_v45, %v548_v40  ;;  %v700_v56 = vsel %vm685_vm6, %v698_v48, %v699_v43  ;;  %v551_v40 = vrot.slane %v5326_v42, 6  ;;  %v702_v43 = vrot.slane %v5326_v42, 7 }
 0x1b0   :  { %v701_v48 = vrot.slane %v5321_v38, 7 }
 0x1b7   :  { %v5491_v59 = vpop.f32.mrf.mxu2 }
 0x1b9   :  { %v433_v3 = vpop.f32.mrf.mxu1 }
 0x1bc   :  { %4682 = vmatmul.msk.bf16.gmra.mxu3 %vm381_vm3, %v586_v20  ;;  %4691 = vmatmul.msk.bf16.gmra.mxu1 %vm381_vm3, %v737_v21  ;;  %v738_v20 = vpack.c.bf16 %v700_v56, %v730_v7  ;;  %v843_v21 = vpack.c.bf16 %v5398_v58, %v5384_v41  ;;  %v703_v56 = vsel %vm685_vm6, %v701_v48, %v702_v43 }
 0x1bd   :  { %4703 = vmatmul.msk.bf16.gmra.mxu2 %vm381_vm3, %v842_v24 }
 0x1bf   :  { %v509_v33 = vpop.f32.mrf.mxu2 }
 0x1c0   :  { %v5502_v36 = vadd.f32 %v509_v33, %v433_v3  ;;  %v579_v3 = vsel %vm534_vm5, 0.0, %v547_v45  ;;  %v550_v45 = vrot.slane %v5321_v38, 6 }
 0x1c1   :  { %v435_v39 = vpop.f32.mrf.mxu1  ;;  %v587_v14 = vpack.c.bf16 %v549_v52, %v579_v3 }
 0x1c2   :  { %v552_v52 = vsel %vm534_vm5, %v550_v45, %v551_v40 }
 0x1c7   :  { %v511_v51 = vpop.f32.mrf.mxu2 }
 0x1c8   :  { %v5510_v61 = vadd.f32 %v511_v51, %v435_v39 }
 0x1c9   :  { %v438_v63 = vpop.f32.mrf.mxu1 }
 0x1cc   :  { %4683 = vmatmul.msk.bf16.gmra.mxu3 %vm381_vm3, %v587_v14  ;;  %4692 = vmatmul.msk.bf16.gmra.mxu1 %vm381_vm3, %v738_v20  ;;  %v731_v14 = vsel %vm685_vm6, 0.0, %v701_v48  ;;  %v705_v48 = vrot.slane %v5356_v8, 7 }
 0x1cd   :  { %4704 = vmatmul.msk.bf16.gmra.mxu2 %vm381_vm3, %v843_v21  ;;  %v739_v21 = vpack.c.bf16 %v703_v56, %v731_v14 }
 0x1cf   :  { %v514_v24 = vpop.f32.mrf.mxu2 }
 0x1d0   :  { %v5519_v33 = vadd.f32 %v514_v24, %v438_v63  ;;  %v580_v63 = vsel %vm534_vm5, 0.0, %v550_v45  ;;  %v554_v45 = vrot.slane %v5356_v8, 6 }
 0x1d1   :  { %v440_v39 = vpop.f32.mrf.mxu1  ;;  %v588_v20 = vpack.c.bf16 %v552_v52, %v580_v63  ;;  %v704_v52 = vrot.slane %v5351_v1, 7 }
 0x1d3   :  { %v706_v10 = vsel %vm685_vm6, %v704_v52, %v705_v48 }
 0x1d7   :  { %v516_v51 = vpop.f32.mrf.mxu2 }
 0x1d8   :  { %v5527_v3 = vadd.f32 %v516_v51, %v440_v39  ;;  %v553_v51 = vrot.slane %v5351_v1, 6 }
 0x1d9   :  { %v443_v7 = vpop.f32.mrf.mxu1 }
 0x1da   :  { %v555_v63 = vsel %vm534_vm5, %v553_v51, %v554_v45  ;;  %v581_v14 = vsel %vm534_vm5, 0.0, %v553_v51  ;;  %v557_v51 = vrot.slane %v5398_v58, 6 }
 0x1dc   :  { %4684 = vmatmul.msk.bf16.gmra.mxu3 %vm381_vm3, %v588_v20  ;;  %4693 = vmatmul.msk.bf16.gmra.mxu1 %vm381_vm3, %v739_v21  ;;  %v732_v20 = vsel %vm685_vm6, 0.0, %v704_v52  ;;  %v589_v21 = vpack.c.bf16 %v555_v63, %v581_v14  ;;  %v708_v52 = vrot.slane %v5398_v58, 7  ;;  %v556_v63 = vrot.slane %v5384_v41, 6 }
 0x1dd   :  { %4733 = vmatmul.msk.bf16.vlgmr.msra.gmra.mxu2 %vm381_vm3, %v1407_v15 }
 0x1df   :  { %v519_v24 = vpop.f32.mrf.mxu3 }
 0x1e0   :  { %v5537_v40 = vadd.f32 %v519_v24, %v443_v7  ;;  %v5539_v39 = vpop.f32.mrf.mxu2  ;;  %v740_v24 = vpack.c.bf16 %v706_v10, %v732_v20  ;;  %v707_v10 = vrot.slane %v5384_v41, 7  ;;  %v558_v20 = vsel %vm534_vm5, %v556_v63, %v557_v51 }
 0x1e1   :  { %v445_v43 = vpop.f32.mrf.mxu1 }
 0x1e2   :  { %v709_v26 = vsel %vm685_vm6, %v707_v10, %v708_v52 }
 0x1e7   :  { %v521_v56 = vpop.f32.mrf.mxu3 }
 0x1e8   :  { %v5547_v12 = vadd.f32 %v521_v56, %v445_v43  ;;  %v5549_v15 = vpop.f32.mrf.mxu2 }
 0x1e9   :  { %v448_v7 = vpop.f32.mrf.mxu1 }
 0x1ec   :  { %4685 = vmatmul.msk.bf16.gmra.mxu3 %vm381_vm3, %v589_v21  ;;  %4694 = vmatmul.msk.bf16.gmra.mxu1 %vm381_vm3, %v740_v24  ;;  %v582_v21 = vsel %vm534_vm5, 0.0, %v556_v63  ;;  %v733_v24 = vsel %vm685_vm6, 0.0, %v707_v10  ;;  %v418_v63 = vpop.f32.mrf.mxu0  ;;  %v940_v10 = vrot.slane %v5189_v5, 1 }
 0x1ed   :  { %4734 = vmatmul.msk.bf16.gmra.mxu2 %vm381_vm3, %v1408_v31  ;;  %v741_v22 = vpack.c.bf16 %v709_v26, %v733_v24  ;;  %v939_v26 = vrot.slane %v5185_v2, 1 }
 0x1ef   :  { %v524_v43 = vpop.f32.mrf.mxu3  ;;  %v941_v46 = vsel %vm938_vm7, %v939_v26, %v940_v10  ;;  %v5025_v26 = vld [vmem:[%s7875_s4 + $0x8] sm:$0x10] }
 0x1f0   :  { %v5559_v45 = vadd.f32 %v524_v43, %v448_v7  ;;  %v5561_v48 = vpop.f32.mrf.mxu2  ;;  %v590_v43 = vpack.c.bf16 %v558_v20, %v582_v21  ;;  %v1242_v20 = vrot.slane %v5189_v5, 3 }
 0x1f1   :  { %v450_v56 = vpop.f32.mrf.mxu1 }
 0x1f2   :  { %v1281_v21 = vsel %vm1240_vm8, %v1242_v20, 0.0 }
 0x1f7   :  { %v526_v14 = vpop.f32.mrf.mxu3 }
 0x1f8   :  { %v5569_v28 = vadd.f32 %v526_v14, %v450_v56  ;;  %v5571_v31 = vpop.f32.mrf.mxu2 }
 0x1f9   :  { %v453_v7 = vpop.f32.mrf.mxu1 }
 0x1fc   :  { %4686 = vmatmul.msk.bf16.gmra.mxu3 %vm381_vm3, %v590_v43  ;;  %4695 = vmatmul.msk.bf16.gmra.mxu1 %vm381_vm3, %v741_v22  ;;  %v1241_v22 = vrot.slane %v5185_v2, 3  ;;  %v4745_v2 = vld [vmem:[%s7875_s4 + $0x8] sm:$0xf] }
 0x1fd   :  { %4735 = vmatmul.msk.bf16.gmra.mxu2 %vm381_vm3, %v1409_v49  ;;  %v979_v49 = vsel %vm938_vm7, %v940_v10, 0.0  ;;  %v4746_v10 = vor.u32 %v5025_v26, %v4745_v2  ;;  %v1245_v2 = vrot.slane %v5211_v19, 3 }
 0x1ff   :  { %v529_v56 = vpop.f32.mrf.mxu3 }
 0x200   :  { %v5581_v51 = vadd.f32 %v529_v56, %v453_v7  ;;  %v5583_v52 = vpop.f32.mrf.mxu2  ;;  %v1243_v7 = vsel %vm1240_vm8, %v1241_v22, %v1242_v20  ;;  %v987_v56 = vpack.c.bf16 %v979_v49, %v941_v46  ;;  %v1708_v22 = vsel %vm264_vm1, 4294967295, %v5059_v60  ;;  %v420_v20 = vpop.f32.mrf.mxu0 }
 0x201   :  { %v455_v14 = vpop.f32.mrf.mxu1  ;;  %v1289_v34 = vpack.c.bf16 %v1281_v21, %v1243_v7  ;;  %v495_v46 = vadd.f32 %v5441_v6, %v418_v63 }
 0x207   :  { %v531_v44 = vpop.f32.mrf.mxu3 }
 0x208   :  { %v5593_v24 = vadd.f32 %v531_v44, %v455_v14  ;;  %v5595_v43 = vpop.f32.mrf.mxu2  ;;  %v5607_v14 = vsel %vm1240_vm8, %v1708_v22, 0  ;;  %v423_v6 = vpop.f32.mrf.mxu0  ;;  %v1246_v22 = vsel %vm1240_vm8, %v1244_v0, %v1245_v2  ;;  %v946_v0 = vrot.slane %v5241_v37, 1 }
 0x209   :  { %v780_v5 = vpop.f32.mrf.mxu1  ;;  %7987 = vst [vmem:[#allocation2_spill] sm:$0xff] %v5607_v14  ;;  %v1711_v44 = vand.u32 %v4746_v10, %v5607_v14 }
 0x20b   :  { %1720 = vmatpush.bf16.msrb.mxu3 %v1711_v44  ;;  %v1282_v44 = vsel %vm1240_vm8, %v1245_v2, 0.0 }
 0x20c   :  { %4706 = vmatmul.msk.bf16.vlgmr.msra.gmra.mxu3 %vm381_vm3, %v987_v56  ;;  %4724 = vmatmul.msk.bf16.vlgmr.msra.gmra.mxu1 %vm381_vm3, %v1289_v34  ;;  %v943_v34 = vrot.slane %v5211_v19, 1 }
 0x20d   :  { %4736 = vmatmul.msk.bf16.gmra.mxu2 %vm381_vm3, %v1410_v4  ;;  %v497_v4 = vadd.f32 %v5449_v29, %v420_v20  ;;  %v500_v20 = vadd.f32 %v5463_v53, %v423_v6 }
 0x20e   :  { %v944_v10 = vsel %vm938_vm7, %v942_v62, %v943_v34 }
 0x20f   :  { %v629_v49 = vpop.f32.mrf.mxu3 }
 0x210   :  { %v669_v60 = vadd.f32 %v629_v49, %v495_v46  ;;  %v5615_v56 = vpop.f32.mrf.mxu2 }
 0x211   :  { %v782_v7 = vpop.f32.mrf.mxu1 }
 0x212   :  { %v820_v21 = vadd.f32 %v780_v5, %v669_v60  ;;  %v980_v5 = vsel %vm938_vm7, %v943_v34, 0.0  ;;  %v1290_v60 = vpack.c.bf16 %v1282_v44, %v1246_v22  ;;  %v425_v34 = vpop.f32.mrf.mxu0 }
 0x213   :  { %v988_v49 = vpack.c.bf16 %v980_v5, %v944_v10  ;;  %v502_v30 = vadd.f32 %v5471_v11, %v425_v34  ;;  %v981_v10 = vsel %vm938_vm7, %v946_v0, 0.0  ;;  %v7988_v11 = vpack.c.bf16 %v5340_v57, %v5336_v55 }
 0x214   :  { %v5620_v26 = vadd.f32 %v5539_v39, %v820_v21  ;;  %v948_v55 = vrot.slane %v5263_v50, 1  ;;  %v1250_v57 = vrot.slane %v5263_v50, 3 }
 0x217   :  { %v631_v63 = vpop.f32.mrf.mxu3 }
 0x218   :  { %v670_v19 = vadd.f32 %v631_v63, %v497_v4  ;;  %v5634_v29 = vpop.f32.mrf.mxu2  ;;  %v1248_v4 = vrot.slane %v5241_v37, 3  ;;  %v945_v63 = vrot.slane %v5233_v32, 1 }
 0x219   :  { %v785_v46 = vpop.f32.mrf.mxu1 }
 0x21a   :  { %v821_v39 = vadd.f32 %v782_v7, %v670_v19  ;;  %v947_v6 = vsel %vm938_vm7, %v945_v63, %v946_v0  ;;  %v1249_v5 = vsel %vm1240_vm8, %v1247_v27, %v1248_v4  ;;  %v1283_v37 = vsel %vm1240_vm8, %v1248_v4, 0.0 }
 0x21b   :  { %v989_v19 = vpack.c.bf16 %v981_v10, %v947_v6 }
 0x21c   :  { %4707 = vmatmul.msk.bf16.gmra.mxu3 %vm381_vm3, %v988_v49  ;;  %4725 = vmatmul.msk.bf16.gmra.mxu1 %vm381_vm3, %v1290_v60  ;;  %v5632_v16 = vadd.f32 %v5549_v15, %v821_v39  ;;  %v428_v39 = vpop.f32.mrf.mxu0 }
 0x21d   :  { %4737 = vmatmul.msk.bf16.gmra.mxu2 %vm381_vm3, %v1411_v35  ;;  %v505_v49 = vadd.f32 %v5485_v47, %v428_v39  ;;  %v1254_v39 = vrot.slane %v5299_v17, 3 }
 0x21f   :  { %v634_v21 = vpop.f32.mrf.mxu3 }
 0x220   :  { %v671_v7 = vadd.f32 %v634_v21, %v500_v20  ;;  %v5649_v35 = vpop.f32.mrf.mxu2 }
 0x221   :  { %v787_v2 = vpop.f32.mrf.mxu1 }
 0x222   :  { %v822_v62 = vadd.f32 %v785_v46, %v671_v7  ;;  %v1291_v46 = vpack.c.bf16 %v1283_v37, %v1249_v5 }
 0x224   :  { %v5644_v15 = vadd.f32 %v5561_v48, %v822_v62  ;;  %v1251_v62 = vrot.slane %v5268_v54, 3  ;;  %v430_v0 = vpop.f32.mrf.mxu0 }
 0x225   :  { %v507_v47 = vadd.f32 %v5491_v59, %v430_v0  ;;  %v7989_v59 = vpack.c.bf16 %v5370_v25, %v5366_v23  ;;  %v1253_v23 = vrot.slane %v5294_v9, 3  ;;  %v7990_v0 = vpack.c.bf16 %v5412_v18, %v5408_v13 }
 0x226   :  { %v1256_v13 = vrot.slane %v5321_v38, 3 }
 0x227   :  { %v636_v53 = vpop.f32.mrf.mxu3 }
 0x228   :  { %v672_v22 = vadd.f32 %v636_v53, %v502_v30  ;;  %v5665_v21 = vpop.f32.mrf.mxu2  ;;  %v1252_v30 = vsel %vm1240_vm8, %v1250_v57, %v1251_v62  ;;  %v1284_v53 = vsel %vm1240_vm8, %v1251_v62, 0.0 }
 0x229   :  { %v790_v48 = vpop.f32.mrf.mxu1  ;;  %v1292_v5 = vpack.c.bf16 %v1284_v53, %v1252_v30 }
 0x22a   :  { %v823_v44 = vadd.f32 %v787_v2, %v672_v22  ;;  %v949_v2 = vrot.slane %v5268_v54, 1 }
 0x22c   :  { %4708 = vmatmul.msk.bf16.gmra.mxu3 %vm381_vm3, %v989_v19  ;;  %4726 = vmatmul.msk.bf16.gmra.mxu1 %vm381_vm3, %v1291_v46  ;;  %v5658_v32 = vadd.f32 %v5571_v31, %v823_v44  ;;  %v950_v63 = vsel %vm938_vm7, %v948_v55, %v949_v2  ;;  %v982_v27 = vsel %vm938_vm7, %v949_v2, 0.0  ;;  %v952_v46 = vrot.slane %v5299_v17, 1 }
 0x22d   :  { %4738 = vmatmul.msk.bf16.gmra.mxu2 %vm381_vm3, %v7988_v11  ;;  %v990_v10 = vpack.c.bf16 %v982_v27, %v950_v63  ;;  %v955_v63 = vrot.slane %v5326_v42, 1  ;;  %v1257_v27 = vrot.slane %v5326_v42, 3 }
 0x22f   :  { %v639_v60 = vpop.f32.mrf.mxu3 }
 0x230   :  { %v673_v20 = vadd.f32 %v639_v60, %v505_v49  ;;  %v907_v37 = vpop.f32.mrf.mxu2 }
 0x231   :  { %v792_v7 = vpop.f32.mrf.mxu1 }
 0x232   :  { %v824_v34 = vadd.f32 %v790_v48, %v673_v20  ;;  %v1255_v20 = vsel %vm1240_vm8, %v1253_v23, %v1254_v39 }
 0x234   :  { %v5670_v31 = vadd.f32 %v5583_v52, %v824_v34 }
 0x237   :  { %v641_v4 = vpop.f32.mrf.mxu3 }
 0x238   :  { %v674_v54 = vadd.f32 %v641_v4, %v507_v47  ;;  %v5694_v49 = vpop.f32.mrf.mxu2 }
 0x239   :  { %v795_v6 = vpop.f32.mrf.mxu1 }
 0x23a   :  { %v825_v52 = vadd.f32 %v792_v7, %v674_v54  ;;  %v1285_v7 = vsel %vm1240_vm8, %v1254_v39, 0.0  ;;  %v1258_v54 = vsel %vm1240_vm8, %v1256_v13, %v1257_v27  ;;  %v957_v39 = vrot.slane %v5351_v1, 1 }
 0x23b   :  { %v1293_v62 = vpack.c.bf16 %v1285_v7, %v1255_v20 }
 0x23c   :  { %4709 = vmatmul.msk.bf16.gmra.mxu3 %vm381_vm3, %v990_v10  ;;  %4727 = vmatmul.msk.bf16.gmra.mxu1 %vm381_vm3, %v1292_v5  ;;  %v5682_v50 = vadd.f32 %v5595_v43, %v825_v52  ;;  %v951_v43 = vrot.slane %v5294_v9, 1 }
 0x23d   :  { %4739 = vmatmul.msk.bf16.gmra.mxu2 %vm381_vm3, %v7989_v59 }
 0x23e   :  { %v953_v60 = vsel %vm938_vm7, %v951_v43, %v952_v46  ;;  %v1259_v43 = vrot.slane %v5351_v1, 3 }
 0x23f   :  { %v644_v22 = vpop.f32.mrf.mxu3 }
 0x240   :  { %v675_v48 = vadd.f32 %v644_v22, %v5502_v36  ;;  %v983_v36 = vsel %vm938_vm7, %v952_v46, 0.0  ;;  %v912_v55 = vpop.f32.mrf.mxu2 }
 0x241   :  { %v797_v44 = vpop.f32.mrf.mxu1  ;;  %v991_v2 = vpack.c.bf16 %v983_v36, %v953_v60 }
 0x242   :  { %v826_v19 = vadd.f32 %v795_v6, %v675_v48  ;;  %v1286_v6 = vsel %vm1240_vm8, %v1257_v27, 0.0 }
 0x244   :  { %v5692_v11 = vadd.f32 %v5615_v56, %v826_v19  ;;  %v1260_v19 = vrot.slane %v5356_v8, 3 }
 0x246   :  { %v1261_v60 = vsel %vm1240_vm8, %v1259_v43, %v1260_v19  ;;  %v1287_v36 = vsel %vm1240_vm8, %v1260_v19, 0.0  ;;  %v5024_v19 = vld [vmem:[%s7875_s4] sm:$0x10]  ;;  %v4785_v43 = vld [vmem:[%s7875_s4 + $0x18] sm:$0xf] }
 0x247   :  { %v646_v25 = vpop.f32.mrf.mxu3 }
 0x248   :  { %v676_v17 = vadd.f32 %v646_v25, %v5510_v61  ;;  %v5728_v52 = vpop.f32.mrf.mxu2 }
 0x249   :  { %v800_v34 = vpop.f32.mrf.mxu1 }
 0x24a   :  { %v827_v56 = vadd.f32 %v797_v44, %v676_v17  ;;  %v958_v44 = vrot.slane %v5356_v8, 1  ;;  %v1295_v17 = vpack.c.bf16 %v1287_v36, %v1261_v60 }
 0x24c   :  { %4710 = vmatmul.msk.bf16.gmra.mxu3 %vm381_vm3, %v991_v2  ;;  %4728 = vmatmul.msk.bf16.gmra.mxu1 %vm381_vm3, %v1293_v62  ;;  %v5706_v9 = vadd.f32 %v5634_v29, %v827_v56  ;;  %v954_v29 = vrot.slane %v5321_v38, 1  ;;  %v959_v25 = vsel %vm938_vm7, %v957_v39, %v958_v44  ;;  %v1184_v2 = vpop.f32.mrf.mxu0  ;;  %v961_v62 = vrot.slane %v5398_v58, 1 }
 0x24d   :  { %4740 = vmatmul.msk.bf16.gmra.mxu2 %vm381_vm3, %v7990_v0  ;;  %v1263_v0 = vrot.slane %v5398_v58, 3 }
 0x24e   :  { %v956_v53 = vsel %vm938_vm7, %v954_v29, %v955_v63 }
 0x24f   :  { %v649_v57 = vpop.f32.mrf.mxu3 }
 0x250   :  { %v677_v61 = vadd.f32 %v649_v57, %v5519_v33  ;;  %v984_v33 = vsel %vm938_vm7, %v955_v63, 0.0  ;;  %v917_v48 = vpop.f32.mrf.mxu2 }
 0x251   :  { %v5713_v47 = vpop.f32.mrf.mxu1  ;;  %v992_v10 = vpack.c.bf16 %v984_v33, %v956_v53  ;;  %v1288_v53 = vsel %vm1240_vm8, %v1263_v0, 0.0 }
 0x252   :  { %v828_v4 = vadd.f32 %v800_v34, %v677_v61  ;;  %v960_v61 = vrot.slane %v5384_v41, 1 }
 0x254   :  { %v5718_v30 = vadd.f32 %v5649_v35, %v828_v4  ;;  %v1294_v35 = vpack.c.bf16 %v1286_v6, %v1258_v54  ;;  %v1262_v4 = vrot.slane %v5384_v41, 3  ;;  %v962_v29 = vsel %vm938_vm7, %v960_v61, %v961_v62 }
 0x256   :  { %v1264_v13 = vsel %vm1240_vm8, %v1262_v4, %v1263_v0  ;;  %v4799_v4 = vld [vmem:[%s7875_s4 + $0x20] sm:$0xf] }
 0x257   :  { %v5722_v18 = vpop.f32.mrf.mxu3  ;;  %v1296_v58 = vpack.c.bf16 %v1288_v53, %v1264_v13  ;;  %v5808_v53 = vld [vmem:[%s7876_s3] ss:$0 sm:$0xff] }
 0x258   :  { %v5749_v8 = vpop.f32.mrf.mxu2 }
 0x259   :  { %v805_v42 = vpop.f32.mrf.mxu1 }
 0x25c   :  { %4711 = vmatmul.msk.bf16.gmra.mxu3 %vm381_vm3, %v992_v10  ;;  %4729 = vmatmul.msk.bf16.gmra.mxu1 %vm381_vm3, %v1294_v35 }
 0x25f   :  { %v654_v38 = vpop.f32.mrf.mxu3 }
 0x260   :  { %v679_v5 = vadd.f32 %v654_v38, %v5537_v40  ;;  %v985_v40 = vsel %vm938_vm7, %v958_v44, 0.0  ;;  %v1453_v63 = vpop.f32.mrf.mxu2  ;;  %v4757_v44 = vld [vmem:[%s7875_s4] sm:$0xf] }
 0x261   :  { %v5733_v59 = vpop.f32.mrf.mxu1  ;;  %v993_v7 = vpack.c.bf16 %v985_v40, %v959_v25  ;;  %v4758_v39 = vor.u32 %v5024_v19, %v4757_v44  ;;  %v5027_v25 = vld [vmem:[%s7875_s4 + $0x18] sm:$0x10] }
 0x262   :  { %v830_v22 = vadd.f32 %v805_v42, %v679_v5  ;;  %v4786_v36 = vor.u32 %v5027_v25, %v4785_v43 }
 0x264   :  { %v5737_v46 = vadd.f32 %v907_v37, %v830_v22 }
 0x267   :  { %v5741_v23 = vpop.f32.mrf.mxu3 }
 0x268   :  { %v1455_v42 = vpop.f32.mrf.mxu2 }
 0x269   :  { %v810_v20 = vpop.f32.mrf.mxu1 }
 0x26c   :  { %4712 = vmatmul.msk.bf16.gmra.mxu3 %vm381_vm3, %v993_v7  ;;  %4730 = vmatmul.msk.bf16.gmra.mxu1 %vm381_vm3, %v1295_v17 }
 0x26f   :  { %v659_v1 = vpop.f32.mrf.mxu3 }
 0x270   :  { %v681_v37 = vadd.f32 %v659_v1, %v5559_v45  ;;  %v986_v45 = vsel %vm938_vm7, %v961_v62, 0.0  ;;  %v1458_v7 = vpop.f32.mrf.mxu2  ;;  %v2088_v1 = vand.u32 %v4786_v36, %v5607_v14 }
 0x271   :  { %v5752_v34 = vpop.f32.mrf.mxu1  ;;  %v994_v54 = vpack.c.bf16 %v986_v45, %v962_v29  ;;  %v5028_v29 = vld [vmem:[%s7875_s4 + $0x20] sm:$0x10] }
 0x272   :  { %v832_v56 = vadd.f32 %v810_v20, %v681_v37  ;;  %v1792_v20 = vand.u32 %v4758_v39, %v5607_v14  ;;  %2097 = vmatpush.bf16.msrb.mxu2 %v2088_v1  ;;  %v4800_v45 = vor.u32 %v5028_v29, %v4799_v4 }
 0x274   :  { %v5756_v57 = vadd.f32 %v912_v55, %v832_v56  ;;  %v1186_v55 = vpop.f32.mrf.mxu0  ;;  %1801 = vmatpush.bf16.msrb.mxu0 %v1792_v20 }
 0x277   :  { %v5760_v27 = vpop.f32.mrf.mxu3 }
 0x279   :  { %v815_v33 = vpop.f32.mrf.mxu1 }
 0x27c   :  { %4713 = vmatmul.msk.bf16.gmra.mxu3 %vm381_vm3, %v994_v54  ;;  %4731 = vmatmul.msk.bf16.gmra.mxu1 %vm381_vm3, %v1296_v58  ;;  %v1189_v5 = vpop.f32.mrf.mxu0 }
 0x27f   :  { %v664_v41 = vpop.f32.mrf.mxu3 }
 0x280   :  { %v683_v6 = vadd.f32 %v664_v41, %v5581_v51  ;;  %v4771_v51 = vld [vmem:[%s7875_s4 + $0x10] sm:$0xf] }
 0x281   :  { %v5769_v10 = vpop.f32.mrf.mxu1 }
 0x282   :  { %v834_v35 = vadd.f32 %v815_v33, %v683_v6  ;;  %v2196_v33 = vand.u32 %v4800_v45, %v5607_v14 }
 0x284   :  { %v5771_v38 = vadd.f32 %v917_v48, %v834_v35  ;;  %v5026_v48 = vld [vmem:[%s7875_s4 + $0x10] sm:$0x10]  ;;  %v5797_v62 = vpop.f32.mrf.mxu0  ;;  %2205 = vmatpush.bf16.msra.mxu3 %v2196_v33 }
 0x285   :  { %v4772_v60 = vor.u32 %v5026_v48, %v4771_v51 }
 0x287   :  { %v5773_v22 = vpop.f32.mrf.mxu3  ;;  %v1932_v17 = vand.u32 %v4772_v60, %v5607_v14 }
 0x289   :  { %v1335_v40 = vpop.f32.mrf.mxu1  ;;  %1941 = vmatpush.bf16.msrb.mxu1 %v1932_v17 }
 0x28c   :  { %v5815_v44 = vpop.f32.mrf.mxu0 }
 0x28f   :  { %v1033_v37 = vpop.f32.mrf.mxu3 }
 0x290   :  { %v1073_v56 = vadd.f32 %v1033_v37, %v5620_v26  ;;  %v5810_v26 = vpop.f32.mrf.mxu2 }
 0x291   :  { %v1337_v0 = vpop.f32.mrf.mxu1 }
 0x292   :  { %v1224_v61 = vadd.f32 %v1184_v2, %v1073_v56 }
 0x294   :  { %v1375_v13 = vadd.f32 %v1335_v40, %v1224_v61 }
 0x296   :  { %v1493_v2 = vadd.f32 %v1453_v63, %v1375_v13 }
 0x297   :  { %v1035_v54 = vpop.f32.mrf.mxu3 }
 0x298   :  { %v1513_v58 = vadd.f32 %v5808_v53, %v1493_v2  ;;  %v1074_v41 = vadd.f32 %v1035_v54, %v5632_v16  ;;  %v5819_v48 = vpop.f32.mrf.mxu2 }
 0x299   :  { %v1340_v6 = vpop.f32.mrf.mxu1 }
 0x29a   :  { %v1225_v35 = vadd.f32 %v1186_v55, %v1074_v41  ;;  %v5817_v19 = vmax.f32 %v1513_v58, 0.0 }
 0x29c   :  { %7991 = vst [vmem:[#allocation3_spill] sm:$0xff] %v5817_v19  ;;  %v1376_v51 = vadd.f32 %v1337_v0, %v1225_v35  ;;  %v1619_v25 = vrot.slane %v5817_v19, 5  ;;  %v1561_v63 = vrot.slane %v5817_v19, 4  ;;  %v1843_v40 = vrot.slane %v5817_v19, 6 }
 0x29d   :  { %v1999_v60 = vrot.slane %v5817_v19, 7  ;;  %v2263_v20 = vrot.slane %v5817_v19, 1  ;;  %v2419_v1 = vrot.slane %v5817_v19, 2  ;;  %v2575_v37 = vrot.slane %v5817_v19, 3 }
 0x29e   :  { %v1494_v39 = vadd.f32 %v1455_v42, %v1376_v51  ;;  %v1659_v56 = vsel %vm322_vm2, 0.0, %v1619_v25  ;;  %v1601_v0 = vsel %vm264_vm1, 0.0, %v1561_v63  ;;  %v1883_v61 = vsel %vm534_vm5, 0.0, %v1843_v40 }
 0x29f   :  { %v1038_v43 = vpop.f32.mrf.mxu3  ;;  %v2039_v4 = vsel %vm685_vm6, 0.0, %v1999_v60 }
 0x2a0   :  { %v1514_v16 = vadd.f32 %v5808_v53, %v1494_v39  ;;  %v1075_v55 = vadd.f32 %v1038_v43, %v5644_v15 }
 0x2a1   :  { %v1342_v36 = vpop.f32.mrf.mxu1 }
 0x2a2   :  { %v5828_v42 = vmax.f32 %v1514_v16, 0.0  ;;  %v1226_v17 = vadd.f32 %v1189_v5, %v1075_v55  ;;  %v5839_v5 = vpop.f32.mrf.mxu0 }
 0x2a4   :  { %v1377_v15 = vadd.f32 %v1340_v6, %v1226_v17  ;;  %v1620_v29 = vrot.slane %v5828_v42, 5  ;;  %v1562_v45 = vrot.slane %v5828_v42, 4  ;;  %v1844_v13 = vrot.slane %v5828_v42, 6 }
 0x2a5   :  { %v2000_v33 = vrot.slane %v5828_v42, 7  ;;  %v2264_v54 = vrot.slane %v5828_v42, 1  ;;  %v2420_v58 = vrot.slane %v5828_v42, 2 }
 0x2a6   :  { %v1495_v41 = vadd.f32 %v1458_v7, %v1377_v15  ;;  %v1621_v6 = vsel %vm322_vm2, %v1619_v25, %v1620_v29  ;;  %v5848_v35 = vsel %vm264_vm1, %v1561_v63, %v1562_v45  ;;  %v1845_v51 = vsel %vm534_vm5, %v1843_v40, %v1844_v13  ;;  %v5858_v25 = vpop.f32.mrf.mxu2 }
 0x2a7   :  { %7992 = vst [vmem:[#allocation4_spill] sm:$0xff] %v5848_v35  ;;  %v1040_v39 = vpop.f32.mrf.mxu3  ;;  %v1667_v43 = vpack.c.bf16 %v1621_v6, %v1659_v56  ;;  %v1609_v16 = vpack.c.bf16 %v5848_v35, %v1601_v0  ;;  %v1891_v55 = vpack.c.bf16 %v1845_v51, %v1883_v61  ;;  %v2001_v17 = vsel %vm685_vm6, %v1999_v60, %v2000_v33 }
 0x2a8   :  { %v1515_v2 = vadd.f32 %v5808_v53, %v1495_v41  ;;  %v1076_v19 = vadd.f32 %v1040_v39, %v5658_v32  ;;  %v2047_v14 = vpack.c.bf16 %v2001_v17, %v2039_v4  ;;  %v5856_v7 = vsel %vm938_vm7, %v2263_v20, %v2264_v54 }
 0x2a9   :  { %v1345_v63 = vpop.f32.mrf.mxu1  ;;  %4747 = vmatmul.msk.bf16.vlgmr.msrb.gmra.mxu3 %vm1683_vm9, %v1667_v43  ;;  %4759 = vmatmul.msk.bf16.vlgmr.msrb.gmra.mxu0 %vm1683_vm9, %v1609_v16  ;;  %v5863_v40 = vsel %vm938_vm7, %v2264_v54, 0.0  ;;  %v5866_v60 = vsel %vm1089_vm4, %v2419_v1, %v2420_v58  ;;  %v5869_v56 = vsel %vm1089_vm4, %v2420_v58, 0.0  ;;  %v2576_v32 = vrot.slane %v5828_v42, 3 }
 0x2aa   :  { %7993 = vst [vmem:[#allocation5_spill] sm:$0xff] %v5866_v60  ;;  %v5872_v20 = vmax.f32 %v1515_v2, 0.0  ;;  %v1227_v0 = vadd.f32 %v5797_v62, %v1076_v19  ;;  %4773 = vmatmul.msk.bf16.vlgmr.msrb.gmra.mxu1 %vm1683_vm9, %v1891_v55  ;;  %4787 = vmatmul.msk.bf16.vlgmr.msrb.gmra.mxu2 %vm1683_vm9, %v2047_v14  ;;  %v5888_v13 = vsel %vm264_vm1, %v1562_v45, 0.0  ;;  %v5894_v33 = vpop.f32.mrf.mxu0 }
 0x2ab   :  { %7994 = vst [vmem:[#allocation6_spill] sm:$0xff] %v5869_v56  ;;  %v5882_v4 = vsel %vm1240_vm8, %v2575_v37, %v2576_v32  ;;  %v5885_v15 = vsel %vm1240_vm8, %v2576_v32, 0.0 }
 0x2ac   :  { %7995 = vst [vmem:[#allocation7_spill] sm:$0xff] %v5872_v20  ;;  %v1378_v29 = vadd.f32 %v1342_v36, %v1227_v0  ;;  %v1622_v19 = vrot.slane %v5872_v20, 5  ;;  %v1564_v37 = vrot.slane %v5872_v20, 4  ;;  %v1846_v54 = vrot.slane %v5872_v20, 6 }
 0x2ad   :  { %7996 = vst [vmem:[#allocation8_spill] sm:$0xff] %v5882_v4  ;;  %v2002_v58 = vrot.slane %v5872_v20, 7  ;;  %v2422_v16 = vrot.slane %v5872_v20, 2 }
 0x2ae   :  { %7997 = vst [vmem:[#allocation9_spill] sm:$0xff] %v5885_v15  ;;  %v1496_v14 = vadd.f32 %v5810_v26, %v1378_v29  ;;  %v2266_v26 = vrot.slane %v5872_v20, 1  ;;  %v1660_v43 = vsel %vm322_vm2, 0.0, %v1622_v19  ;;  %v5909_v55 = vpop.f32.mrf.mxu2  ;;  %v1602_v17 = vsel %vm264_vm1, 0.0, %v1564_v37 }
 0x2af   :  { %7998 = vst [vmem:[#allocation10_spill] sm:$0xff] %v5888_v13  ;;  %v1043_v2 = vpop.f32.mrf.mxu3  ;;  %v1884_v32 = vsel %vm534_vm5, 0.0, %v1846_v54  ;;  %v2040_v0 = vsel %vm685_vm6, 0.0, %v2002_v58 }
 0x2b0   :  { %v1516_v45 = vadd.f32 %v5808_v53, %v1496_v14  ;;  %v1077_v41 = vadd.f32 %v1043_v2, %v5670_v31  ;;  %v2578_v31 = vrot.slane %v5872_v20, 3 }
 0x2b1   :  { %v1347_v6 = vpop.f32.mrf.mxu1 }
 0x2b2   :  { %v5904_v51 = vmax.f32 %v1516_v45, 0.0  ;;  %v1228_v39 = vadd.f32 %v5815_v44, %v1077_v41 }
 0x2b4   :  { %v1379_v29 = vadd.f32 %v1345_v63, %v1228_v39  ;;  %v1623_v14 = vrot.slane %v5904_v51, 5  ;;  %v1565_v2 = vrot.slane %v5904_v51, 4  ;;  %v1847_v44 = vrot.slane %v5904_v51, 6 }
 0x2b5   :  { %v2003_v45 = vrot.slane %v5904_v51, 7  ;;  %v2267_v36 = vrot.slane %v5904_v51, 1  ;;  %v2423_v62 = vrot.slane %v5904_v51, 2 }
 0x2b6   :  { %v1497_v1 = vadd.f32 %v5819_v48, %v1379_v29  ;;  %v1624_v61 = vsel %vm322_vm2, %v1622_v19, %v1623_v14  ;;  %v5926_v63 = vsel %vm264_vm1, %v1564_v37, %v1565_v2  ;;  %v1848_v39 = vsel %vm534_vm5, %v1846_v54, %v1847_v44  ;;  %v5936_v19 = vpop.f32.mrf.mxu0 }
 0x2b7   :  { %7999 = vst [vmem:[#allocation11_spill] sm:$0xff] %v5926_v63  ;;  %v1045_v35 = vpop.f32.mrf.mxu3  ;;  %v1668_v13 = vpack.c.bf16 %v1624_v61, %v1660_v43  ;;  %v1610_v4 = vpack.c.bf16 %v5926_v63, %v1602_v17  ;;  %v1892_v15 = vpack.c.bf16 %v1848_v39, %v1884_v32  ;;  %v2004_v41 = vsel %vm685_vm6, %v2002_v58, %v2003_v45 }
 0x2b8   :  { %v1517_v20 = vadd.f32 %v5808_v53, %v1497_v1  ;;  %v1078_v60 = vadd.f32 %v1045_v35, %v5682_v50  ;;  %v2048_v56 = vpack.c.bf16 %v2004_v41, %v2040_v0  ;;  %v5934_v48 = vsel %vm938_vm7, %v2266_v26, %v2267_v36 }
 0x2b9   :  { %v1350_v37 = vpop.f32.mrf.mxu1  ;;  %4748 = vmatmul.msk.bf16.gmra.mxu3 %vm1683_vm9, %v1668_v13  ;;  %4760 = vmatmul.msk.bf16.gmra.mxu0 %vm1683_vm9, %v1610_v4  ;;  %v5941_v61 = vsel %vm938_vm7, %v2267_v36, 0.0  ;;  %v5944_v54 = vsel %vm1089_vm4, %v2422_v16, %v2423_v62  ;;  %v5947_v1 = vsel %vm1089_vm4, %v2423_v62, 0.0  ;;  %v2579_v50 = vrot.slane %v5904_v51, 3 }
 0x2ba   :  { %8000 = vst [vmem:[#allocation12_spill] sm:$0xff] %v5944_v54  ;;  %v5950_v35 = vmax.f32 %v1517_v20, 0.0  ;;  %v1229_v58 = vadd.f32 %v5839_v5, %v1078_v60  ;;  %4774 = vmatmul.msk.bf16.gmra.mxu1 %vm1683_vm9, %v1892_v15  ;;  %4788 = vmatmul.msk.bf16.gmra.mxu2 %vm1683_vm9, %v2048_v56  ;;  %v5966_v26 = vsel %vm264_vm1, %v1565_v2, 0.0  ;;  %v5968_v5 = vpop.f32.mrf.mxu2  ;;  %v678_v29 = vadd.f32 %v5722_v18, %v5527_v3 }
 0x2bb   :  { %v5960_v36 = vsel %vm1240_vm8, %v2578_v31, %v2579_v50  ;;  %v5963_v62 = vsel %vm1240_vm8, %v2579_v50, 0.0  ;;  %8004 = vst [vmem:[#allocation16_spill] sm:$0xff] %v5966_v26 }
 0x2bc   :  { %8001 = vst [vmem:[#allocation13_spill] sm:$0xff] %v5950_v35  ;;  %v1380_v20 = vadd.f32 %v1347_v6, %v1229_v58  ;;  %v1625_v15 = vrot.slane %v5950_v35, 5  ;;  %v1567_v16 = vrot.slane %v5950_v35, 4  ;;  %v1849_v17 = vrot.slane %v5950_v35, 6 }
 0x2bd   :  { %8002 = vst [vmem:[#allocation14_spill] sm:$0xff] %v5960_v36  ;;  %v2005_v32 = vrot.slane %v5950_v35, 7  ;;  %v2269_v14 = vrot.slane %v5950_v35, 1  ;;  %v2425_v41 = vrot.slane %v5950_v35, 2  ;;  %v2581_v3 = vrot.slane %v5950_v35, 3 }
 0x2be   :  { %8003 = vst [vmem:[#allocation15_spill] sm:$0xff] %v5963_v62  ;;  %v1498_v56 = vadd.f32 %v5858_v25, %v1380_v20  ;;  %v1661_v45 = vsel %vm322_vm2, 0.0, %v1625_v15  ;;  %v1204_v39 = vpop.f32.mrf.mxu0  ;;  %v1603_v50 = vsel %vm264_vm1, 0.0, %v1567_v16  ;;  %v1885_v58 = vsel %vm534_vm5, 0.0, %v1849_v17 }
 0x2bf   :  { %v1048_v43 = vpop.f32.mrf.mxu3 }
 0x2c0   :  { %v1518_v0 = vadd.f32 %v5808_v53, %v1498_v56  ;;  %v1079_v31 = vadd.f32 %v1048_v43, %v5692_v11  ;;  %v2041_v11 = vsel %vm685_vm6, 0.0, %v2005_v32 }
 0x2c1   :  { %v1352_v25 = vpop.f32.mrf.mxu1 }
 0x2c2   :  { %v5984_v2 = vmax.f32 %v1518_v0, 0.0  ;;  %v1230_v44 = vadd.f32 %v5894_v33, %v1079_v31  ;;  %v1473_v4 = vpop.f32.mrf.mxu2 }
 0x2c4   :  { %v1381_v18 = vadd.f32 %v1350_v37, %v1230_v44  ;;  %v1626_v20 = vrot.slane %v5984_v2, 5  ;;  %v1568_v56 = vrot.slane %v5984_v2, 4  ;;  %v1850_v33 = vrot.slane %v5984_v2, 6 }
 0x2c5   :  { %v2006_v43 = vrot.slane %v5984_v2, 7  ;;  %v2270_v31 = vrot.slane %v5984_v2, 1  ;;  %v2426_v6 = vrot.slane %v5984_v2, 2 }
 0x2c6   :  { %v1499_v60 = vadd.f32 %v5909_v55, %v1381_v18  ;;  %v1627_v13 = vsel %vm322_vm2, %v1625_v15, %v1626_v20  ;;  %v6004_v37 = vsel %vm264_vm1, %v1567_v16, %v1568_v56  ;;  %v1851_v44 = vsel %vm534_vm5, %v1849_v17, %v1850_v33 }
 0x2c7   :  { %8005 = vst [vmem:[#allocation17_spill] sm:$0xff] %v6004_v37  ;;  %v1050_v63 = vpop.f32.mrf.mxu3  ;;  %v1669_v26 = vpack.c.bf16 %v1627_v13, %v1661_v45  ;;  %v1611_v36 = vpack.c.bf16 %v6004_v37, %v1603_v50  ;;  %v1893_v62 = vpack.c.bf16 %v1851_v44, %v1885_v58  ;;  %v2007_v0 = vsel %vm685_vm6, %v2005_v32, %v2006_v43 }
 0x2c8   :  { %v1519_v35 = vadd.f32 %v5808_v53, %v1499_v60  ;;  %v1080_v54 = vadd.f32 %v1050_v63, %v5706_v9  ;;  %v2049_v55 = vpack.c.bf16 %v2007_v0, %v2041_v11  ;;  %v6012_v15 = vsel %vm938_vm7, %v2269_v14, %v2270_v31 }
 0x2c9   :  { %v1355_v16 = vpop.f32.mrf.mxu1  ;;  %4749 = vmatmul.msk.bf16.gmra.mxu3 %vm1683_vm9, %v1669_v26  ;;  %4761 = vmatmul.msk.bf16.gmra.mxu0 %vm1683_vm9, %v1611_v36  ;;  %v6017_v13 = vsel %vm938_vm7, %v2270_v31, 0.0  ;;  %v6020_v17 = vsel %vm1089_vm4, %v2425_v41, %v2426_v6  ;;  %v6023_v32 = vsel %vm1089_vm4, %v2426_v6, 0.0  ;;  %v2582_v9 = vrot.slane %v5984_v2, 3 }
 0x2ca   :  { %v6026_v63 = vmax.f32 %v1519_v35, 0.0  ;;  %v1231_v60 = vadd.f32 %v5936_v19, %v1080_v54  ;;  %4775 = vmatmul.msk.bf16.gmra.mxu1 %vm1683_vm9, %v1893_v62  ;;  %4789 = vmatmul.msk.bf16.gmra.mxu2 %vm1683_vm9, %v2049_v55  ;;  %v6042_v45 = vsel %vm264_vm1, %v1568_v56, 0.0  ;;  %v1206_v19 = vpop.f32.mrf.mxu0  ;;  %v829_v54 = vadd.f32 %v5713_v47, %v678_v29 }
 0x2cb   :  { %v6036_v14 = vsel %vm1240_vm8, %v2581_v3, %v2582_v9  ;;  %v6039_v6 = vsel %vm1240_vm8, %v2582_v9, 0.0  ;;  %8009 = vst [vmem:[#allocation21_spill] sm:$0xff] %v6042_v45  ;;  %v680_v29 = vadd.f32 %v5741_v23, %v5547_v12 }
 0x2cc   :  { %8006 = vst [vmem:[#allocation18_spill] sm:$0xff] %v6026_v63  ;;  %v1382_v35 = vadd.f32 %v1352_v25, %v1231_v60  ;;  %v1628_v50 = vrot.slane %v6026_v63, 5  ;;  %v1570_v11 = vrot.slane %v6026_v63, 4  ;;  %v1852_v3 = vrot.slane %v6026_v63, 6 }
 0x2cd   :  { %8007 = vst [vmem:[#allocation19_spill] sm:$0xff] %v6036_v14  ;;  %v2008_v25 = vrot.slane %v6026_v63, 7  ;;  %v931_v33 = vadd.f32 %v5665_v21, %v829_v54  ;;  %v2272_v43 = vrot.slane %v6026_v63, 1  ;;  %v2428_v55 = vrot.slane %v6026_v63, 2 }
 0x2ce   :  { %8008 = vst [vmem:[#allocation20_spill] sm:$0xff] %v6039_v6  ;;  %v1500_v41 = vadd.f32 %v5968_v5, %v1382_v35  ;;  %v1475_v5 = vpop.f32.mrf.mxu2  ;;  %v1662_v44 = vsel %vm322_vm2, 0.0, %v1628_v50  ;;  %v1604_v9 = vsel %vm264_vm1, 0.0, %v1570_v11  ;;  %v2584_v12 = vrot.slane %v6026_v63, 3 }
 0x2cf   :  { %v1053_v58 = vpop.f32.mrf.mxu3  ;;  %v2042_v60 = vsel %vm685_vm6, 0.0, %v2008_v25 }
 0x2d0   :  { %v1520_v20 = vadd.f32 %v5808_v53, %v1500_v41  ;;  %v1081_v47 = vadd.f32 %v1053_v58, %v5718_v30  ;;  %v1886_v30 = vsel %vm534_vm5, 0.0, %v1852_v3 }
 0x2d1   :  { %v1357_v56 = vpop.f32.mrf.mxu1 }
 0x2d2   :  { %v6060_v0 = vmax.f32 %v1520_v20, 0.0  ;;  %v1232_v31 = vadd.f32 %v1204_v39, %v1081_v47  ;;  %v1209_v62 = vpop.f32.mrf.mxu0 }
 0x2d4   :  { %v1383_v23 = vadd.f32 %v1355_v16, %v1232_v31  ;;  %v1629_v21 = vrot.slane %v6060_v0, 5  ;;  %v1571_v35 = vrot.slane %v6060_v0, 4  ;;  %v1853_v54 = vrot.slane %v6060_v0, 6 }
 0x2d5   :  { %v2009_v39 = vrot.slane %v6060_v0, 7  ;;  %v2273_v58 = vrot.slane %v6060_v0, 1  ;;  %v2429_v20 = vrot.slane %v6060_v0, 2 }
 0x2d6   :  { %v1501_v47 = vadd.f32 %v1473_v4, %v1383_v23  ;;  %v1630_v18 = vsel %vm322_vm2, %v1628_v50, %v1629_v21  ;;  %v6078_v16 = vsel %vm264_vm1, %v1570_v11, %v1571_v35  ;;  %v1854_v31 = vsel %vm534_vm5, %v1852_v3, %v1853_v54 }
 0x2d7   :  { %8010 = vst [vmem:[#allocation22_spill] sm:$0xff] %v6078_v16  ;;  %v1055_v26 = vpop.f32.mrf.mxu3  ;;  %v1670_v36 = vpack.c.bf16 %v1630_v18, %v1662_v44  ;;  %v1612_v37 = vpack.c.bf16 %v6078_v16, %v1604_v9  ;;  %v1894_v45 = vpack.c.bf16 %v1854_v31, %v1886_v30  ;;  %v2010_v41 = vsel %vm685_vm6, %v2008_v25, %v2009_v39 }
 0x2d8   :  { %v1521_v63 = vadd.f32 %v5808_v53, %v1501_v47  ;;  %v1082_v14 = vadd.f32 %v1055_v26, %v931_v33  ;;  %v2050_v6 = vpack.c.bf16 %v2010_v41, %v2042_v60  ;;  %v6085_v4 = vsel %vm938_vm7, %v2272_v43, %v2273_v58  ;;  %v1478_v43 = vpop.f32.mrf.mxu2 }
 0x2d9   :  { %v1360_v50 = vpop.f32.mrf.mxu1  ;;  %4750 = vmatmul.msk.bf16.gmra.mxu3 %vm1683_vm9, %v1670_v36  ;;  %4762 = vmatmul.msk.bf16.gmra.mxu0 %vm1683_vm9, %v1612_v37  ;;  %v6090_v11 = vsel %vm938_vm7, %v2273_v58, 0.0  ;;  %v6093_v3 = vsel %vm1089_vm4, %v2428_v55, %v2429_v20  ;;  %v6096_v25 = vsel %vm1089_vm4, %v2429_v20, 0.0  ;;  %v2585_v26 = vrot.slane %v6060_v0, 3 }
 0x2da   :  { %v6099_v18 = vmax.f32 %v1521_v63, 0.0  ;;  %v1233_v33 = vadd.f32 %v1206_v19, %v1082_v14  ;;  %4776 = vmatmul.msk.bf16.gmra.mxu1 %vm1683_vm9, %v1894_v45  ;;  %4790 = vmatmul.msk.bf16.gmra.mxu2 %vm1683_vm9, %v2050_v6  ;;  %v6114_v14 = vsel %vm264_vm1, %v1571_v35, 0.0  ;;  %v831_v45 = vadd.f32 %v5733_v59, %v680_v29  ;;  %v1211_v29 = vpop.f32.mrf.mxu0 }
 0x2db   :  { %v6108_v44 = vsel %vm1240_vm8, %v2584_v12, %v2585_v26  ;;  %v6111_v55 = vsel %vm1240_vm8, %v2585_v26, 0.0  ;;  %8013 = vst [vmem:[#allocation25_spill] sm:$0xff] %v6114_v14 }
 0x2dc   :  { %8011 = vst [vmem:[#allocation23_spill] sm:$0xff] %v6099_v18  ;;  %v1384_v63 = vadd.f32 %v1357_v56, %v1233_v33  ;;  %v1631_v9 = vrot.slane %v6099_v18, 5  ;;  %v1573_v60 = vrot.slane %v6099_v18, 4  ;;  %v1855_v12 = vrot.slane %v6099_v18, 6 }
 0x2dd   :  { %8012 = vst [vmem:[#allocation24_spill] sm:$0xff] %v6108_v44  ;;  %v2011_v23 = vrot.slane %v6099_v18, 7  ;;  %v933_v35 = vadd.f32 %v5694_v49, %v831_v45  ;;  %v2275_v54 = vrot.slane %v6099_v18, 1  ;;  %v2431_v20 = vrot.slane %v6099_v18, 2 }
 0x2de   :  { %v1502_v19 = vadd.f32 %v1475_v5, %v1384_v63  ;;  %v682_v5 = vadd.f32 %v5760_v27, %v5569_v28  ;;  %v1663_v58 = vsel %vm322_vm2, 0.0, %v1631_v9  ;;  %v1605_v31 = vsel %vm264_vm1, 0.0, %v1573_v60 }
 0x2df   :  { %v1058_v30 = vpop.f32.mrf.mxu3  ;;  %v2043_v26 = vsel %vm685_vm6, 0.0, %v2011_v23  ;;  %v2587_v28 = vrot.slane %v6099_v18, 3 }
 0x2e0   :  { %v1522_v21 = vadd.f32 %v5808_v53, %v1502_v19  ;;  %v1083_v59 = vadd.f32 %v1058_v30, %v5737_v46  ;;  %v1887_v46 = vsel %vm534_vm5, 0.0, %v1855_v12  ;;  %v1480_v63 = vpop.f32.mrf.mxu2 }
 0x2e1   :  { %v1362_v47 = vpop.f32.mrf.mxu1 }
 0x2e2   :  { %v6131_v39 = vmax.f32 %v1522_v21, 0.0  ;;  %v1234_v41 = vadd.f32 %v1209_v62, %v1083_v59 }
 0x2e4   :  { %v1385_v27 = vadd.f32 %v1360_v50, %v1234_v41  ;;  %v1632_v49 = vrot.slane %v6131_v39, 5  ;;  %v1574_v33 = vrot.slane %v6131_v39, 4  ;;  %v1856_v62 = vrot.slane %v6131_v39, 6 }
 0x2e5   :  { %v2012_v45 = vrot.slane %v6131_v39, 7  ;;  %v2276_v30 = vrot.slane %v6131_v39, 1  ;;  %v2432_v21 = vrot.slane %v6131_v39, 2 }
 0x2e6   :  { %v1503_v59 = vadd.f32 %v1478_v43, %v1385_v27  ;;  %v1633_v56 = vsel %vm322_vm2, %v1631_v9, %v1632_v49  ;;  %v6149_v50 = vsel %vm264_vm1, %v1573_v60, %v1574_v33  ;;  %v1857_v41 = vsel %vm534_vm5, %v1855_v12, %v1856_v62 }
 0x2e7   :  { %8014 = vst [vmem:[#allocation26_spill] sm:$0xff] %v6149_v50  ;;  %v1060_v6 = vpop.f32.mrf.mxu3  ;;  %v1671_v36 = vpack.c.bf16 %v1633_v56, %v1663_v58  ;;  %v1613_v37 = vpack.c.bf16 %v6149_v50, %v1605_v31  ;;  %v1895_v16 = vpack.c.bf16 %v1857_v41, %v1887_v46  ;;  %v2013_v14 = vsel %vm685_vm6, %v2011_v23, %v2012_v45  ;;  %v1214_v56 = vpop.f32.mrf.mxu0 }
 0x2e8   :  { %v1523_v19 = vadd.f32 %v5808_v53, %v1503_v59  ;;  %v1084_v18 = vadd.f32 %v1060_v6, %v933_v35  ;;  %v2051_v44 = vpack.c.bf16 %v2013_v14, %v2043_v26  ;;  %v6156_v43 = vsel %vm938_vm7, %v2275_v54, %v2276_v30  ;;  %v1483_v46 = vpop.f32.mrf.mxu2 }
 0x2e9   :  { %4751 = vmatmul.msk.bf16.gmra.mxu3 %vm1683_vm9, %v1671_v36  ;;  %4763 = vmatmul.msk.bf16.gmra.mxu0 %vm1683_vm9, %v1613_v37  ;;  %v6161_v9 = vsel %vm938_vm7, %v2276_v30, 0.0  ;;  %v6164_v60 = vsel %vm1089_vm4, %v2431_v20, %v2432_v21  ;;  %v6167_v12 = vsel %vm1089_vm4, %v2432_v21, 0.0  ;;  %v2588_v23 = vrot.slane %v6131_v39, 3 }
 0x2ea   :  { %v6170_v6 = vmax.f32 %v1523_v19, 0.0  ;;  %v1235_v14 = vadd.f32 %v1211_v29, %v1084_v18  ;;  %4777 = vmatmul.msk.bf16.gmra.mxu1 %vm1683_vm9, %v1895_v16  ;;  %4791 = vmatmul.msk.bf16.gmra.mxu2 %vm1683_vm9, %v2051_v44  ;;  %v6185_v18 = vsel %vm264_vm1, %v1574_v33, 0.0  ;;  %v833_v16 = vadd.f32 %v5752_v34, %v682_v5  ;;  %v1365_v44 = vpop.f32.mrf.mxu1 }
 0x2eb   :  { %v6179_v35 = vsel %vm1240_vm8, %v2587_v28, %v2588_v23  ;;  %v6182_v54 = vsel %vm1240_vm8, %v2588_v23, 0.0  ;;  %8017 = vst [vmem:[#allocation29_spill] sm:$0xff] %v6185_v18  ;;  %v684_v33 = vadd.f32 %v5773_v22, %v5593_v24 }
 0x2ec   :  { %8015 = vst [vmem:[#allocation27_spill] sm:$0xff] %v6170_v6  ;;  %v1386_v58 = vadd.f32 %v1362_v47, %v1235_v14  ;;  %v1634_v31 = vrot.slane %v6170_v6, 5  ;;  %v1576_v28 = vrot.slane %v6170_v6, 4  ;;  %v1858_v27 = vrot.slane %v6170_v6, 6 }
 0x2ed   :  { %8016 = vst [vmem:[#allocation28_spill] sm:$0xff] %v6179_v35  ;;  %v2014_v47 = vrot.slane %v6170_v6, 7  ;;  %v935_v62 = vadd.f32 %v5728_v52, %v833_v16  ;;  %v2434_v21 = vrot.slane %v6170_v6, 2  ;;  %v2590_v23 = vrot.slane %v6170_v6, 3 }
 0x2ee   :  { %v1504_v20 = vadd.f32 %v1480_v63, %v1386_v58  ;;  %v2278_v63 = vrot.slane %v6170_v6, 1  ;;  %v1664_v30 = vsel %vm322_vm2, 0.0, %v1634_v31  ;;  %v1606_v59 = vsel %vm264_vm1, 0.0, %v1576_v28 }
 0x2ef   :  { %v1063_v26 = vpop.f32.mrf.mxu3  ;;  %v1888_v41 = vsel %vm534_vm5, 0.0, %v1858_v27 }
 0x2f0   :  { %v1524_v34 = vadd.f32 %v5808_v53, %v1504_v20  ;;  %v1085_v5 = vadd.f32 %v1063_v26, %v5756_v57  ;;  %v2044_v57 = vsel %vm685_vm6, 0.0, %v2014_v47 }
 0x2f2   :  { %v6202_v45 = vmax.f32 %v1524_v34, 0.0  ;;  %v1236_v19 = vadd.f32 %v1214_v56, %v1085_v5  ;;  %v1216_v56 = vpop.f32.mrf.mxu0  ;;  %v1367_v49 = vpop.f32.mrf.mxu1 }
 0x2f4   :  { %v1387_v24 = vadd.f32 %v1365_v44, %v1236_v19  ;;  %v1635_v52 = vrot.slane %v6202_v45, 5  ;;  %v1577_v22 = vrot.slane %v6202_v45, 4  ;;  %v1859_v14 = vrot.slane %v6202_v45, 6 }
 0x2f5   :  { %v2015_v58 = vrot.slane %v6202_v45, 7  ;;  %v2279_v20 = vrot.slane %v6202_v45, 1  ;;  %v2435_v26 = vrot.slane %v6202_v45, 2 }
 0x2f6   :  { %v1505_v34 = vadd.f32 %v1483_v46, %v1387_v24  ;;  %v1636_v5 = vsel %vm322_vm2, %v1634_v31, %v1635_v52  ;;  %v6220_v44 = vsel %vm264_vm1, %v1576_v28, %v1577_v22  ;;  %v1860_v19 = vsel %vm534_vm5, %v1858_v27, %v1859_v14  ;;  %v1485_v31 = vpop.f32.mrf.mxu2 }
 0x2f7   :  { %8018 = vst [vmem:[#allocation30_spill] sm:$0xff] %v6220_v44  ;;  %v1065_v29 = vpop.f32.mrf.mxu3  ;;  %v1672_v36 = vpack.c.bf16 %v1636_v5, %v1664_v30  ;;  %v1614_v37 = vpack.c.bf16 %v6220_v44, %v1606_v59  ;;  %v1896_v50 = vpack.c.bf16 %v1860_v19, %v1888_v41  ;;  %v2016_v16 = vsel %vm685_vm6, %v2014_v47, %v2015_v58 }
 0x2f8   :  { %v1525_v18 = vadd.f32 %v5808_v53, %v1505_v34  ;;  %v1086_v6 = vadd.f32 %v1065_v29, %v935_v62  ;;  %v2052_v35 = vpack.c.bf16 %v2016_v16, %v2044_v57  ;;  %v6227_v46 = vsel %vm938_vm7, %v2278_v63, %v2279_v20 }
 0x2f9   :  { %4752 = vmatmul.msk.bf16.gmra.mxu3 %vm1683_vm9, %v1672_v36  ;;  %4764 = vmatmul.msk.bf16.gmra.mxu0 %vm1683_vm9, %v1614_v37  ;;  %v6232_v28 = vsel %vm938_vm7, %v2279_v20, 0.0  ;;  %v6235_v27 = vsel %vm1089_vm4, %v2434_v21, %v2435_v26  ;;  %v6238_v47 = vsel %vm1089_vm4, %v2435_v26, 0.0  ;;  %v2591_v29 = vrot.slane %v6202_v45, 3 }
 0x2fa   :  { %v6241_v62 = vmax.f32 %v1525_v18, 0.0  ;;  %v1237_v63 = vadd.f32 %v1216_v56, %v1086_v6  ;;  %4778 = vmatmul.msk.bf16.gmra.mxu1 %vm1683_vm9, %v1896_v50  ;;  %4792 = vmatmul.msk.bf16.gmra.mxu2 %vm1683_vm9, %v2052_v35  ;;  %v6256_v18 = vsel %vm264_vm1, %v1577_v22, 0.0  ;;  %v835_v50 = vadd.f32 %v5769_v10, %v684_v33  ;;  %v1219_v57 = vpop.f32.mrf.mxu0  ;;  %v1370_v33 = vpop.f32.mrf.mxu1 }
 0x2fb   :  { %v6250_v30 = vsel %vm1240_vm8, %v2590_v23, %v2591_v29  ;;  %v6253_v21 = vsel %vm1240_vm8, %v2591_v29, 0.0  ;;  %8019 = vst [vmem:[#allocation31_spill] sm:$0xff] %v6256_v18 }
 0x2fc   :  { %v1388_v59 = vadd.f32 %v1367_v49, %v1237_v63  ;;  %v1637_v41 = vrot.slane %v6241_v62, 5  ;;  %v1579_v23 = vrot.slane %v6241_v62, 4  ;;  %v1861_v52 = vrot.slane %v6241_v62, 6 }
 0x2fd   :  { %v2017_v14 = vrot.slane %v6241_v62, 7  ;;  %v937_v56 = vadd.f32 %v5749_v8, %v835_v50  ;;  %v2281_v20 = vrot.slane %v6241_v62, 1  ;;  %v2437_v26 = vrot.slane %v6241_v62, 2 }
 0x2fe   :  { %v1506_v35 = vadd.f32 %v1485_v31, %v1388_v59  ;;  %v1488_v34 = vpop.f32.mrf.mxu2  ;;  %v1665_v5 = vsel %vm322_vm2, 0.0, %v1637_v41  ;;  %v1607_v19 = vsel %vm264_vm1, 0.0, %v1579_v23  ;;  %v1889_v31 = vsel %vm534_vm5, 0.0, %v1861_v52 }
 0x2ff   :  { %v1068_v24 = vpop.f32.mrf.mxu3  ;;  %v2045_v29 = vsel %vm685_vm6, 0.0, %v2017_v14 }
 0x300   :  { %v1526_v22 = vadd.f32 %v5808_v53, %v1506_v35  ;;  %v1087_v10 = vadd.f32 %v1068_v24, %v5771_v38 }
 0x302   :  { %v6270_v58 = vmax.f32 %v1526_v22, 0.0  ;;  %v1238_v16 = vadd.f32 %v1219_v57, %v1087_v10 }
 0x304   :  { %v1389_v38 = vadd.f32 %v1370_v33, %v1238_v16  ;;  %v1638_v63 = vrot.slane %v6270_v58, 5  ;;  %v1580_v8 = vrot.slane %v6270_v58, 4  ;;  %v1862_v59 = vrot.slane %v6270_v58, 6 }
 0x305   :  { %v2018_v50 = vrot.slane %v6270_v58, 7  ;;  %v2282_v57 = vrot.slane %v6270_v58, 1  ;;  %v2438_v24 = vrot.slane %v6270_v58, 2 }
 0x306   :  { %v1507_v22 = vadd.f32 %v1488_v34, %v1389_v38  ;;  %v1639_v10 = vsel %vm322_vm2, %v1637_v41, %v1638_v63  ;;  %v6290_v33 = vsel %vm264_vm1, %v1579_v23, %v1580_v8  ;;  %v1863_v16 = vsel %vm534_vm5, %v1861_v52, %v1862_v59  ;;  %v4813_v34 = vld [vmem:[%s7875_s4 + $0x28] sm:$0xf]  ;;  %v5029_v41 = vld [vmem:[%s7875_s4 + $0x28] sm:$0x10]  ;;  %v4827_v23 = vld [vmem:[%s7875_s4 + $0x30] sm:$0xf]  ;;  %v1221_v59 = vpop.f32.mrf.mxu0 }
 0x307   :  { %8020 = vst [vmem:[#allocation32_spill] sm:$0xff] %v6290_v33  ;;  %v1070_v49 = vpop.f32.mrf.mxu3  ;;  %v1673_v6 = vpack.c.bf16 %v1639_v10, %v1665_v5  ;;  %v1615_v36 = vpack.c.bf16 %v6290_v33, %v1607_v19  ;;  %v1897_v37 = vpack.c.bf16 %v1863_v16, %v1889_v31  ;;  %v2019_v35 = vsel %vm685_vm6, %v2017_v14, %v2018_v50  ;;  %v5030_v14 = vld [vmem:[%s7875_s4 + $0x30] sm:$0x10]  ;;  %v4841_v31 = vld [vmem:[%s7875_s4 + $0x38] sm:$0xf]  ;;  %v8022_v10 = vld [vmem:[#allocation2_spill] sm:$0xff] }
 0x308   :  { %v1527_v52 = vadd.f32 %v5808_v53, %v1507_v22  ;;  %v1088_v5 = vadd.f32 %v1070_v49, %v937_v56  ;;  %v2053_v38 = vpack.c.bf16 %v2019_v35, %v2045_v29  ;;  %v4814_v19 = vor.u32 %v5029_v41, %v4813_v34  ;;  %v5031_v63 = vld [vmem:[%s7875_s4 + $0x38] sm:$0x10] }
 0x309   :  { %4753 = vmatmul.msk.bf16.gmra.mxu3 %vm1683_vm9, %v1673_v6  ;;  %4765 = vmatmul.msk.bf16.gmra.mxu0 %vm1683_vm9, %v1615_v36  ;;  %v4828_v49 = vor.u32 %v5030_v14, %v4827_v23  ;;  %v4842_v56 = vor.u32 %v5031_v63, %v4841_v31  ;;  %v6317_v29 = vsel %vm938_vm7, %v2281_v20, %v2282_v57  ;;  %v6320_v50 = vsel %vm938_vm7, %v2282_v57, 0.0  ;;  %v4855_v36 = vld [vmem:[%s7875_s4 + $0x40] sm:$0xf]  ;;  %v5032_v6 = vld [vmem:[%s7875_s4 + $0x40] sm:$0x10]  ;;  %v1372_v57 = vpop.f32.mrf.mxu1 }
 0x30a   :  { %v6322_v35 = vmax.f32 %v1527_v52, 0.0  ;;  %v1239_v22 = vadd.f32 %v1221_v59, %v1088_v5  ;;  %4779 = vmatmul.msk.bf16.gmra.mxu1 %vm1683_vm9, %v1897_v37  ;;  %4793 = vmatmul.msk.bf16.gmra.mxu2 %vm1683_vm9, %v2053_v38  ;;  %v2352_v16 = vand.u32 %v4814_v19, %v8022_v10  ;;  %v4856_v41 = vor.u32 %v5032_v6, %v4855_v36  ;;  %v1490_v38 = vpop.f32.mrf.mxu2 }
 0x30b   :  { %v2508_v34 = vand.u32 %v4828_v49, %v8022_v10  ;;  %v2664_v37 = vand.u32 %v4842_v56, %v8022_v10  ;;  %v6338_v23 = vsel %vm1089_vm4, %v2437_v26, %v2438_v24  ;;  %v2593_v5 = vrot.slane %v6241_v62, 3 }
 0x30c   :  { %8021 = vst [vmem:[#allocation33_spill] sm:$0xff] %v6322_v35  ;;  %v1390_v52 = vadd.f32 %v1372_v57, %v1239_v22  ;;  %2361 = vmatpush.bf16.msra.mxu0 %v2352_v16  ;;  %v1640_v19 = vrot.slane %v6322_v35, 5  ;;  %v2788_v14 = vand.u32 %v4856_v41, %v8022_v10  ;;  %v6344_v31 = vsel %vm1089_vm4, %v2438_v24, 0.0 }
 0x30d   :  { %8023 = vst [vmem:[#allocation34_spill] sm:$0xff] %v6338_v23  ;;  %2517 = vmatpush.bf16.msra.mxu1 %v2508_v34  ;;  %2673 = vmatpush.bf16.msra.mxu2 %v2664_v37  ;;  %v2594_v63 = vrot.slane %v6270_v58, 3  ;;  %v1582_v26 = vrot.slane %v6322_v35, 4  ;;  %v1864_v49 = vrot.slane %v6322_v35, 6  ;;  %v2020_v56 = vrot.slane %v6322_v35, 7 }
 0x30e   :  { %8024 = vst [vmem:[#allocation35_spill] sm:$0xff] %v6344_v31  ;;  %v1508_v59 = vadd.f32 %v1490_v38, %v1390_v52  ;;  %2797 = vmatpush.bf16.msrb.mxu3 %v2788_v14  ;;  %v1666_v57 = vsel %vm322_vm2, 0.0, %v1640_v19  ;;  %v6365_v34 = vsel %vm264_vm1, %v1580_v8, 0.0  ;;  %v2284_v38 = vrot.slane %v6322_v35, 1 }
 0x30f   :  { %v6353_v16 = vsel %vm1240_vm8, %v2593_v5, %v2594_v63  ;;  %v6356_v36 = vsel %vm1240_vm8, %v2594_v63, 0.0  ;;  %8027 = vst [vmem:[#allocation38_spill] sm:$0xff] %v6365_v34  ;;  %v1608_v41 = vsel %vm264_vm1, 0.0, %v1582_v26  ;;  %v1890_v52 = vsel %vm534_vm5, 0.0, %v1864_v49 }
 0x310   :  { %8025 = vst [vmem:[#allocation36_spill] sm:$0xff] %v6353_v16  ;;  %v1528_v24 = vadd.f32 %v5808_v53, %v1508_v59  ;;  %v2046_v53 = vsel %vm685_vm6, 0.0, %v2020_v56  ;;  %v2440_v14 = vrot.slane %v6322_v35, 2  ;;  %v2596_v63 = vrot.slane %v6322_v35, 3 }
 0x311   :  { %8026 = vst [vmem:[#allocation37_spill] sm:$0xff] %v6356_v36 }
 0x312   :  { %v6367_v37 = vmax.f32 %v1528_v24, 0.0 }
 0x314   :  { %v1641_v8 = vrot.slane %v6367_v37, 5  ;;  %v1583_v59 = vrot.slane %v6367_v37, 4  ;;  %v1865_v24 = vrot.slane %v6367_v37, 6  ;;  %v2021_v6 = vrot.slane %v6367_v37, 7 }
 0x315   :  { %v2285_v5 = vrot.slane %v6367_v37, 1  ;;  %v2441_v20 = vrot.slane %v6367_v37, 2  ;;  %v2597_v33 = vrot.slane %v6367_v37, 3 }
 0x316   :  { %v1642_v34 = vsel %vm322_vm2, %v1640_v19, %v1641_v8  ;;  %v6388_v44 = vsel %vm264_vm1, %v1582_v26, %v1583_v59  ;;  %v1866_v18 = vsel %vm534_vm5, %v1864_v49, %v1865_v24  ;;  %v2022_v10 = vsel %vm685_vm6, %v2020_v56, %v2021_v6 }
 0x317   :  { %v1674_v16 = vpack.c.bf16 %v1642_v34, %v1666_v57  ;;  %v1616_v36 = vpack.c.bf16 %v6388_v44, %v1608_v41  ;;  %v1898_v23 = vpack.c.bf16 %v1866_v18, %v1890_v52  ;;  %v2054_v22 = vpack.c.bf16 %v2022_v10, %v2046_v53  ;;  %v8028_v34 = vld [vmem:[#allocation3_spill] sm:$0xff]  ;;  %v8035_v53 = vld [vmem:[#allocation8_spill] sm:$0xff] }
 0x318   :  { %v6394_v35 = vsel %vm938_vm7, %v2284_v38, %v2285_v5  ;;  %v6397_v31 = vsel %vm938_vm7, %v2285_v5, 0.0  ;;  %v6400_v19 = vsel %vm1089_vm4, %v2440_v14, %v2441_v20  ;;  %v6403_v26 = vsel %vm1089_vm4, %v2441_v20, 0.0  ;;  %v8034_v5 = vld [vmem:[#allocation9_spill] sm:$0xff] }
 0x319   :  { %4754 = vmatmul.msk.bf16.gmra.mxu3 %vm1683_vm9, %v1674_v16  ;;  %4766 = vmatmul.msk.bf16.gmra.mxu0 %vm1683_vm9, %v1616_v36  ;;  %v2318_v18 = vpack.c.bf16 %v6397_v31, %v6394_v35  ;;  %v2474_v10 = vpack.c.bf16 %v6403_v26, %v6400_v19  ;;  %v6412_v49 = vsel %vm1240_vm8, %v2596_v63, %v2597_v33  ;;  %v6415_v56 = vsel %vm1240_vm8, %v2597_v33, 0.0  ;;  %v4895_v35 = vld [vmem:[%s7877_s6 + $0x10] sm:$0xf]  ;;  %v5035_v31 = vld [vmem:[%s7877_s6 + $0x10] sm:$0x10] }
 0x31a   :  { %4780 = vmatmul.msk.bf16.gmra.mxu1 %vm1683_vm9, %v1898_v23  ;;  %4794 = vmatmul.msk.bf16.gmra.mxu2 %vm1683_vm9, %v2054_v22  ;;  %v2630_v20 = vpack.c.bf16 %v6415_v56, %v6412_v49  ;;  %v6422_v16 = vsel %vm264_vm1, %v1583_v59, 0.0  ;;  %v8029_v41 = vpack.c.bf16 %v5828_v42, %v8028_v34  ;;  %v8030_v33 = vpack.c.bf16 %v5863_v40, %v5856_v7  ;;  %v8031_v23 = vld [vmem:[#allocation6_spill] sm:$0xff]  ;;  %v8032_v22 = vld [vmem:[#allocation5_spill] sm:$0xff]  ;;  %v4869_v19 = vld [vmem:[%s7877_s6 + $0x8] sm:$0xf] }
 0x31b   :  { %v2754_v36 = vpack.c.bf16 %v6422_v16, %v6388_v44  ;;  %v8033_v52 = vpack.c.bf16 %v8031_v23, %v8032_v22  ;;  %v8036_v38 = vpack.c.bf16 %v8034_v5, %v8035_v53  ;;  %v8037_v5 = vld [vmem:[#allocation7_spill] sm:$0xff]  ;;  %v8079_v56 = vld [vmem:[#allocation2_spill] sm:$0xff]  ;;  %v4951_v16 = vld [vmem:[%s7877_s6 + $0x30] sm:$0xf] }
 0x31c   :  { %v8038_v53 = vpack.c.bf16 %v5904_v51, %v8037_v5 }
 0x326   :  { %v1803_v6 = vpop.f32.mrf.mxu0 }
 0x327   :  { %v1943_v57 = vpop.f32.mrf.mxu1 }
 0x329   :  { %4801 = vmatmul.msk.bf16.vlgmr.msra.gmra.mxu3 %vm1683_vm9, %v8029_v41  ;;  %4815 = vmatmul.msk.bf16.vlgmr.msra.gmra.mxu0 %vm1683_vm9, %v8030_v33 }
 0x32a   :  { %4829 = vmatmul.msk.bf16.vlgmr.msra.gmra.mxu1 %vm1683_vm9, %v8033_v52  ;;  %4843 = vmatmul.msk.bf16.vlgmr.msra.gmra.mxu2 %vm1683_vm9, %v8036_v38 }
 0x32c   :  { %v1722_v14 = vpop.f32.mrf.mxu3 }
 0x32d   :  { %v1804_v63 = vadd.f32 %v1803_v6, %v1722_v14  ;;  %v2099_v42 = vpop.f32.mrf.mxu2  ;;  %v8039_v6 = vpack.c.bf16 %v5941_v61, %v5934_v48  ;;  %v8042_v14 = vld [vmem:[#allocation15_spill] sm:$0xff] }
 0x32e   :  { %v1805_v8 = vpop.f32.mrf.mxu0 }
 0x32f   :  { %v1983_v59 = vadd.f32 %v1943_v57, %v1804_v63  ;;  %v1945_v24 = vpop.f32.mrf.mxu1  ;;  %v8040_v57 = vld [vmem:[#allocation12_spill] sm:$0xff]  ;;  %v8043_v63 = vld [vmem:[#allocation14_spill] sm:$0xff] }
 0x330   :  { %v8041_v38 = vpack.c.bf16 %v5947_v1, %v8040_v57  ;;  %v8045_v57 = vld [vmem:[#allocation13_spill] sm:$0xff] }
 0x331   :  { %v6442_v34 = vadd.f32 %v2099_v42, %v1983_v59  ;;  %v8044_v42 = vpack.c.bf16 %v8042_v14, %v8043_v63  ;;  %v8049_v14 = vld [vmem:[#allocation20_spill] sm:$0xff]  ;;  %v8050_v63 = vld [vmem:[#allocation19_spill] sm:$0xff] }
 0x334   :  { %v1724_v7 = vpop.f32.mrf.mxu3 }
 0x335   :  { %v1806_v40 = vadd.f32 %v1805_v8, %v1724_v7  ;;  %v2101_v41 = vpop.f32.mrf.mxu2 }
 0x336   :  { %v1808_v33 = vpop.f32.mrf.mxu0 }
 0x337   :  { %v1984_v23 = vadd.f32 %v1945_v24, %v1806_v40  ;;  %v1948_v22 = vpop.f32.mrf.mxu1 }
 0x339   :  { %v6444_v52 = vadd.f32 %v2101_v41, %v1984_v23  ;;  %4802 = vmatmul.msk.bf16.gmra.mxu3 %vm1683_vm9, %v8038_v53  ;;  %4816 = vmatmul.msk.bf16.gmra.mxu0 %vm1683_vm9, %v8039_v6 }
 0x33a   :  { %4830 = vmatmul.msk.bf16.gmra.mxu1 %vm1683_vm9, %v8041_v38  ;;  %4844 = vmatmul.msk.bf16.gmra.mxu2 %vm1683_vm9, %v8044_v42  ;;  %v8046_v38 = vpack.c.bf16 %v5984_v2, %v8045_v57  ;;  %v8051_v42 = vpack.c.bf16 %v8049_v14, %v8050_v63 }
 0x33c   :  { %v1727_v8 = vpop.f32.mrf.mxu3 }
 0x33d   :  { %v1809_v59 = vadd.f32 %v1808_v33, %v1727_v8  ;;  %v2104_v51 = vpop.f32.mrf.mxu2  ;;  %v8047_v33 = vpack.c.bf16 %v6017_v13, %v6012_v15 }
 0x33e   :  { %v1810_v24 = vpop.f32.mrf.mxu0 }
 0x33f   :  { %v1985_v7 = vadd.f32 %v1948_v22, %v1809_v59  ;;  %v1950_v40 = vpop.f32.mrf.mxu1  ;;  %v8048_v22 = vpack.c.bf16 %v6023_v32, %v6020_v17 }
 0x341   :  { %v6462_v41 = vadd.f32 %v2104_v51, %v1985_v7 }
 0x344   :  { %v1729_v48 = vpop.f32.mrf.mxu3 }
 0x345   :  { %v1811_v61 = vadd.f32 %v1810_v24, %v1729_v48  ;;  %v2106_v23 = vpop.f32.mrf.mxu2 }
 0x346   :  { %v1813_v5 = vpop.f32.mrf.mxu0 }
 0x347   :  { %v1986_v1 = vadd.f32 %v1950_v40, %v1811_v61  ;;  %v1953_v53 = vpop.f32.mrf.mxu1 }
 0x349   :  { %v6464_v6 = vadd.f32 %v2106_v23, %v1986_v1  ;;  %4803 = vmatmul.msk.bf16.gmra.mxu3 %vm1683_vm9, %v8046_v38  ;;  %4817 = vmatmul.msk.bf16.gmra.mxu0 %vm1683_vm9, %v8047_v33  ;;  %v8052_v1 = vld [vmem:[#allocation18_spill] sm:$0xff]  ;;  %v8056_v38 = vld [vmem:[#allocation24_spill] sm:$0xff] }
 0x34a   :  { %4831 = vmatmul.msk.bf16.gmra.mxu1 %vm1683_vm9, %v8048_v22  ;;  %4845 = vmatmul.msk.bf16.gmra.mxu2 %vm1683_vm9, %v8051_v42  ;;  %v8053_v57 = vpack.c.bf16 %v6060_v0, %v8052_v1  ;;  %v8057_v33 = vpack.c.bf16 %v6111_v55, %v8056_v38  ;;  %v8058_v55 = vld [vmem:[#allocation23_spill] sm:$0xff] }
 0x34c   :  { %v1732_v8 = vpop.f32.mrf.mxu3 }
 0x34d   :  { %v1814_v59 = vadd.f32 %v1813_v5, %v1732_v8  ;;  %v2109_v2 = vpop.f32.mrf.mxu2  ;;  %v8054_v5 = vpack.c.bf16 %v6090_v11, %v6085_v4 }
 0x34e   :  { %v1815_v51 = vpop.f32.mrf.mxu0 }
 0x34f   :  { %v1987_v24 = vadd.f32 %v1953_v53, %v1814_v59  ;;  %v1955_v7 = vpop.f32.mrf.mxu1  ;;  %v8055_v53 = vpack.c.bf16 %v6096_v25, %v6093_v3 }
 0x351   :  { %v6482_v40 = vadd.f32 %v2109_v2, %v1987_v24 }
 0x354   :  { %v1734_v15 = vpop.f32.mrf.mxu3 }
 0x355   :  { %v1816_v13 = vadd.f32 %v1815_v51, %v1734_v15  ;;  %v2111_v48 = vpop.f32.mrf.mxu2  ;;  %v8060_v15 = vpack.c.bf16 %v6161_v9, %v6156_v43 }
 0x356   :  { %v1818_v61 = vpop.f32.mrf.mxu0 }
 0x357   :  { %v1988_v17 = vadd.f32 %v1955_v7, %v1816_v13  ;;  %v1958_v32 = vpop.f32.mrf.mxu1  ;;  %v8059_v7 = vpack.c.bf16 %v6131_v39, %v8058_v55  ;;  %v8061_v13 = vpack.c.bf16 %v6167_v12, %v6164_v60  ;;  %v8075_v55 = vld [vmem:[#allocation36_spill] sm:$0xff] }
 0x359   :  { %v6484_v23 = vadd.f32 %v2111_v48, %v1988_v17  ;;  %4804 = vmatmul.msk.bf16.gmra.mxu3 %vm1683_vm9, %v8053_v57  ;;  %4818 = vmatmul.msk.bf16.gmra.mxu0 %vm1683_vm9, %v8054_v5  ;;  %v8062_v48 = vld [vmem:[#allocation28_spill] sm:$0xff] }
 0x35a   :  { %4832 = vmatmul.msk.bf16.gmra.mxu1 %vm1683_vm9, %v8055_v53  ;;  %4846 = vmatmul.msk.bf16.gmra.mxu2 %vm1683_vm9, %v8057_v33  ;;  %v8066_v33 = vpack.c.bf16 %v6232_v28, %v6227_v46 }
 0x35c   :  { %v1737_v22 = vpop.f32.mrf.mxu3 }
 0x35d   :  { %v1819_v14 = vadd.f32 %v1818_v61, %v1737_v22  ;;  %v2114_v0 = vpop.f32.mrf.mxu2  ;;  %v8063_v61 = vpack.c.bf16 %v6182_v54, %v8062_v48  ;;  %v8064_v54 = vld [vmem:[#allocation27_spill] sm:$0xff]  ;;  %v8067_v22 = vpack.c.bf16 %v6238_v47, %v6235_v27 }
 0x35e   :  { %v1820_v63 = vpop.f32.mrf.mxu0  ;;  %v8065_v38 = vpack.c.bf16 %v6202_v45, %v8064_v54 }
 0x35f   :  { %v1989_v42 = vadd.f32 %v1958_v32, %v1819_v14  ;;  %v1960_v8 = vpop.f32.mrf.mxu1  ;;  %v8068_v14 = vpack.c.bf16 %v6253_v21, %v6250_v30  ;;  %v8069_v30 = vpack.c.bf16 %v6270_v58, %v6241_v62  ;;  %v8070_v21 = vpack.c.bf16 %v6320_v50, %v6317_v29 }
 0x361   :  { %v6502_v59 = vadd.f32 %v2114_v0, %v1989_v42 }
 0x364   :  { %v1739_v4 = vpop.f32.mrf.mxu3 }
 0x365   :  { %v1821_v11 = vadd.f32 %v1820_v63, %v1739_v4  ;;  %v2116_v2 = vpop.f32.mrf.mxu2 }
 0x366   :  { %v1823_v51 = vpop.f32.mrf.mxu0 }
 0x367   :  { %v1990_v3 = vadd.f32 %v1960_v8, %v1821_v11  ;;  %v1963_v25 = vpop.f32.mrf.mxu1 }
 0x369   :  { %v6504_v24 = vadd.f32 %v2116_v2, %v1990_v3  ;;  %4805 = vmatmul.msk.bf16.gmra.mxu3 %vm1683_vm9, %v8059_v7  ;;  %4819 = vmatmul.msk.bf16.gmra.mxu0 %vm1683_vm9, %v8060_v15  ;;  %v8071_v2 = vld [vmem:[#allocation35_spill] sm:$0xff] }
 0x36a   :  { %4833 = vmatmul.msk.bf16.gmra.mxu1 %vm1683_vm9, %v8061_v13  ;;  %4847 = vmatmul.msk.bf16.gmra.mxu2 %vm1683_vm9, %v8063_v61 }
 0x36c   :  { %v1742_v17 = vpop.f32.mrf.mxu3 }
 0x36d   :  { %v1824_v32 = vadd.f32 %v1823_v51, %v1742_v17  ;;  %v2119_v39 = vpop.f32.mrf.mxu2  ;;  %v8072_v51 = vld [vmem:[#allocation34_spill] sm:$0xff] }
 0x36e   :  { %v6522_v1 = vpop.f32.mrf.mxu0  ;;  %v8073_v3 = vpack.c.bf16 %v8071_v2, %v8072_v51 }
 0x36f   :  { %v1991_v57 = vadd.f32 %v1963_v25, %v1824_v32  ;;  %v6524_v5 = vpop.f32.mrf.mxu1  ;;  %v8074_v25 = vld [vmem:[#allocation37_spill] sm:$0xff] }
 0x370   :  { %v8076_v7 = vpack.c.bf16 %v8074_v25, %v8075_v55  ;;  %v8077_v32 = vld [vmem:[#allocation33_spill] sm:$0xff]  ;;  %v8084_v25 = vld [vmem:[#allocation11_spill] sm:$0xff] }
 0x371   :  { %v6526_v43 = vadd.f32 %v2119_v39, %v1991_v57  ;;  %v8078_v39 = vpack.c.bf16 %v6367_v37, %v8077_v32 }
 0x374   :  { %v6528_v9 = vpop.f32.mrf.mxu3 }
 0x375   :  { %v6530_v60 = vpop.f32.mrf.mxu2 }
 0x376   :  { %v1828_v12 = vpop.f32.mrf.mxu0 }
 0x377   :  { %v1968_v53 = vpop.f32.mrf.mxu1 }
 0x379   :  { %4806 = vmatmul.msk.bf16.gmra.mxu3 %vm1683_vm9, %v8065_v38  ;;  %4820 = vmatmul.msk.bf16.gmra.mxu0 %vm1683_vm9, %v8066_v33 }
 0x37a   :  { %4834 = vmatmul.msk.bf16.gmra.mxu1 %vm1683_vm9, %v8067_v22  ;;  %4848 = vmatmul.msk.bf16.gmra.mxu2 %vm1683_vm9, %v8068_v14  ;;  %v8080_v14 = vld [vmem:[#allocation10_spill] sm:$0xff] }
 0x37c   :  { %v1747_v0 = vpop.f32.mrf.mxu3 }
 0x37d   :  { %v1829_v63 = vadd.f32 %v1828_v12, %v1747_v0  ;;  %v2124_v45 = vpop.f32.mrf.mxu2  ;;  %v8081_v0 = vld [vmem:[#allocation4_spill] sm:$0xff] }
 0x37e   :  { %v6548_v42 = vpop.f32.mrf.mxu0 }
 0x37f   :  { %v1993_v8 = vadd.f32 %v1968_v53, %v1829_v63  ;;  %v6550_v4 = vpop.f32.mrf.mxu1  ;;  %v8082_v63 = vpack.c.bf16 %v8080_v14, %v8081_v0 }
 0x381   :  { %v6552_v46 = vadd.f32 %v2124_v45, %v1993_v8  ;;  %v4881_v45 = vld [vmem:[%s7877_s6] sm:$0xf]  ;;  %v5033_v8 = vld [vmem:[%s7877_s6] sm:$0x10] }
 0x384   :  { %v6554_v28 = vpop.f32.mrf.mxu3 }
 0x385   :  { %v6556_v27 = vpop.f32.mrf.mxu2 }
 0x386   :  { %v1833_v47 = vpop.f32.mrf.mxu0 }
 0x387   :  { %v1973_v11 = vpop.f32.mrf.mxu1 }
 0x389   :  { %4807 = vmatmul.msk.bf16.gmra.mxu3 %vm1683_vm9, %v8069_v30  ;;  %4821 = vmatmul.msk.bf16.gmra.mxu0 %vm1683_vm9, %v8070_v21  ;;  %v4882_v30 = vor.u32 %v5033_v8, %v4881_v45 }
 0x38a   :  { %4835 = vmatmul.msk.bf16.gmra.mxu1 %vm1683_vm9, %v8073_v3  ;;  %4849 = vmatmul.msk.bf16.gmra.mxu2 %vm1683_vm9, %v8076_v7  ;;  %v8083_v3 = vld [vmem:[#allocation16_spill] sm:$0xff] }
 0x38b   :  { %v8085_v55 = vpack.c.bf16 %v8083_v3, %v8084_v25 }
 0x38c   :  { %v1752_v15 = vpop.f32.mrf.mxu3 }
 0x38d   :  { %v1834_v62 = vadd.f32 %v1833_v47, %v1752_v15  ;;  %v2129_v58 = vpop.f32.mrf.mxu2 }
 0x38e   :  { %v6576_v29 = vpop.f32.mrf.mxu0 }
 0x38f   :  { %v1995_v13 = vadd.f32 %v1973_v11, %v1834_v62  ;;  %v6578_v50 = vpop.f32.mrf.mxu1  ;;  %v3135_v11 = vand.u32 %v4882_v30, %v8079_v56  ;;  %v8099_v30 = vld [vmem:[#allocation38_spill] sm:$0xff] }
 0x391   :  { %v6574_v48 = vadd.f32 %v2129_v58, %v1995_v13  ;;  %3144 = vmatpush.bf16.msrb.mxu1 %v3135_v11  ;;  %v8087_v13 = vld [vmem:[#allocation17_spill] sm:$0xff]  ;;  %v8100_v11 = vld [vmem:[#allocation32_spill] sm:$0xff] }
 0x394   :  { %v6580_v61 = vpop.f32.mrf.mxu3 }
 0x395   :  { %v6582_v17 = vpop.f32.mrf.mxu2 }
 0x396   :  { %v1838_v57 = vpop.f32.mrf.mxu0 }
 0x397   :  { %v1978_v53 = vpop.f32.mrf.mxu1 }
 0x399   :  { %4808 = vmatmul.msk.bf16.gmra.mxu3 %vm1683_vm9, %v8078_v39  ;;  %4822 = vmatmul.msk.bf16.gmra.mxu0 %vm1683_vm9, %v2318_v18  ;;  %v4896_v18 = vor.u32 %v5035_v31, %v4895_v35  ;;  %v8092_v31 = vld [vmem:[#allocation29_spill] sm:$0xff] }
 0x39a   :  { %4836 = vmatmul.msk.bf16.gmra.mxu1 %vm1683_vm9, %v2474_v10  ;;  %4850 = vmatmul.msk.bf16.gmra.mxu2 %vm1683_vm9, %v2630_v20  ;;  %v5034_v10 = vld [vmem:[%s7877_s6 + $0x8] sm:$0x10] }
 0x39b   :  { %v4870_v49 = vor.u32 %v5034_v10, %v4869_v19  ;;  %v3275_v20 = vand.u32 %v4896_v18, %v8079_v56 }
 0x39c   :  { %v1757_v12 = vpop.f32.mrf.mxu3 }
 0x39d   :  { %v1839_v37 = vadd.f32 %v1838_v57, %v1757_v12  ;;  %v2134_v38 = vpop.f32.mrf.mxu2  ;;  %v3054_v22 = vand.u32 %v4870_v49, %v8079_v56  ;;  %3284 = vmatpush.bf16.msrb.mxu2 %v3275_v20 }
 0x39e   :  { %v6670_v10 = vpop.f32.mrf.mxu0 }
 0x39f   :  { %v1997_v54 = vadd.f32 %v1978_v53, %v1839_v37  ;;  %3063 = vmatpush.bf16.msrb.mxu0 %v3054_v22  ;;  %v8089_v37 = vld [vmem:[#allocation25_spill] sm:$0xff]  ;;  %v6674_v20 = vpop.f32.mrf.mxu1  ;;  %v8096_v22 = vld [vmem:[#allocation30_spill] sm:$0xff] }
 0x3a1   :  { %v6600_v33 = vadd.f32 %v2134_v38, %v1997_v54 }
 0x3a4   :  { %v6611_v26 = vpop.f32.mrf.mxu3 }
 0x3a5   :  { %v6683_v45 = vpop.f32.mrf.mxu2 }
 0x3a6   :  { %8098 = vst [vmem:[#allocation3_spill] sm:$0xff] %v6683_v45 }
 0x3a9   :  { %4857 = vmatmul.msk.bf16.vlgmr.msrb.gmra.mxu3 %vm1683_vm9, %v8082_v63 }
 0x3ac   :  { %v2207_v47 = vpop.f32.mrf.mxu3 }
 0x3ad   :  { %v2247_v21 = vadd.f32 %v2207_v47, %v6442_v34  ;;  %v8086_v34 = vld [vmem:[#allocation21_spill] sm:$0xff]  ;;  %v2675_v3 = vpop.f32.mrf.mxu2 }
 0x3ae   :  { %v8088_v32 = vpack.c.bf16 %v8086_v34, %v8087_v13 }
 0x3b4   :  { %v2209_v2 = vpop.f32.mrf.mxu3 }
 0x3b5   :  { %v6631_v51 = vadd.f32 %v2209_v2, %v6444_v52  ;;  %v8101_v2 = vpack.c.bf16 %v8099_v30, %v8100_v11  ;;  %v2677_v34 = vpop.f32.mrf.mxu2 }
 0x3b9   :  { %4858 = vmatmul.msk.bf16.gmra.mxu3 %vm1683_vm9, %v8085_v55 }
 0x3bc   :  { %v2212_v7 = vpop.f32.mrf.mxu3 }
 0x3bd   :  { %v6638_v15 = vadd.f32 %v2212_v7, %v6462_v41  ;;  %v8090_v41 = vld [vmem:[#allocation22_spill] sm:$0xff] }
 0x3be   :  { %v8091_v53 = vpack.c.bf16 %v8089_v37, %v8090_v41 }
 0x3c4   :  { %v2214_v62 = vpop.f32.mrf.mxu3 }
 0x3c5   :  { %v6641_v58 = vadd.f32 %v2214_v62, %v6464_v6 }
 0x3c9   :  { %4859 = vmatmul.msk.bf16.gmra.mxu3 %vm1683_vm9, %v8088_v32 }
 0x3cc   :  { %v2217_v52 = vpop.f32.mrf.mxu3 }
 0x3cd   :  { %v6648_v39 = vadd.f32 %v2217_v52, %v6482_v40  ;;  %v8093_v40 = vld [vmem:[#allocation26_spill] sm:$0xff]  ;;  %v4909_v52 = vld [vmem:[%s7877_s6 + $0x18] sm:$0xf] }
 0x3ce   :  { %v8094_v19 = vpack.c.bf16 %v8092_v31, %v8093_v40 }
 0x3d4   :  { %v2219_v57 = vpop.f32.mrf.mxu3 }
 0x3d5   :  { %v6651_v12 = vadd.f32 %v2219_v57, %v6484_v23 }
 0x3d9   :  { %4860 = vmatmul.msk.bf16.gmra.mxu3 %vm1683_vm9, %v8091_v53 }
 0x3dc   :  { %v2222_v6 = vpop.f32.mrf.mxu3 }
 0x3dd   :  { %v6658_v54 = vadd.f32 %v2222_v6, %v6502_v59  ;;  %v8095_v59 = vld [vmem:[#allocation31_spill] sm:$0xff]  ;;  %v2680_v6 = vpop.f32.mrf.mxu2 }
 0x3de   :  { %v8097_v14 = vpack.c.bf16 %v8095_v59, %v8096_v22 }
 0x3e4   :  { %v2224_v38 = vpop.f32.mrf.mxu3 }
 0x3e5   :  { %v6661_v35 = vadd.f32 %v2224_v38, %v6504_v24  ;;  %v2363_v24 = vpop.f32.mrf.mxu0  ;;  %v4923_v38 = vld [vmem:[%s7877_s6 + $0x20] sm:$0xf]  ;;  %v6726_v30 = vpop.f32.mrf.mxu2 }
 0x3e6   :  { %v2403_v40 = vadd.f32 %v2363_v24, %v2247_v21  ;;  %v5038_v21 = vld [vmem:[%s7877_s6 + $0x28] sm:$0x10] }
 0x3e9   :  { %4861 = vmatmul.msk.bf16.gmra.mxu3 %vm1683_vm9, %v8094_v19 }
 0x3ec   :  { %v2227_v23 = vpop.f32.mrf.mxu3 }
 0x3ed   :  { %v6668_v18 = vadd.f32 %v2227_v23, %v6526_v43  ;;  %v2519_v43 = vpop.f32.mrf.mxu1  ;;  %v2365_v47 = vpop.f32.mrf.mxu0 }
 0x3f4   :  { %v6672_v49 = vpop.f32.mrf.mxu3 }
 0x3f5   :  { %v2521_v25 = vpop.f32.mrf.mxu1  ;;  %v2368_v62 = vpop.f32.mrf.mxu0 }
 0x3f9   :  { %4862 = vmatmul.msk.bf16.gmra.mxu3 %vm1683_vm9, %v8097_v14 }
 0x3fc   :  { %v2232_v0 = vpop.f32.mrf.mxu3 }
 0x3fd   :  { %v6681_v63 = vadd.f32 %v2232_v0, %v6552_v46  ;;  %v2524_v13 = vpop.f32.mrf.mxu1  ;;  %v2370_v32 = vpop.f32.mrf.mxu0  ;;  %v2559_v0 = vadd.f32 %v2519_v43, %v2403_v40  ;;  %v6740_v43 = vld [vmem:[%s7878_s5] ss:$0 sm:$0xff] }
 0x3fe   :  { %v2406_v40 = vadd.f32 %v2370_v32, %v6641_v58 }
 0x404   :  { %v6685_v8 = vpop.f32.mrf.mxu3 }
 0x405   :  { %v2526_v44 = vpop.f32.mrf.mxu1  ;;  %v2373_v19 = vpop.f32.mrf.mxu0 }
 0x406   :  { %v2407_v58 = vadd.f32 %v2373_v19, %v6648_v39 }
 0x409   :  { %4863 = vmatmul.msk.bf16.gmra.mxu3 %vm1683_vm9, %v8101_v2  ;;  %v4937_v2 = vld [vmem:[%s7877_s6 + $0x28] sm:$0xf] }
 0x40a   :  { %v4938_v24 = vor.u32 %v5038_v21, %v4937_v2 }
 0x40c   :  { %v2237_v55 = vpop.f32.mrf.mxu3 }
 0x40d   :  { %v6692_v7 = vadd.f32 %v2237_v55, %v6574_v48  ;;  %v5036_v48 = vld [vmem:[%s7877_s6 + $0x18] sm:$0x10]  ;;  %v6728_v11 = vpop.f32.mrf.mxu1  ;;  %v2715_v55 = vadd.f32 %v2675_v3, %v2559_v0 }
 0x40e   :  { %v4910_v57 = vor.u32 %v5036_v48, %v4909_v52  ;;  %v2404_v52 = vadd.f32 %v2365_v47, %v6631_v51  ;;  %v6749_v47 = vpop.f32.mrf.mxu2 }
 0x410   :  { %v3431_v41 = vand.u32 %v4910_v57, %v8079_v56  ;;  %v3695_v57 = vand.u32 %v4938_v24, %v8079_v56 }
 0x412   :  { %3440 = vmatpush.bf16.msra.mxu3 %v3431_v41  ;;  %3704 = vmatpush.bf16.msra.mxu1 %v3695_v57 }
 0x414   :  { %v6694_v46 = vpop.f32.mrf.mxu3 }
 0x415   :  { %8102 = vst [vmem:[#allocation6_spill] sm:$0xff] %v6694_v46 }
 0x419   :  { %4864 = vmatmul.msk.bf16.gmra.mxu3 %vm1683_vm9, %v2754_v36  ;;  %v5039_v36 = vld [vmem:[%s7877_s6 + $0x30] sm:$0x10] }
 0x41a   :  { %v4952_v31 = vor.u32 %v5039_v36, %v4951_v16  ;;  %v2560_v16 = vadd.f32 %v2521_v25, %v2404_v52 }
 0x41c   :  { %v2242_v37 = vpop.f32.mrf.mxu3  ;;  %v3851_v22 = vand.u32 %v4952_v31, %v8079_v56  ;;  %v2716_v51 = vadd.f32 %v2677_v34, %v2560_v16  ;;  %v6751_v31 = vpop.f32.mrf.mxu1 }
 0x41d   :  { %v6708_v53 = vadd.f32 %v2242_v37, %v6600_v33  ;;  %v5037_v33 = vld [vmem:[%s7877_s6 + $0x20] sm:$0x10]  ;;  %v6743_v37 = vpop.f32.mrf.mxu0 }
 0x41e   :  { %v4924_v23 = vor.u32 %v5037_v33, %v4923_v38  ;;  %3860 = vmatpush.bf16.msra.mxu2 %v3851_v22  ;;  %v2405_v38 = vadd.f32 %v2368_v62, %v6638_v15 }
 0x41f   :  { %8103 = vst [vmem:[#allocation5_spill] sm:$0xff] %v6708_v53 }
 0x420   :  { %v3587_v14 = vand.u32 %v4924_v23, %v8079_v56  ;;  %v2561_v33 = vadd.f32 %v2524_v13, %v2405_v38  ;;  %v2562_v13 = vadd.f32 %v2526_v44, %v2406_v40 }
 0x422   :  { %3596 = vmatpush.bf16.msra.mxu0 %v3587_v14  ;;  %v2717_v21 = vadd.f32 %v2680_v6, %v2561_v33 }
 0x424   :  { %v6722_v59 = vpop.f32.mrf.mxu3 }
 0x425   :  { %8104 = vst [vmem:[#allocation9_spill] sm:$0xff] %v6722_v59  ;;  %v6759_v34 = vpop.f32.mrf.mxu0 }
 0x42c   :  { %v2799_v48 = vpop.f32.mrf.mxu3 }
 0x42d   :  { %v2839_v41 = vadd.f32 %v2799_v48, %v2715_v55 }
 0x42f   :  { %v2859_v36 = vadd.f32 %v6740_v43, %v2839_v41 }
 0x431   :  { %v6747_v3 = vmax.f32 %v2859_v36, 0.0 }
 0x433   :  { %8105 = vst [vmem:[#allocation8_spill] sm:$0xff] %v6747_v3  ;;  %v2965_v14 = vrot.slane %v6747_v3, 4  ;;  %v2907_v25 = vrot.slane %v6747_v3, 3  ;;  %v3186_v0 = vrot.slane %v6747_v3, 5  ;;  %v3342_v15 = vrot.slane %v6747_v3, 6 }
 0x434   :  { %v2801_v23 = vpop.f32.mrf.mxu3  ;;  %v3498_v62 = vrot.slane %v6747_v3, 7  ;;  %v3762_v55 = vrot.slane %v6747_v3, 1  ;;  %v3918_v52 = vrot.slane %v6747_v3, 2 }
 0x435   :  { %v2840_v22 = vadd.f32 %v2801_v23, %v2716_v51  ;;  %v3005_v24 = vsel %vm264_vm1, 0.0, %v2965_v14  ;;  %v2947_v48 = vsel %vm1240_vm8, 0.0, %v2907_v25  ;;  %v3226_v57 = vsel %vm322_vm2, 0.0, %v3186_v0  ;;  %v6783_v23 = vpop.f32.mrf.mxu2 }
 0x436   :  { %v3382_v41 = vsel %vm534_vm5, 0.0, %v3342_v15  ;;  %v6772_v16 = vsel %vm685_vm6, 0.0, %v3498_v62 }
 0x437   :  { %v2860_v2 = vadd.f32 %v6740_v43, %v2840_v22  ;;  %v6785_v22 = vpop.f32.mrf.mxu1 }
 0x439   :  { %v6763_v32 = vmax.f32 %v2860_v2, 0.0 }
 0x43b   :  { %8106 = vst [vmem:[#allocation7_spill] sm:$0xff] %v6763_v32  ;;  %v2966_v6 = vrot.slane %v6763_v32, 4  ;;  %v2908_v39 = vrot.slane %v6763_v32, 3  ;;  %v3187_v44 = vrot.slane %v6763_v32, 5  ;;  %v3343_v19 = vrot.slane %v6763_v32, 6 }
 0x43c   :  { %v2804_v36 = vpop.f32.mrf.mxu3  ;;  %v3499_v38 = vrot.slane %v6763_v32, 7  ;;  %v3763_v33 = vrot.slane %v6763_v32, 1  ;;  %v3919_v40 = vrot.slane %v6763_v32, 2 }
 0x43d   :  { %v2841_v2 = vadd.f32 %v2804_v36, %v2717_v21  ;;  %v6788_v56 = vsel %vm264_vm1, %v2965_v14, %v2966_v6  ;;  %v6791_v59 = vsel %vm1240_vm8, %v2907_v25, %v2908_v39  ;;  %v6794_v53 = vsel %vm322_vm2, %v3186_v0, %v3187_v44 }
 0x43e   :  { %8107 = vst [vmem:[#allocation12_spill] sm:$0xff] %v6788_v56  ;;  %v3013_v51 = vpack.c.bf16 %v6788_v56, %v3005_v24  ;;  %v2955_v3 = vpack.c.bf16 %v6791_v59, %v2947_v48  ;;  %v3234_v32 = vpack.c.bf16 %v6794_v53, %v3226_v57  ;;  %v3344_v45 = vsel %vm534_vm5, %v3342_v15, %v3343_v19 }
 0x43f   :  { %8108 = vst [vmem:[#allocation15_spill] sm:$0xff] %v6791_v59  ;;  %v2861_v46 = vadd.f32 %v6740_v43, %v2841_v2  ;;  %v3390_v21 = vpack.c.bf16 %v3344_v45, %v3382_v41  ;;  %v6802_v14 = vsel %vm685_vm6, %v3498_v62, %v3499_v38  ;;  %v6805_v25 = vsel %vm938_vm7, %v3762_v55, %v3763_v33  ;;  %v6820_v62 = vpop.f32.mrf.mxu0 }
 0x440   :  { %8109 = vst [vmem:[#allocation14_spill] sm:$0xff] %v6794_v53  ;;  %4871 = vmatmul.msk.bf16.vlgmr.msrb.gmra.mxu0 %vm1683_vm9, %v3013_v51  ;;  %4883 = vmatmul.msk.bf16.vlgmr.msrb.gmra.mxu1 %vm1683_vm9, %v2955_v3  ;;  %v6812_v24 = vsel %vm938_vm7, %v3763_v33, 0.0  ;;  %v6815_v15 = vsel %vm1089_vm4, %v3918_v52, %v3919_v40  ;;  %v6818_v45 = vsel %vm1089_vm4, %v3919_v40, 0.0  ;;  %v6831_v52 = vsel %vm1240_vm8, %v2908_v39, 0.0 }
 0x441   :  { %v6822_v55 = vmax.f32 %v2861_v46, 0.0  ;;  %4897 = vmatmul.msk.bf16.vlgmr.msrb.gmra.mxu2 %vm1683_vm9, %v3234_v32  ;;  %4911 = vmatmul.msk.bf16.vlgmr.msra.gmra.mxu3 %vm1683_vm9, %v3390_v21  ;;  %8111 = vst [vmem:[#allocation20_spill] sm:$0xff] %v6831_v52  ;;  %v6836_v41 = vsel %vm264_vm1, %v2966_v6, 0.0  ;;  %v2718_v46 = vadd.f32 %v6726_v30, %v2562_v13  ;;  %v6840_v32 = vsel %vm322_vm2, %v3187_v44, 0.0 }
 0x442   :  { %8112 = vst [vmem:[#allocation19_spill] sm:$0xff] %v6836_v41  ;;  %v1826_v19 = vadd.f32 %v6522_v1, %v6528_v9  ;;  %v2563_v36 = vadd.f32 %v6728_v11, %v2407_v58  ;;  %v2408_v39 = vadd.f32 %v6743_v37, %v6651_v12  ;;  %v6856_v11 = vpop.f32.mrf.mxu2  ;;  %v6858_v12 = vpop.f32.mrf.mxu1  ;;  %v2409_v21 = vadd.f32 %v6759_v34, %v6658_v54 }
 0x443   :  { %8110 = vst [vmem:[#allocation13_spill] sm:$0xff] %v6822_v55  ;;  %v2968_v6 = vrot.slane %v6822_v55, 4  ;;  %v2910_v30 = vrot.slane %v6822_v55, 3  ;;  %v3189_v13 = vrot.slane %v6822_v55, 5  ;;  %v3345_v44 = vrot.slane %v6822_v55, 6 }
 0x444   :  { %8113 = vst [vmem:[#allocation18_spill] sm:$0xff] %v6840_v32  ;;  %v2806_v38 = vpop.f32.mrf.mxu3  ;;  %v3501_v1 = vrot.slane %v6822_v55, 7  ;;  %v1992_v58 = vadd.f32 %v6524_v5, %v1826_v19  ;;  %v2719_v40 = vadd.f32 %v6749_v47, %v2563_v36  ;;  %v2564_v2 = vadd.f32 %v6751_v31, %v2408_v39 }
 0x445   :  { %v2842_v33 = vadd.f32 %v2806_v38, %v2718_v46  ;;  %v3006_v38 = vsel %vm264_vm1, 0.0, %v2968_v6  ;;  %v3765_v9 = vrot.slane %v6822_v55, 1  ;;  %v3921_v51 = vrot.slane %v6822_v55, 2 }
 0x446   :  { %v2948_v57 = vsel %vm1240_vm8, 0.0, %v2910_v30  ;;  %v3383_v5 = vsel %vm534_vm5, 0.0, %v3345_v44  ;;  %v6875_v47 = vsel %vm685_vm6, 0.0, %v3501_v1 }
 0x447   :  { %v2862_v37 = vadd.f32 %v6740_v43, %v2842_v33  ;;  %v3227_v33 = vsel %vm322_vm2, 0.0, %v3189_v13  ;;  %v2383_v31 = vpop.f32.mrf.mxu0 }
 0x449   :  { %v6866_v46 = vmax.f32 %v2862_v37, 0.0 }
 0x44b   :  { %8114 = vst [vmem:[#allocation24_spill] sm:$0xff] %v6866_v46  ;;  %v2969_v54 = vrot.slane %v6866_v46, 4  ;;  %v2911_v34 = vrot.slane %v6866_v46, 3  ;;  %v3190_v19 = vrot.slane %v6866_v46, 5  ;;  %v3346_v36 = vrot.slane %v6866_v46, 6 }
 0x44c   :  { %v2809_v39 = vpop.f32.mrf.mxu3  ;;  %v3502_v37 = vrot.slane %v6866_v46, 7  ;;  %v3766_v3 = vrot.slane %v6866_v46, 1  ;;  %v3922_v0 = vrot.slane %v6866_v46, 2 }
 0x44d   :  { %v2843_v53 = vadd.f32 %v2809_v39, %v2719_v40  ;;  %v6887_v32 = vsel %vm264_vm1, %v2968_v6, %v2969_v54  ;;  %v6890_v56 = vsel %vm1240_vm8, %v2910_v30, %v2911_v34  ;;  %v6893_v41 = vsel %vm322_vm2, %v3189_v13, %v3190_v19 }
 0x44e   :  { %8115 = vst [vmem:[#allocation23_spill] sm:$0xff] %v6887_v32  ;;  %v3014_v59 = vpack.c.bf16 %v6887_v32, %v3006_v38  ;;  %v2956_v52 = vpack.c.bf16 %v6890_v56, %v2948_v57  ;;  %v3235_v48 = vpack.c.bf16 %v6893_v41, %v3227_v33  ;;  %v3347_v55 = vsel %vm534_vm5, %v3345_v44, %v3346_v36 }
 0x44f   :  { %8116 = vst [vmem:[#allocation28_spill] sm:$0xff] %v6890_v56  ;;  %v2863_v46 = vadd.f32 %v6740_v43, %v2843_v53  ;;  %v3391_v40 = vpack.c.bf16 %v3347_v55, %v3383_v5  ;;  %v6901_v6 = vsel %vm685_vm6, %v3501_v1, %v3502_v37  ;;  %v6904_v30 = vsel %vm938_vm7, %v3765_v9, %v3766_v3  ;;  %v6919_v55 = vpop.f32.mrf.mxu2  ;;  %v6921_v1 = vpop.f32.mrf.mxu1 }
 0x450   :  { %8117 = vst [vmem:[#allocation27_spill] sm:$0xff] %v6893_v41  ;;  %4872 = vmatmul.msk.bf16.gmra.mxu0 %vm1683_vm9, %v3014_v59  ;;  %4884 = vmatmul.msk.bf16.gmra.mxu1 %vm1683_vm9, %v2956_v52  ;;  %v6911_v13 = vsel %vm938_vm7, %v3766_v3, 0.0  ;;  %v6914_v44 = vsel %vm1089_vm4, %v3921_v51, %v3922_v0  ;;  %v6917_v53 = vsel %vm1089_vm4, %v3922_v0, 0.0  ;;  %v6932_v52 = vsel %vm1240_vm8, %v2911_v34, 0.0  ;;  %v6951_v39 = vpop.f32.mrf.mxu0 }
 0x451   :  { %v6923_v9 = vmax.f32 %v2863_v46, 0.0  ;;  %4898 = vmatmul.msk.bf16.gmra.mxu2 %vm1683_vm9, %v3235_v48  ;;  %4912 = vmatmul.msk.bf16.gmra.mxu3 %vm1683_vm9, %v3391_v40  ;;  %8119 = vst [vmem:[#allocation34_spill] sm:$0xff] %v6932_v52  ;;  %v6937_v51 = vsel %vm264_vm1, %v2969_v54, 0.0  ;;  %v1831_v48 = vadd.f32 %v6548_v42, %v6554_v28  ;;  %v2720_v46 = vadd.f32 %v6783_v23, %v2564_v2 }
 0x452   :  { %8120 = vst [vmem:[#allocation37_spill] sm:$0xff] %v6937_v51  ;;  %v6943_v38 = vsel %vm322_vm2, %v3190_v19, 0.0  ;;  %v2565_v33 = vadd.f32 %v6785_v22, %v2409_v21  ;;  %v2410_v5 = vadd.f32 %v6820_v62, %v6661_v35  ;;  %v2148_v54 = vadd.f32 %v6530_v60, %v1992_v58 }
 0x453   :  { %8118 = vst [vmem:[#allocation35_spill] sm:$0xff] %v6923_v9  ;;  %v2971_v42 = vrot.slane %v6923_v9, 4  ;;  %v2913_v28 = vrot.slane %v6923_v9, 3  ;;  %v3192_v23 = vrot.slane %v6923_v9, 5  ;;  %v3348_v22 = vrot.slane %v6923_v9, 6 }
 0x454   :  { %8121 = vst [vmem:[#allocation36_spill] sm:$0xff] %v6943_v38  ;;  %v2811_v34 = vpop.f32.mrf.mxu3  ;;  %v3504_v2 = vrot.slane %v6923_v9, 7  ;;  %v1994_v62 = vadd.f32 %v6550_v4, %v1831_v48  ;;  %v2721_v58 = vadd.f32 %v6856_v11, %v2565_v33  ;;  %v2566_v21 = vadd.f32 %v6858_v12, %v2410_v5 }
 0x455   :  { %v2844_v37 = vadd.f32 %v2811_v34, %v2720_v46  ;;  %v2411_v19 = vadd.f32 %v2383_v31, %v6668_v18  ;;  %v2256_v40 = vadd.f32 %v6672_v49, %v2148_v54  ;;  %v3007_v34 = vsel %vm264_vm1, 0.0, %v2971_v42 }
 0x456   :  { %v3768_v36 = vrot.slane %v6923_v9, 1  ;;  %v3924_v35 = vrot.slane %v6923_v9, 2  ;;  %v2949_v4 = vsel %vm1240_vm8, 0.0, %v2913_v28  ;;  %v3228_v48 = vsel %vm322_vm2, 0.0, %v3192_v23 }
 0x457   :  { %v2864_v60 = vadd.f32 %v6740_v43, %v2844_v37  ;;  %v3384_v11 = vsel %vm534_vm5, 0.0, %v3348_v22  ;;  %v6975_v12 = vsel %vm685_vm6, 0.0, %v3504_v2  ;;  %v2695_v18 = vpop.f32.mrf.mxu2  ;;  %v2541_v31 = vpop.f32.mrf.mxu1 }
 0x458   :  { %v2388_v9 = vpop.f32.mrf.mxu0 }
 0x459   :  { %v6966_v46 = vmax.f32 %v2864_v60, 0.0 }
 0x45b   :  { %v2972_v49 = vrot.slane %v6966_v46, 4  ;;  %v2914_v33 = vrot.slane %v6966_v46, 3  ;;  %v3193_v5 = vrot.slane %v6966_v46, 5  ;;  %v3349_v54 = vrot.slane %v6966_v46, 6 }
 0x45c   :  { %v2814_v37 = vpop.f32.mrf.mxu3  ;;  %v3505_v60 = vrot.slane %v6966_v46, 7  ;;  %v3769_v3 = vrot.slane %v6966_v46, 1  ;;  %v3925_v59 = vrot.slane %v6966_v46, 2 }
 0x45d   :  { %v2845_v57 = vadd.f32 %v2814_v37, %v2721_v58  ;;  %v6987_v41 = vsel %vm264_vm1, %v2971_v42, %v2972_v49  ;;  %v6990_v38 = vsel %vm1240_vm8, %v2913_v28, %v2914_v33  ;;  %v6993_v32 = vsel %vm322_vm2, %v3192_v23, %v3193_v5 }
 0x45e   :  { %8122 = vst [vmem:[#allocation33_spill] sm:$0xff] %v6987_v41  ;;  %v3015_v51 = vpack.c.bf16 %v6987_v41, %v3007_v34  ;;  %v2957_v56 = vpack.c.bf16 %v6990_v38, %v2949_v4  ;;  %v3236_v0 = vpack.c.bf16 %v6993_v32, %v3228_v48  ;;  %v3350_v52 = vsel %vm534_vm5, %v3348_v22, %v3349_v54 }
 0x45f   :  { %8123 = vst [vmem:[#allocation10_spill] sm:$0xff] %v6990_v38  ;;  %v2865_v58 = vadd.f32 %v6740_v43, %v2845_v57  ;;  %v3392_v37 = vpack.c.bf16 %v3350_v52, %v3384_v11  ;;  %v7001_v42 = vsel %vm685_vm6, %v3504_v2, %v3505_v60  ;;  %v7004_v28 = vsel %vm938_vm7, %v3768_v36, %v3769_v3  ;;  %v7046_v60 = vpop.f32.mrf.mxu1 }
 0x460   :  { %8124 = vst [vmem:[#allocation4_spill] sm:$0xff] %v6993_v32  ;;  %4873 = vmatmul.msk.bf16.gmra.mxu0 %vm1683_vm9, %v3015_v51  ;;  %4885 = vmatmul.msk.bf16.gmra.mxu1 %vm1683_vm9, %v2957_v56  ;;  %v7011_v34 = vsel %vm938_vm7, %v3769_v3, 0.0  ;;  %v7014_v22 = vsel %vm1089_vm4, %v3924_v35, %v3925_v59  ;;  %v7017_v57 = vsel %vm1089_vm4, %v3925_v59, 0.0  ;;  %v7028_v3 = vsel %vm1240_vm8, %v2914_v33, 0.0 }
 0x461   :  { %v7019_v52 = vmax.f32 %v2865_v58, 0.0  ;;  %4899 = vmatmul.msk.bf16.gmra.mxu2 %vm1683_vm9, %v3236_v0  ;;  %4913 = vmatmul.msk.bf16.gmra.mxu3 %vm1683_vm9, %v3392_v37  ;;  %8126 = vst [vmem:[#allocation11_spill] sm:$0xff] %v7028_v3  ;;  %v7033_v59 = vsel %vm264_vm1, %v2972_v49, 0.0  ;;  %v1836_v0 = vadd.f32 %v6576_v29, %v6580_v61  ;;  %v2722_v2 = vadd.f32 %v6919_v55, %v2566_v21  ;;  %v2697_v49 = vpop.f32.mrf.mxu2 }
 0x462   :  { %8127 = vst [vmem:[#allocation21_spill] sm:$0xff] %v7033_v59  ;;  %v7039_v35 = vsel %vm322_vm2, %v3193_v5, 0.0  ;;  %v2567_v4 = vadd.f32 %v6921_v1, %v2411_v19  ;;  %v2412_v48 = vadd.f32 %v6951_v39, %v2256_v40  ;;  %v2150_v54 = vadd.f32 %v6556_v27, %v1994_v62 }
 0x463   :  { %8125 = vst [vmem:[#allocation16_spill] sm:$0xff] %v7019_v52  ;;  %v2974_v29 = vrot.slane %v7019_v52, 4  ;;  %v2916_v61 = vrot.slane %v7019_v52, 3  ;;  %v3195_v55 = vrot.slane %v7019_v52, 5  ;;  %v3351_v1 = vrot.slane %v7019_v52, 6 }
 0x464   :  { %8128 = vst [vmem:[#allocation17_spill] sm:$0xff] %v7039_v35  ;;  %v2816_v11 = vpop.f32.mrf.mxu3  ;;  %v3507_v39 = vrot.slane %v7019_v52, 7  ;;  %v1996_v19 = vadd.f32 %v6578_v50, %v1836_v0  ;;  %v2723_v62 = vadd.f32 %v2695_v18, %v2567_v4  ;;  %v2568_v40 = vadd.f32 %v2541_v31, %v2412_v48 }
 0x465   :  { %v2846_v58 = vadd.f32 %v2816_v11, %v2722_v2  ;;  %v2413_v5 = vadd.f32 %v2388_v9, %v6681_v63  ;;  %v2258_v37 = vadd.f32 %v6685_v8, %v2150_v54  ;;  %v2390_v2 = vpop.f32.mrf.mxu0  ;;  %v3008_v33 = vsel %vm264_vm1, 0.0, %v2974_v29 }
 0x466   :  { %v3771_v36 = vrot.slane %v7019_v52, 1  ;;  %v3927_v51 = vrot.slane %v7019_v52, 2  ;;  %v2950_v21 = vsel %vm1240_vm8, 0.0, %v2916_v61  ;;  %v3229_v50 = vsel %vm322_vm2, 0.0, %v3195_v55 }
 0x467   :  { %v2866_v27 = vadd.f32 %v6740_v43, %v2846_v58  ;;  %v3385_v18 = vsel %vm534_vm5, 0.0, %v3351_v1  ;;  %v7068_v31 = vsel %vm685_vm6, 0.0, %v3507_v39  ;;  %v2546_v52 = vpop.f32.mrf.mxu1 }
 0x469   :  { %v7059_v11 = vmax.f32 %v2866_v27, 0.0  ;;  %v2700_v3 = vpop.f32.mrf.mxu2 }
 0x46b   :  { %v2975_v63 = vrot.slane %v7059_v11, 4  ;;  %v2917_v8 = vrot.slane %v7059_v11, 3  ;;  %v3196_v9 = vrot.slane %v7059_v11, 5  ;;  %v3352_v0 = vrot.slane %v7059_v11, 6 }
 0x46c   :  { %v2819_v4 = vpop.f32.mrf.mxu3  ;;  %v3508_v48 = vrot.slane %v7059_v11, 7  ;;  %v3772_v58 = vrot.slane %v7059_v11, 1  ;;  %v3928_v27 = vrot.slane %v7059_v11, 2 }
 0x46d   :  { %v2847_v56 = vadd.f32 %v2819_v4, %v2723_v62  ;;  %v7080_v23 = vsel %vm264_vm1, %v2974_v29, %v2975_v63  ;;  %v7083_v32 = vsel %vm1240_vm8, %v2916_v61, %v2917_v8  ;;  %v7086_v35 = vsel %vm322_vm2, %v3195_v55, %v3196_v9 }
 0x46e   :  { %8129 = vst [vmem:[#allocation25_spill] sm:$0xff] %v7080_v23  ;;  %v3016_v41 = vpack.c.bf16 %v7080_v23, %v3008_v33  ;;  %v2958_v59 = vpack.c.bf16 %v7083_v32, %v2950_v21  ;;  %v3237_v54 = vpack.c.bf16 %v7086_v35, %v3229_v50  ;;  %v3353_v38 = vsel %vm534_vm5, %v3351_v1, %v3352_v0 }
 0x46f   :  { %8130 = vst [vmem:[#allocation22_spill] sm:$0xff] %v7083_v32  ;;  %v2867_v62 = vadd.f32 %v6740_v43, %v2847_v56  ;;  %v3393_v29 = vpack.c.bf16 %v3353_v38, %v3385_v18  ;;  %v7094_v4 = vsel %vm685_vm6, %v3507_v39, %v3508_v48  ;;  %v7097_v61 = vsel %vm938_vm7, %v3771_v36, %v3772_v58  ;;  %v2393_v18 = vpop.f32.mrf.mxu0 }
 0x470   :  { %8131 = vst [vmem:[#allocation29_spill] sm:$0xff] %v7086_v35  ;;  %4874 = vmatmul.msk.bf16.gmra.mxu0 %vm1683_vm9, %v3016_v41  ;;  %4886 = vmatmul.msk.bf16.gmra.mxu1 %vm1683_vm9, %v2958_v59  ;;  %v7104_v55 = vsel %vm938_vm7, %v3772_v58, 0.0  ;;  %v7107_v1 = vsel %vm1089_vm4, %v3927_v51, %v3928_v27  ;;  %v7110_v38 = vsel %vm1089_vm4, %v3928_v27, 0.0  ;;  %v7121_v59 = vsel %vm1240_vm8, %v2917_v8, 0.0 }
 0x471   :  { %v7112_v56 = vmax.f32 %v2867_v62, 0.0  ;;  %4900 = vmatmul.msk.bf16.gmra.mxu2 %vm1683_vm9, %v3237_v54  ;;  %4914 = vmatmul.msk.bf16.gmra.mxu3 %vm1683_vm9, %v3393_v29  ;;  %8133 = vst [vmem:[#allocation31_spill] sm:$0xff] %v7121_v59  ;;  %v7126_v39 = vsel %vm264_vm1, %v2975_v63, 0.0  ;;  %v1841_v21 = vadd.f32 %v6670_v10, %v6611_v26  ;;  %v2724_v50 = vadd.f32 %v2697_v49, %v2568_v40 }
 0x472   :  { %8134 = vst [vmem:[#allocation30_spill] sm:$0xff] %v7126_v39  ;;  %v7131_v0 = vsel %vm322_vm2, %v3196_v9, 0.0  ;;  %v2569_v48 = vadd.f32 %v7046_v60, %v2413_v5  ;;  %v2414_v54 = vadd.f32 %v2390_v2, %v2258_v37  ;;  %v2152_v27 = vadd.f32 %v6582_v17, %v1996_v19  ;;  %v8136_v2 = vld [vmem:[#allocation6_spill] sm:$0xff] }
 0x473   :  { %8132 = vst [vmem:[#allocation26_spill] sm:$0xff] %v7112_v56  ;;  %v2977_v63 = vrot.slane %v7112_v56, 4  ;;  %v2919_v29 = vrot.slane %v7112_v56, 3  ;;  %v3198_v26 = vrot.slane %v7112_v56, 5  ;;  %v3354_v10 = vrot.slane %v7112_v56, 6 }
 0x474   :  { %8135 = vst [vmem:[#allocation38_spill] sm:$0xff] %v7131_v0  ;;  %v2821_v58 = vpop.f32.mrf.mxu3  ;;  %v3510_v49 = vrot.slane %v7112_v56, 7  ;;  %v1998_v40 = vadd.f32 %v6674_v20, %v1841_v21  ;;  %v2725_v37 = vadd.f32 %v2700_v3, %v2569_v48  ;;  %v2570_v17 = vadd.f32 %v2546_v52, %v2414_v54 }
 0x475   :  { %v2848_v62 = vadd.f32 %v2821_v58, %v2724_v50  ;;  %v2415_v19 = vadd.f32 %v2393_v18, %v6692_v7  ;;  %v2260_v9 = vadd.f32 %v8136_v2, %v2152_v27  ;;  %v2702_v50 = vpop.f32.mrf.mxu2  ;;  %v2549_v58 = vpop.f32.mrf.mxu1  ;;  %v3009_v51 = vsel %vm264_vm1, 0.0, %v2977_v63 }
 0x476   :  { %v3774_v36 = vrot.slane %v7112_v56, 1  ;;  %v3930_v60 = vrot.slane %v7112_v56, 2  ;;  %v2951_v20 = vsel %vm1240_vm8, 0.0, %v2919_v29  ;;  %v3230_v21 = vsel %vm322_vm2, 0.0, %v3198_v26 }
 0x477   :  { %v2868_v5 = vadd.f32 %v6740_v43, %v2848_v62  ;;  %v3386_v52 = vsel %vm534_vm5, 0.0, %v3354_v10  ;;  %v7157_v7 = vsel %vm685_vm6, 0.0, %v3510_v49  ;;  %v2395_v33 = vpop.f32.mrf.mxu0 }
 0x479   :  { %v7148_v8 = vmax.f32 %v2868_v5, 0.0 }
 0x47b   :  { %8137 = vst [vmem:[#allocation32_spill] sm:$0xff] %v7148_v8  ;;  %v2978_v3 = vrot.slane %v7148_v8, 4  ;;  %v2920_v18 = vrot.slane %v7148_v8, 3  ;;  %v3199_v48 = vrot.slane %v7148_v8, 5  ;;  %v3355_v54 = vrot.slane %v7148_v8, 6 }
 0x47c   :  { %v2824_v27 = vpop.f32.mrf.mxu3  ;;  %v3511_v62 = vrot.slane %v7148_v8, 7  ;;  %v3775_v2 = vrot.slane %v7148_v8, 1  ;;  %v3931_v41 = vrot.slane %v7148_v8, 2 }
 0x47d   :  { %v2849_v35 = vadd.f32 %v2824_v27, %v2725_v37  ;;  %v7169_v0 = vsel %vm264_vm1, %v2977_v63, %v2978_v3  ;;  %v7172_v23 = vsel %vm1240_vm8, %v2919_v29, %v2920_v18  ;;  %v7175_v39 = vsel %vm322_vm2, %v3198_v26, %v3199_v48 }
 0x47e   :  { %8138 = vst [vmem:[#allocation6_spill] sm:$0xff] %v7169_v0  ;;  %v3017_v32 = vpack.c.bf16 %v7169_v0, %v3009_v51  ;;  %v2959_v59 = vpack.c.bf16 %v7172_v23, %v2951_v20  ;;  %v3238_v5 = vpack.c.bf16 %v7175_v39, %v3230_v21  ;;  %v3356_v56 = vsel %vm534_vm5, %v3354_v10, %v3355_v54  ;;  %v2551_v20 = vpop.f32.mrf.mxu1 }
 0x47f   :  { %8139 = vst [vmem:[#allocation39_spill] sm:$0xff] %v7172_v23  ;;  %v2869_v8 = vadd.f32 %v6740_v43, %v2849_v35  ;;  %v3394_v37 = vpack.c.bf16 %v3356_v56, %v3386_v52  ;;  %v7183_v63 = vsel %vm685_vm6, %v3510_v49, %v3511_v62  ;;  %v7186_v29 = vsel %vm938_vm7, %v3774_v36, %v3775_v2 }
 0x480   :  { %8140 = vst [vmem:[#allocation40_spill] sm:$0xff] %v7175_v39  ;;  %4875 = vmatmul.msk.bf16.gmra.mxu0 %vm1683_vm9, %v3017_v32  ;;  %4887 = vmatmul.msk.bf16.gmra.mxu1 %vm1683_vm9, %v2959_v59  ;;  %v7193_v26 = vsel %vm938_vm7, %v3775_v2, 0.0  ;;  %v7196_v10 = vsel %vm1089_vm4, %v3930_v60, %v3931_v41  ;;  %v7199_v35 = vsel %vm1089_vm4, %v3931_v41, 0.0  ;;  %v7210_v59 = vsel %vm1240_vm8, %v2920_v18, 0.0  ;;  %v2705_v60 = vpop.f32.mrf.mxu2  ;;  %v8149_v18 = vld [vmem:[#allocation3_spill] sm:$0xff] }
 0x481   :  { %8141 = vst [vmem:[#allocation41_spill] sm:$0xff] %v7186_v29  ;;  %v7201_v56 = vmax.f32 %v2869_v8, 0.0  ;;  %4901 = vmatmul.msk.bf16.gmra.mxu2 %vm1683_vm9, %v3238_v5  ;;  %4915 = vmatmul.msk.bf16.gmra.mxu3 %vm1683_vm9, %v3394_v37  ;;  %v7215_v41 = vsel %vm264_vm1, %v2978_v3, 0.0  ;;  %v2726_v8 = vadd.f32 %v2702_v50, %v2570_v17  ;;  %v7218_v21 = vsel %vm322_vm2, %v3199_v48, 0.0 }
 0x482   :  { %8142 = vst [vmem:[#allocation42_spill] sm:$0xff] %v7193_v26  ;;  %v2571_v52 = vadd.f32 %v2549_v58, %v2415_v19  ;;  %v2416_v54 = vadd.f32 %v2395_v33, %v2260_v9  ;;  %v2154_v5 = vadd.f32 %v8149_v18, %v1998_v40  ;;  %v2398_v19 = vpop.f32.mrf.mxu0  ;;  %v8150_v40 = vld [vmem:[#allocation5_spill] sm:$0xff] }
 0x483   :  { %8143 = vst [vmem:[#allocation43_spill] sm:$0xff] %v7196_v10  ;;  %v2980_v37 = vrot.slane %v7201_v56, 4  ;;  %v2922_v3 = vrot.slane %v7201_v56, 3  ;;  %v3201_v17 = vrot.slane %v7201_v56, 5  ;;  %v3357_v50 = vrot.slane %v7201_v56, 6 }
 0x484   :  { %8144 = vst [vmem:[#allocation44_spill] sm:$0xff] %v7199_v35  ;;  %v2826_v27 = vpop.f32.mrf.mxu3  ;;  %v3513_v48 = vrot.slane %v7201_v56, 7  ;;  %v2727_v58 = vadd.f32 %v2705_v60, %v2571_v52  ;;  %v2572_v62 = vadd.f32 %v2551_v20, %v2416_v54  ;;  %v3777_v32 = vrot.slane %v7201_v56, 1 }
 0x485   :  { %8145 = vst [vmem:[#allocation45_spill] sm:$0xff] %v7201_v56  ;;  %v2850_v2 = vadd.f32 %v2826_v27, %v2726_v8  ;;  %v2417_v8 = vadd.f32 %v2398_v19, %v8150_v40  ;;  %v8151_v27 = vld [vmem:[#allocation9_spill] sm:$0xff]  ;;  %v3010_v36 = vsel %vm264_vm1, 0.0, %v2980_v37  ;;  %v3933_v51 = vrot.slane %v7201_v56, 2 }
 0x486   :  { %8146 = vst [vmem:[#allocation46_spill] sm:$0xff] %v7210_v59  ;;  %v2262_v18 = vadd.f32 %v8151_v27, %v2154_v5  ;;  %v2952_v0 = vsel %vm1240_vm8, 0.0, %v2922_v3  ;;  %v3231_v33 = vsel %vm322_vm2, 0.0, %v3201_v17  ;;  %v7242_v60 = vsel %vm685_vm6, 0.0, %v3513_v48 }
 0x487   :  { %8147 = vst [vmem:[#allocation47_spill] sm:$0xff] %v7215_v41  ;;  %v2870_v9 = vadd.f32 %v6740_v43, %v2850_v2  ;;  %v3387_v2 = vsel %vm534_vm5, 0.0, %v3357_v50  ;;  %v2554_v41 = vpop.f32.mrf.mxu1 }
 0x488   :  { %8148 = vst [vmem:[#allocation48_spill] sm:$0xff] %v7218_v21  ;;  %v2707_v21 = vpop.f32.mrf.mxu2 }
 0x489   :  { %v7233_v49 = vmax.f32 %v2870_v9, 0.0 }
 0x48b   :  { %8152 = vst [vmem:[#allocation3_spill] sm:$0xff] %v7233_v49  ;;  %v2981_v20 = vrot.slane %v7233_v49, 4  ;;  %v2923_v52 = vrot.slane %v7233_v49, 3  ;;  %v3202_v54 = vrot.slane %v7233_v49, 5  ;;  %v3358_v5 = vrot.slane %v7233_v49, 6 }
 0x48c   :  { %v2829_v19 = vpop.f32.mrf.mxu3  ;;  %v3514_v9 = vrot.slane %v7233_v49, 7  ;;  %v3778_v27 = vrot.slane %v7233_v49, 1  ;;  %v3934_v39 = vrot.slane %v7233_v49, 2 }
 0x48d   :  { %v2851_v23 = vadd.f32 %v2829_v19, %v2727_v58  ;;  %v7254_v59 = vsel %vm264_vm1, %v2980_v37, %v2981_v20  ;;  %v7257_v10 = vsel %vm1240_vm8, %v2922_v3, %v2923_v52  ;;  %v7260_v35 = vsel %vm322_vm2, %v3201_v17, %v3202_v54 }
 0x48e   :  { %8153 = vst [vmem:[#allocation5_spill] sm:$0xff] %v7254_v59  ;;  %v3018_v29 = vpack.c.bf16 %v7254_v59, %v3010_v36  ;;  %v2960_v40 = vpack.c.bf16 %v7257_v10, %v2952_v0  ;;  %v3239_v56 = vpack.c.bf16 %v7260_v35, %v3231_v33  ;;  %v3359_v49 = vsel %vm534_vm5, %v3357_v50, %v3358_v5  ;;  %v2400_v33 = vpop.f32.mrf.mxu0 }
 0x48f   :  { %8154 = vst [vmem:[#allocation9_spill] sm:$0xff] %v7257_v10  ;;  %v2871_v26 = vadd.f32 %v6740_v43, %v2851_v23  ;;  %v3395_v58 = vpack.c.bf16 %v3359_v49, %v3387_v2  ;;  %v7268_v37 = vsel %vm685_vm6, %v3513_v48, %v3514_v9  ;;  %v7271_v3 = vsel %vm938_vm7, %v3777_v32, %v3778_v27  ;;  %v5040_v32 = vld [vmem:[%s7877_s6 + $0x38] sm:$0x10] }
 0x490   :  { %8155 = vst [vmem:[#allocation49_spill] sm:$0xff] %v7260_v35  ;;  %4876 = vmatmul.msk.bf16.gmra.mxu0 %vm1683_vm9, %v3018_v29  ;;  %4888 = vmatmul.msk.bf16.gmra.mxu1 %vm1683_vm9, %v2960_v40  ;;  %v7278_v36 = vsel %vm938_vm7, %v3778_v27, 0.0  ;;  %v7281_v17 = vsel %vm1089_vm4, %v3933_v51, %v3934_v39  ;;  %v7284_v23 = vsel %vm1089_vm4, %v3934_v39, 0.0  ;;  %v4965_v29 = vld [vmem:[%s7877_s6 + $0x38] sm:$0xf]  ;;  %v2728_v48 = vadd.f32 %v2707_v21, %v2572_v62  ;;  %v8163_v27 = vld [vmem:[#allocation2_spill] sm:$0xff] }
 0x491   :  { %8156 = vst [vmem:[#allocation50_spill] sm:$0xff] %v7271_v3  ;;  %v7286_v49 = vmax.f32 %v2871_v26, 0.0  ;;  %4902 = vmatmul.msk.bf16.gmra.mxu2 %vm1683_vm9, %v3239_v56  ;;  %4916 = vmatmul.msk.bf16.gmra.mxu3 %vm1683_vm9, %v3395_v58  ;;  %v7301_v26 = vsel %vm1240_vm8, %v2923_v52, 0.0  ;;  %v4966_v56 = vor.u32 %v5040_v32, %v4965_v29  ;;  %v7306_v2 = vsel %vm264_vm1, %v2981_v20, 0.0 }
 0x492   :  { %8157 = vst [vmem:[#allocation51_spill] sm:$0xff] %v7281_v17  ;;  %v7309_v5 = vsel %vm322_vm2, %v3202_v54, 0.0  ;;  %v2573_v19 = vadd.f32 %v2554_v41, %v2417_v8  ;;  %v2418_v9 = vadd.f32 %v2400_v33, %v2262_v18  ;;  %v2710_v8 = vpop.f32.mrf.mxu2  ;;  %v2556_v18 = vpop.f32.mrf.mxu1 }
 0x493   :  { %8158 = vst [vmem:[#allocation52_spill] sm:$0xff] %v7284_v23  ;;  %v4007_v58 = vand.u32 %v4966_v56, %v8163_v27  ;;  %v2983_v52 = vrot.slane %v7286_v49, 4  ;;  %v2925_v29 = vrot.slane %v7286_v49, 3  ;;  %v3204_v32 = vrot.slane %v7286_v49, 5 }
 0x494   :  { %8159 = vst [vmem:[#allocation53_spill] sm:$0xff] %v7286_v49  ;;  %v2831_v40 = vpop.f32.mrf.mxu3  ;;  %v3360_v21 = vrot.slane %v7286_v49, 6  ;;  %v3516_v62 = vrot.slane %v7286_v49, 7  ;;  %v2729_v56 = vadd.f32 %v2710_v8, %v2573_v19  ;;  %v3936_v50 = vrot.slane %v7286_v49, 2 }
 0x495   :  { %8160 = vst [vmem:[#allocation54_spill] sm:$0xff] %v7301_v26  ;;  %v2852_v39 = vadd.f32 %v2831_v40, %v2728_v48  ;;  %4016 = vmatpush.bf16.msrb.mxu3 %v4007_v58  ;;  %v2574_v48 = vadd.f32 %v2556_v18, %v2418_v9  ;;  %v3011_v40 = vsel %vm264_vm1, 0.0, %v2983_v52  ;;  %v3780_v58 = vrot.slane %v7286_v49, 1 }
 0x496   :  { %8161 = vst [vmem:[#allocation55_spill] sm:$0xff] %v7306_v2  ;;  %v2953_v51 = vsel %vm1240_vm8, 0.0, %v2925_v29  ;;  %v3232_v20 = vsel %vm322_vm2, 0.0, %v3204_v32  ;;  %v3388_v41 = vsel %vm534_vm5, 0.0, %v3360_v21  ;;  %v7331_v0 = vsel %vm685_vm6, 0.0, %v3516_v62 }
 0x497   :  { %8162 = vst [vmem:[#allocation56_spill] sm:$0xff] %v7309_v5  ;;  %v2872_v54 = vadd.f32 %v6740_v43, %v2852_v39 }
 0x499   :  { %v7322_v33 = vmax.f32 %v2872_v54, 0.0 }
 0x49b   :  { %8164 = vst [vmem:[#allocation2_spill] sm:$0xff] %v7322_v33  ;;  %v2984_v39 = vrot.slane %v7322_v33, 4  ;;  %v2926_v19 = vrot.slane %v7322_v33, 3  ;;  %v3205_v9 = vrot.slane %v7322_v33, 5  ;;  %v3361_v8 = vrot.slane %v7322_v33, 6 }
 0x49c   :  { %v2834_v18 = vpop.f32.mrf.mxu3  ;;  %v3517_v54 = vrot.slane %v7322_v33, 7  ;;  %v3781_v5 = vrot.slane %v7322_v33, 1  ;;  %v3937_v59 = vrot.slane %v7322_v33, 2 }
 0x49d   :  { %v2853_v2 = vadd.f32 %v2834_v18, %v2729_v56  ;;  %v7343_v10 = vsel %vm264_vm1, %v2983_v52, %v2984_v39  ;;  %v7346_v26 = vsel %vm1240_vm8, %v2925_v29, %v2926_v19  ;;  %v7349_v17 = vsel %vm322_vm2, %v3204_v32, %v3205_v9 }
 0x49e   :  { %8165 = vst [vmem:[#allocation57_spill] sm:$0xff] %v7343_v10  ;;  %v3019_v23 = vpack.c.bf16 %v7343_v10, %v3011_v40  ;;  %v2961_v3 = vpack.c.bf16 %v7346_v26, %v2953_v51  ;;  %v3240_v35 = vpack.c.bf16 %v7349_v17, %v3232_v20  ;;  %v3362_v49 = vsel %vm534_vm5, %v3360_v21, %v3361_v8  ;;  %v4979_v20 = vld [vmem:[%s7877_s6 + $0x40] sm:$0xf] }
 0x49f   :  { %8166 = vst [vmem:[#allocation58_spill] sm:$0xff] %v7346_v26  ;;  %v2873_v33 = vadd.f32 %v6740_v43, %v2853_v2  ;;  %v3396_v56 = vpack.c.bf16 %v3362_v49, %v3388_v41  ;;  %v7357_v52 = vsel %vm685_vm6, %v3516_v62, %v3517_v54  ;;  %v7360_v29 = vsel %vm938_vm7, %v3780_v58, %v3781_v5  ;;  %v5041_v41 = vld [vmem:[%s7877_s6 + $0x40] sm:$0x10] }
 0x4a0   :  { %8167 = vst [vmem:[#allocation59_spill] sm:$0xff] %v7349_v17  ;;  %4877 = vmatmul.msk.bf16.gmra.mxu0 %vm1683_vm9, %v3019_v23  ;;  %4889 = vmatmul.msk.bf16.gmra.mxu1 %vm1683_vm9, %v2961_v3  ;;  %v7367_v32 = vsel %vm938_vm7, %v3781_v5, 0.0  ;;  %v7370_v21 = vsel %vm1089_vm4, %v3936_v50, %v3937_v59  ;;  %v7373_v49 = vsel %vm1089_vm4, %v3937_v59, 0.0  ;;  %v5007_v3 = vld [vmem:[%s7877_s6 + $0x50] sm:$0xf]  ;;  %v7390_v5 = vsel %vm1240_vm8, %v2926_v19, 0.0 }
 0x4a1   :  { %8168 = vst [vmem:[#allocation60_spill] sm:$0xff] %v7370_v21  ;;  %v7375_v2 = vmax.f32 %v2873_v33, 0.0  ;;  %4903 = vmatmul.msk.bf16.gmra.mxu2 %vm1683_vm9, %v3240_v35  ;;  %4917 = vmatmul.msk.bf16.gmra.mxu3 %vm1683_vm9, %v3396_v56  ;;  %v5043_v23 = vld [vmem:[%s7877_s6 + $0x50] sm:$0x10]  ;;  %v2712_v35 = vpop.f32.mrf.mxu2  ;;  %v4980_v18 = vor.u32 %v5041_v41, %v4979_v20  ;;  %v7402_v19 = vsel %vm264_vm1, %v2984_v39, 0.0  ;;  %v7405_v54 = vsel %vm322_vm2, %v3205_v9, 0.0 }
 0x4a2   :  { %8170 = vst [vmem:[#allocation62_spill] sm:$0xff] %v7390_v5  ;;  %v5008_v62 = vor.u32 %v5043_v23, %v5007_v3  ;;  %v2730_v40 = vadd.f32 %v2712_v35, %v2574_v48  ;;  %v4993_v9 = vld [vmem:[%s7877_s6 + $0x48] sm:$0xf] }
 0x4a3   :  { %8169 = vst [vmem:[#allocation61_spill] sm:$0xff] %v7375_v2  ;;  %v2986_v3 = vrot.slane %v7375_v2, 4  ;;  %v2928_v23 = vrot.slane %v7375_v2, 3  ;;  %v3207_v59 = vrot.slane %v7375_v2, 5  ;;  %v3363_v33 = vrot.slane %v7375_v2, 6 }
 0x4a4   :  { %v2836_v58 = vpop.f32.mrf.mxu3  ;;  %v4379_v8 = vand.u32 %v5008_v62, %v8163_v27  ;;  %8171 = vst [vmem:[#allocation63_spill] sm:$0xff] %v7402_v19  ;;  %v4131_v48 = vand.u32 %v4980_v18, %v8163_v27  ;;  %v3519_v35 = vrot.slane %v7375_v2, 7  ;;  %v5042_v62 = vld [vmem:[%s7877_s6 + $0x48] sm:$0x10] }
 0x4a5   :  { %8172 = vst [vmem:[#allocation64_spill] sm:$0xff] %v7405_v54  ;;  %v2854_v56 = vadd.f32 %v2836_v58, %v2730_v40  ;;  %v4994_v40 = vor.u32 %v5042_v62, %v4993_v9  ;;  %v3783_v58 = vrot.slane %v7375_v2, 1  ;;  %v2954_v18 = vsel %vm1240_vm8, 0.0, %v2928_v23 }
 0x4a6   :  { %4388 = vmatpush.bf16.msrb.mxu2 %v4379_v8  ;;  %4140 = vmatpush.bf16.msrb.mxu0 %v4131_v48  ;;  %v3389_v50 = vsel %vm534_vm5, 0.0, %v3363_v33  ;;  %v7433_v20 = vsel %vm685_vm6, 0.0, %v3519_v35  ;;  %v3939_v48 = vrot.slane %v7375_v2, 2 }
 0x4a7   :  { %v2874_v39 = vadd.f32 %v6740_v43, %v2854_v56  ;;  %v3012_v43 = vsel %vm264_vm1, 0.0, %v2986_v3  ;;  %v3233_v56 = vsel %vm322_vm2, 0.0, %v3207_v59  ;;  %v4255_v51 = vand.u32 %v4994_v40, %v8163_v27 }
 0x4a9   :  { %v7425_v8 = vmax.f32 %v2874_v39, 0.0  ;;  %4264 = vmatpush.bf16.msrb.mxu1 %v4255_v51 }
 0x4ab   :  { %8173 = vst [vmem:[#allocation65_spill] sm:$0xff] %v7425_v8  ;;  %v2987_v9 = vrot.slane %v7425_v8, 4  ;;  %v2929_v39 = vrot.slane %v7425_v8, 3  ;;  %v3208_v62 = vrot.slane %v7425_v8, 5  ;;  %v3364_v41 = vrot.slane %v7425_v8, 6 }
 0x4ac   :  { %v3520_v17 = vrot.slane %v7425_v8, 7  ;;  %v3784_v27 = vrot.slane %v7425_v8, 1  ;;  %v3940_v40 = vrot.slane %v7425_v8, 2 }
 0x4ad   :  { %v7446_v10 = vsel %vm264_vm1, %v2986_v3, %v2987_v9  ;;  %v7449_v19 = vsel %vm1240_vm8, %v2928_v23, %v2929_v39  ;;  %v7452_v26 = vsel %vm322_vm2, %v3207_v59, %v3208_v62  ;;  %v3365_v51 = vsel %vm534_vm5, %v3363_v33, %v3364_v41 }
 0x4ae   :  { %v3020_v5 = vpack.c.bf16 %v7446_v10, %v3012_v43  ;;  %v2962_v21 = vpack.c.bf16 %v7449_v19, %v2954_v18  ;;  %v3241_v54 = vpack.c.bf16 %v7452_v26, %v3233_v56  ;;  %v3397_v2 = vpack.c.bf16 %v3365_v51, %v3389_v50 }
 0x4af   :  { %v7459_v8 = vsel %vm685_vm6, %v3519_v35, %v3520_v17  ;;  %v7462_v3 = vsel %vm938_vm7, %v3783_v58, %v3784_v27  ;;  %v7465_v23 = vsel %vm938_vm7, %v3784_v27, 0.0  ;;  %v7468_v59 = vsel %vm1089_vm4, %v3939_v48, %v3940_v40 }
 0x4b0   :  { %4878 = vmatmul.msk.bf16.gmra.mxu0 %vm1683_vm9, %v3020_v5  ;;  %4890 = vmatmul.msk.bf16.gmra.mxu1 %vm1683_vm9, %v2962_v21  ;;  %v3553_v33 = vpack.c.bf16 %v7459_v8, %v7433_v20  ;;  %v3817_v17 = vpack.c.bf16 %v7465_v23, %v7462_v3  ;;  %v7477_v50 = vsel %vm1089_vm4, %v3940_v40, 0.0  ;;  %v7480_v35 = vsel %vm1240_vm8, %v2929_v39, 0.0  ;;  %v8175_v39 = vld [vmem:[#allocation7_spill] sm:$0xff] }
 0x4b1   :  { %4904 = vmatmul.msk.bf16.gmra.mxu2 %vm1683_vm9, %v3241_v54  ;;  %4918 = vmatmul.msk.bf16.gmra.mxu3 %vm1683_vm9, %v3397_v2  ;;  %v3973_v5 = vpack.c.bf16 %v7477_v50, %v7468_v59  ;;  %v4097_v21 = vpack.c.bf16 %v7480_v35, %v7449_v19  ;;  %v7489_v41 = vsel %vm264_vm1, %v2987_v9, 0.0  ;;  %v7492_v58 = vsel %vm322_vm2, %v3208_v62, 0.0  ;;  %v8176_v9 = vld [vmem:[#allocation8_spill] sm:$0xff] }
 0x4b2   :  { %v8174_v48 = vpack.c.bf16 %v6802_v14, %v6772_v16  ;;  %v8177_v27 = vpack.c.bf16 %v8175_v39, %v8176_v9  ;;  %v8178_v62 = vpack.c.bf16 %v6812_v24, %v6805_v25  ;;  %v8179_v40 = vpack.c.bf16 %v6818_v45, %v6815_v15  ;;  %v8181_v45 = vld [vmem:[#allocation24_spill] sm:$0xff] }
 0x4b3   :  { %v8180_v15 = vpack.c.bf16 %v6901_v6, %v6875_v47  ;;  %v8225_v50 = vld [vmem:[#allocation20_spill] sm:$0xff]  ;;  %vm4597_vm1 = vcmask 1047559  }
 0x4bd   :  { %v3065_v18 = vpop.f32.mrf.mxu0  ;;  %v3146_v2 = vpop.f32.mrf.mxu1 }
 0x4be   :  { %v3147_v56 = vadd.f32 %v3146_v2, %v3065_v18 }
 0x4c0   :  { %4925 = vmatmul.msk.bf16.vlgmr.msra.gmra.mxu0 %vm1683_vm9, %v8174_v48  ;;  %4939 = vmatmul.msk.bf16.vlgmr.msra.gmra.mxu1 %vm1683_vm9, %v8177_v27 }
 0x4c1   :  { %4953 = vmatmul.msk.bf16.vlgmr.msra.gmra.mxu2 %vm1683_vm9, %v8178_v62  ;;  %4967 = vmatmul.msk.bf16.vlgmr.msrb.gmra.mxu3 %vm1683_vm9, %v8179_v40 }
 0x4c4   :  { %v3286_v51 = vpop.f32.mrf.mxu2  ;;  %v3442_v18 = vpop.f32.mrf.mxu3 }
 0x4c5   :  { %v3326_v16 = vadd.f32 %v3286_v51, %v3147_v56  ;;  %v3067_v14 = vpop.f32.mrf.mxu0  ;;  %v3148_v2 = vpop.f32.mrf.mxu1  ;;  %v8182_v56 = vld [vmem:[#allocation13_spill] sm:$0xff]  ;;  %v8184_v51 = vpack.c.bf16 %v6911_v13, %v6904_v30 }
 0x4c6   :  { %v3149_v48 = vadd.f32 %v3148_v2, %v3067_v14  ;;  %v8183_v40 = vpack.c.bf16 %v8181_v45, %v8182_v56  ;;  %v8189_v45 = vpack.c.bf16 %v7011_v34, %v7004_v28  ;;  %v8190_v56 = vpack.c.bf16 %v7017_v57, %v7014_v22  ;;  %v8192_v57 = vld [vmem:[#allocation16_spill] sm:$0xff] }
 0x4c7   :  { %v7514_v54 = vadd.f32 %v3442_v18, %v3326_v16  ;;  %v8191_v22 = vpack.c.bf16 %v7094_v4, %v7068_v31 }
 0x4cc   :  { %v3288_v39 = vpop.f32.mrf.mxu2  ;;  %v3444_v9 = vpop.f32.mrf.mxu3 }
 0x4cd   :  { %v3327_v27 = vadd.f32 %v3288_v39, %v3149_v48  ;;  %v3070_v43 = vpop.f32.mrf.mxu0  ;;  %v3151_v25 = vpop.f32.mrf.mxu1 }
 0x4ce   :  { %v3152_v24 = vadd.f32 %v3151_v25, %v3070_v43  ;;  %v8185_v43 = vpack.c.bf16 %v6917_v53, %v6914_v44  ;;  %v8186_v44 = vpack.c.bf16 %v7001_v42, %v6975_v12  ;;  %v8187_v53 = vld [vmem:[#allocation35_spill] sm:$0xff] }
 0x4cf   :  { %v7516_v62 = vadd.f32 %v3444_v9, %v3327_v27 }
 0x4d0   :  { %4926 = vmatmul.msk.bf16.gmra.mxu0 %vm1683_vm9, %v8180_v15  ;;  %4940 = vmatmul.msk.bf16.gmra.mxu1 %vm1683_vm9, %v8183_v40 }
 0x4d1   :  { %4954 = vmatmul.msk.bf16.gmra.mxu2 %vm1683_vm9, %v8184_v51  ;;  %4968 = vmatmul.msk.bf16.gmra.mxu3 %vm1683_vm9, %v8185_v43 }
 0x4d4   :  { %v3291_v18 = vpop.f32.mrf.mxu2  ;;  %v3447_v16 = vpop.f32.mrf.mxu3 }
 0x4d5   :  { %v3328_v47 = vadd.f32 %v3291_v18, %v3152_v24  ;;  %v3072_v6 = vpop.f32.mrf.mxu0  ;;  %v3153_v14 = vpop.f32.mrf.mxu1  ;;  %v8188_v24 = vpack.c.bf16 %v6966_v46, %v8187_v53 }
 0x4d6   :  { %v3154_v2 = vadd.f32 %v3153_v14, %v3072_v6 }
 0x4d7   :  { %v7534_v48 = vadd.f32 %v3447_v16, %v3328_v47 }
 0x4dc   :  { %v3293_v39 = vpop.f32.mrf.mxu2  ;;  %v3449_v9 = vpop.f32.mrf.mxu3 }
 0x4dd   :  { %v3329_v27 = vadd.f32 %v3293_v39, %v3154_v2  ;;  %v3075_v25 = vpop.f32.mrf.mxu0  ;;  %v3156_v30 = vpop.f32.mrf.mxu1  ;;  %v8193_v39 = vpack.c.bf16 %v7059_v11, %v8192_v57 }
 0x4de   :  { %v3157_v13 = vadd.f32 %v3156_v30, %v3075_v25 }
 0x4df   :  { %v7536_v15 = vadd.f32 %v3449_v9, %v3329_v27  ;;  %v8194_v9 = vpack.c.bf16 %v7104_v55, %v7097_v61  ;;  %v8195_v27 = vpack.c.bf16 %v7110_v38, %v7107_v1  ;;  %v8196_v1 = vpack.c.bf16 %v7183_v63, %v7157_v7  ;;  %v8197_v38 = vld [vmem:[#allocation32_spill] sm:$0xff] }
 0x4e0   :  { %4927 = vmatmul.msk.bf16.gmra.mxu0 %vm1683_vm9, %v8186_v44  ;;  %4941 = vmatmul.msk.bf16.gmra.mxu1 %vm1683_vm9, %v8188_v24 }
 0x4e1   :  { %4955 = vmatmul.msk.bf16.gmra.mxu2 %vm1683_vm9, %v8189_v45  ;;  %4969 = vmatmul.msk.bf16.gmra.mxu3 %vm1683_vm9, %v8190_v56 }
 0x4e4   :  { %v3296_v40 = vpop.f32.mrf.mxu2  ;;  %v3452_v51 = vpop.f32.mrf.mxu3 }
 0x4e5   :  { %v3330_v12 = vadd.f32 %v3296_v40, %v3157_v13  ;;  %v3077_v42 = vpop.f32.mrf.mxu0  ;;  %v3158_v43 = vpop.f32.mrf.mxu1 }
 0x4e6   :  { %v3159_v18 = vadd.f32 %v3158_v43, %v3077_v42  ;;  %v8200_v42 = vld [vmem:[#allocation42_spill] sm:$0xff]  ;;  %v8201_v43 = vld [vmem:[#allocation41_spill] sm:$0xff] }
 0x4e7   :  { %v7554_v16 = vadd.f32 %v3452_v51, %v3330_v12  ;;  %v8198_v51 = vld [vmem:[#allocation26_spill] sm:$0xff] }
 0x4e8   :  { %v8199_v12 = vpack.c.bf16 %v8197_v38, %v8198_v51 }
 0x4ec   :  { %v3298_v46 = vpop.f32.mrf.mxu2  ;;  %v3454_v47 = vpop.f32.mrf.mxu3 }
 0x4ed   :  { %v3331_v6 = vadd.f32 %v3298_v46, %v3159_v18  ;;  %v3080_v14 = vpop.f32.mrf.mxu0  ;;  %v3161_v28 = vpop.f32.mrf.mxu1  ;;  %v8202_v18 = vpack.c.bf16 %v8200_v42, %v8201_v43  ;;  %v8203_v46 = vld [vmem:[#allocation44_spill] sm:$0xff] }
 0x4ee   :  { %v3162_v34 = vadd.f32 %v3161_v28, %v3080_v14 }
 0x4ef   :  { %v7556_v2 = vadd.f32 %v3454_v47, %v3331_v6  ;;  %v8204_v47 = vld [vmem:[#allocation43_spill] sm:$0xff] }
 0x4f0   :  { %4928 = vmatmul.msk.bf16.gmra.mxu0 %vm1683_vm9, %v8191_v22  ;;  %4942 = vmatmul.msk.bf16.gmra.mxu1 %vm1683_vm9, %v8193_v39  ;;  %v8205_v6 = vpack.c.bf16 %v8203_v46, %v8204_v47 }
 0x4f1   :  { %4956 = vmatmul.msk.bf16.gmra.mxu2 %vm1683_vm9, %v8194_v9  ;;  %4970 = vmatmul.msk.bf16.gmra.mxu3 %vm1683_vm9, %v8195_v27 }
 0x4f4   :  { %v3301_v25 = vpop.f32.mrf.mxu2  ;;  %v3457_v30 = vpop.f32.mrf.mxu3 }
 0x4f5   :  { %v3332_v31 = vadd.f32 %v3301_v25, %v3162_v34  ;;  %v3082_v4 = vpop.f32.mrf.mxu0  ;;  %v3163_v13 = vpop.f32.mrf.mxu1 }
 0x4f6   :  { %v3164_v44 = vadd.f32 %v3163_v13, %v3082_v4  ;;  %v8206_v4 = vpack.c.bf16 %v7268_v37, %v7242_v60  ;;  %v8207_v13 = vld [vmem:[#allocation3_spill] sm:$0xff] }
 0x4f7   :  { %v7574_v53 = vadd.f32 %v3457_v30, %v3332_v31 }
 0x4fc   :  { %v3303_v11 = vpop.f32.mrf.mxu2  ;;  %v3459_v24 = vpop.f32.mrf.mxu3 }
 0x4fd   :  { %v3333_v45 = vadd.f32 %v3303_v11, %v3164_v44  ;;  %v3085_v56 = vpop.f32.mrf.mxu0  ;;  %v3166_v61 = vpop.f32.mrf.mxu1  ;;  %v8208_v44 = vld [vmem:[#allocation45_spill] sm:$0xff] }
 0x4fe   :  { %v3167_v55 = vadd.f32 %v3166_v61, %v3085_v56  ;;  %v8209_v11 = vpack.c.bf16 %v8207_v13, %v8208_v44  ;;  %v8212_v56 = vld [vmem:[#allocation52_spill] sm:$0xff]  ;;  %v8213_v61 = vld [vmem:[#allocation51_spill] sm:$0xff] }
 0x4ff   :  { %v7576_v40 = vadd.f32 %v3459_v24, %v3333_v45  ;;  %v8210_v24 = vld [vmem:[#allocation50_spill] sm:$0xff] }
 0x500   :  { %4929 = vmatmul.msk.bf16.gmra.mxu0 %vm1683_vm9, %v8196_v1  ;;  %4943 = vmatmul.msk.bf16.gmra.mxu1 %vm1683_vm9, %v8199_v12  ;;  %v8211_v45 = vpack.c.bf16 %v7278_v36, %v8210_v24 }
 0x501   :  { %4957 = vmatmul.msk.bf16.gmra.mxu2 %vm1683_vm9, %v8202_v18  ;;  %4971 = vmatmul.msk.bf16.gmra.mxu3 %vm1683_vm9, %v8205_v6 }
 0x504   :  { %v3306_v14 = vpop.f32.mrf.mxu2  ;;  %v3462_v28 = vpop.f32.mrf.mxu3 }
 0x505   :  { %v3334_v7 = vadd.f32 %v3306_v14, %v3167_v55  ;;  %v3087_v63 = vpop.f32.mrf.mxu0  ;;  %v3168_v34 = vpop.f32.mrf.mxu1  ;;  %v8214_v55 = vpack.c.bf16 %v8212_v56, %v8213_v61 }
 0x506   :  { %v3169_v22 = vadd.f32 %v3168_v34, %v3087_v63  ;;  %v8217_v63 = vld [vmem:[#allocation53_spill] sm:$0xff] }
 0x507   :  { %v7594_v57 = vadd.f32 %v3462_v28, %v3334_v7  ;;  %v8215_v28 = vpack.c.bf16 %v7357_v52, %v7331_v0  ;;  %v8216_v7 = vld [vmem:[#allocation2_spill] sm:$0xff] }
 0x508   :  { %v8218_v34 = vpack.c.bf16 %v8216_v7, %v8217_v63  ;;  %v8231_v7 = vld [vmem:[#allocation18_spill] sm:$0xff] }
 0x509   :  { %v8232_v63 = vld [vmem:[#allocation14_spill] sm:$0xff] }
 0x50c   :  { %v3308_v39 = vpop.f32.mrf.mxu2  ;;  %v7596_v9 = vpop.f32.mrf.mxu3 }
 0x50d   :  { %v7598_v27 = vadd.f32 %v3308_v39, %v3169_v22  ;;  %v3090_v25 = vpop.f32.mrf.mxu0  ;;  %v3171_v30 = vpop.f32.mrf.mxu1  ;;  %v8219_v22 = vpack.c.bf16 %v7367_v32, %v7360_v29  ;;  %v8220_v39 = vld [vmem:[#allocation60_spill] sm:$0xff] }
 0x50e   :  { %v3172_v31 = vadd.f32 %v3171_v30, %v3090_v25  ;;  %v8221_v25 = vpack.c.bf16 %v7373_v49, %v8220_v39  ;;  %v8222_v49 = vld [vmem:[#allocation65_spill] sm:$0xff] }
 0x510   :  { %4930 = vmatmul.msk.bf16.gmra.mxu0 %vm1683_vm9, %v8206_v4  ;;  %4944 = vmatmul.msk.bf16.gmra.mxu1 %vm1683_vm9, %v8209_v11 }
 0x511   :  { %4958 = vmatmul.msk.bf16.gmra.mxu2 %vm1683_vm9, %v8211_v45  ;;  %4972 = vmatmul.msk.bf16.gmra.mxu3 %vm1683_vm9, %v8214_v55  ;;  %v8223_v55 = vld [vmem:[#allocation61_spill] sm:$0xff] }
 0x514   :  { %v3311_v1 = vpop.f32.mrf.mxu2  ;;  %v3467_v38 = vpop.f32.mrf.mxu3 }
 0x515   :  { %v3336_v60 = vadd.f32 %v3311_v1, %v3172_v31  ;;  %v3092_v37 = vpop.f32.mrf.mxu0  ;;  %v3173_v51 = vpop.f32.mrf.mxu1  ;;  %v8224_v1 = vpack.c.bf16 %v8222_v49, %v8223_v55  ;;  %v8234_v49 = vld [vmem:[#allocation34_spill] sm:$0xff]  ;;  %v8235_v55 = vld [vmem:[#allocation28_spill] sm:$0xff] }
 0x516   :  { %v3174_v12 = vadd.f32 %v3173_v51, %v3092_v37 }
 0x517   :  { %v7616_v42 = vadd.f32 %v3467_v38, %v3336_v60 }
 0x51c   :  { %v3313_v43 = vpop.f32.mrf.mxu2  ;;  %v3469_v18 = vpop.f32.mrf.mxu3 }
 0x51d   :  { %v3337_v46 = vadd.f32 %v3313_v43, %v3174_v12  ;;  %v3095_v47 = vpop.f32.mrf.mxu0  ;;  %v3176_v36 = vpop.f32.mrf.mxu1 }
 0x51e   :  { %v3177_v6 = vadd.f32 %v3176_v36, %v3095_v47  ;;  %v8228_v36 = vld [vmem:[#allocation19_spill] sm:$0xff] }
 0x51f   :  { %v7618_v14 = vadd.f32 %v3469_v18, %v3337_v46 }
 0x520   :  { %4931 = vmatmul.msk.bf16.gmra.mxu0 %vm1683_vm9, %v8215_v28  ;;  %4945 = vmatmul.msk.bf16.gmra.mxu1 %vm1683_vm9, %v8218_v34  ;;  %v8233_v34 = vpack.c.bf16 %v8231_v7, %v8232_v63  ;;  %v8243_v63 = vld [vmem:[#allocation11_spill] sm:$0xff] }
 0x521   :  { %4959 = vmatmul.msk.bf16.gmra.mxu2 %vm1683_vm9, %v8219_v22  ;;  %4973 = vmatmul.msk.bf16.gmra.mxu3 %vm1683_vm9, %v8221_v25 }
 0x524   :  { %v3316_v30 = vpop.f32.mrf.mxu2  ;;  %v3472_v31 = vpop.f32.mrf.mxu3 }
 0x525   :  { %v3338_v0 = vadd.f32 %v3316_v30, %v3177_v6  ;;  %v3097_v52 = vpop.f32.mrf.mxu0  ;;  %v3178_v4 = vpop.f32.mrf.mxu1  ;;  %v8229_v6 = vld [vmem:[#allocation12_spill] sm:$0xff] }
 0x526   :  { %v3179_v13 = vadd.f32 %v3178_v4, %v3097_v52  ;;  %v8230_v28 = vpack.c.bf16 %v8228_v36, %v8229_v6 }
 0x527   :  { %v7636_v44 = vadd.f32 %v3472_v31, %v3338_v0 }
 0x52c   :  { %v3318_v11 = vpop.f32.mrf.mxu2  ;;  %v3474_v24 = vpop.f32.mrf.mxu3 }
 0x52d   :  { %v3339_v45 = vadd.f32 %v3318_v11, %v3179_v13  ;;  %v3100_v56 = vpop.f32.mrf.mxu0  ;;  %v3181_v29 = vpop.f32.mrf.mxu1 }
 0x52e   :  { %v3182_v32 = vadd.f32 %v3181_v29, %v3100_v56 }
 0x52f   :  { %v7638_v61 = vadd.f32 %v3474_v24, %v3339_v45 }
 0x530   :  { %4932 = vmatmul.msk.bf16.gmra.mxu0 %vm1683_vm9, %v3553_v33  ;;  %4946 = vmatmul.msk.bf16.gmra.mxu1 %vm1683_vm9, %v8224_v1  ;;  %v8236_v1 = vpack.c.bf16 %v8234_v49, %v8235_v55 }
 0x531   :  { %4960 = vmatmul.msk.bf16.gmra.mxu2 %vm1683_vm9, %v3817_v17  ;;  %4974 = vmatmul.msk.bf16.gmra.mxu3 %vm1683_vm9, %v3973_v5  ;;  %v8226_v5 = vld [vmem:[#allocation15_spill] sm:$0xff] }
 0x532   :  { %v8227_v47 = vpack.c.bf16 %v8225_v50, %v8226_v5 }
 0x534   :  { %v3321_v38 = vpop.f32.mrf.mxu2  ;;  %v3477_v60 = vpop.f32.mrf.mxu3 }
 0x535   :  { %v3340_v20 = vadd.f32 %v3321_v38, %v3182_v32  ;;  %v3102_v8 = vpop.f32.mrf.mxu0  ;;  %v3183_v33 = vpop.f32.mrf.mxu1  ;;  %v8237_v38 = vld [vmem:[#allocation37_spill] sm:$0xff] }
 0x536   :  { %v3184_v37 = vadd.f32 %v3183_v33, %v3102_v8  ;;  %v8241_v8 = vld [vmem:[#allocation27_spill] sm:$0xff] }
 0x537   :  { %v7656_v51 = vadd.f32 %v3477_v60, %v3340_v20  ;;  %v8240_v20 = vld [vmem:[#allocation36_spill] sm:$0xff] }
 0x538   :  { %v8242_v33 = vpack.c.bf16 %v8240_v20, %v8241_v8  ;;  %v8252_v8 = vld [vmem:[#allocation31_spill] sm:$0xff] }
 0x53c   :  { %v3323_v12 = vpop.f32.mrf.mxu2  ;;  %v3479_v43 = vpop.f32.mrf.mxu3 }
 0x53d   :  { %v3341_v18 = vadd.f32 %v3323_v12, %v3184_v37  ;;  %v3598_v46 = vpop.f32.mrf.mxu0  ;;  %v3706_v3 = vpop.f32.mrf.mxu1 }
 0x53e   :  { %v3638_v23 = vadd.f32 %v3598_v46, %v7514_v54 }
 0x53f   :  { %v7659_v17 = vadd.f32 %v3479_v43, %v3341_v18 }
 0x540   :  { %v3746_v59 = vadd.f32 %v3706_v3, %v3638_v23  ;;  %4981 = vmatmul.msk.bf16.vlgmr.msrb.gmra.mxu0 %vm1683_vm9, %v8227_v47  ;;  %4995 = vmatmul.msk.bf16.vlgmr.msrb.gmra.mxu1 %vm1683_vm9, %v8230_v28 }
 0x541   :  { %5009 = vmatmul.msk.bf16.vlgmr.msrb.gmra.mxu2 %vm1683_vm9, %v8233_v34  ;;  %v8244_v34 = vld [vmem:[#allocation10_spill] sm:$0xff] }
 0x544   :  { %v3862_v22 = vpop.f32.mrf.mxu2  ;;  %v4018_v54 = vpop.f32.mrf.mxu3 }
 0x545   :  { %v3902_v39 = vadd.f32 %v3862_v22, %v3746_v59  ;;  %v3600_v25 = vpop.f32.mrf.mxu0  ;;  %v3708_v30 = vpop.f32.mrf.mxu1  ;;  %v8245_v22 = vpack.c.bf16 %v8243_v63, %v8244_v34 }
 0x546   :  { %v3639_v31 = vadd.f32 %v3600_v25, %v7516_v62  ;;  %v8238_v62 = vld [vmem:[#allocation23_spill] sm:$0xff]  ;;  %v8249_v25 = vld [vmem:[#allocation17_spill] sm:$0xff] }
 0x547   :  { %v7674_v0 = vadd.f32 %v4018_v54, %v3902_v39  ;;  %v8239_v60 = vpack.c.bf16 %v8237_v38, %v8238_v62  ;;  %v8246_v54 = vld [vmem:[#allocation21_spill] sm:$0xff] }
 0x548   :  { %v3747_v52 = vadd.f32 %v3708_v30, %v3639_v31  ;;  %v8250_v30 = vld [vmem:[#allocation4_spill] sm:$0xff] }
 0x549   :  { %v8251_v31 = vpack.c.bf16 %v8249_v25, %v8250_v30  ;;  %v8262_v25 = vld [vmem:[#allocation39_spill] sm:$0xff] }
 0x54c   :  { %v3864_v4 = vpop.f32.mrf.mxu2  ;;  %v4020_v13 = vpop.f32.mrf.mxu3 }
 0x54d   :  { %v3903_v11 = vadd.f32 %v3864_v4, %v3747_v52  ;;  %v3603_v24 = vpop.f32.mrf.mxu0  ;;  %v3711_v45 = vpop.f32.mrf.mxu1 }
 0x54e   :  { %v3640_v56 = vadd.f32 %v3603_v24, %v7534_v48 }
 0x54f   :  { %v7677_v29 = vadd.f32 %v4020_v13, %v3903_v11 }
 0x550   :  { %v3748_v32 = vadd.f32 %v3711_v45, %v3640_v56  ;;  %4982 = vmatmul.msk.bf16.gmra.mxu0 %vm1683_vm9, %v8236_v1  ;;  %4996 = vmatmul.msk.bf16.gmra.mxu1 %vm1683_vm9, %v8239_v60 }
 0x551   :  { %5010 = vmatmul.msk.bf16.gmra.mxu2 %vm1683_vm9, %v8242_v33  ;;  %v8253_v33 = vld [vmem:[#allocation22_spill] sm:$0xff] }
 0x554   :  { %v3867_v37 = vpop.f32.mrf.mxu2  ;;  %v4023_v48 = vpop.f32.mrf.mxu3 }
 0x555   :  { %v3904_v12 = vadd.f32 %v3867_v37, %v3748_v32  ;;  %v3605_v43 = vpop.f32.mrf.mxu0  ;;  %v3713_v18 = vpop.f32.mrf.mxu1  ;;  %v8254_v37 = vpack.c.bf16 %v8252_v8, %v8253_v33 }
 0x556   :  { %v3641_v46 = vadd.f32 %v3605_v43, %v7536_v15  ;;  %v8247_v15 = vld [vmem:[#allocation33_spill] sm:$0xff]  ;;  %v8258_v43 = vld [vmem:[#allocation38_spill] sm:$0xff] }
 0x557   :  { %v7692_v3 = vadd.f32 %v4023_v48, %v3904_v12  ;;  %v8248_v39 = vpack.c.bf16 %v8246_v54, %v8247_v15  ;;  %v8255_v48 = vld [vmem:[#allocation30_spill] sm:$0xff] }
 0x558   :  { %v3749_v23 = vadd.f32 %v3713_v18, %v3641_v46  ;;  %v8259_v18 = vld [vmem:[#allocation29_spill] sm:$0xff] }
 0x559   :  { %v8260_v46 = vpack.c.bf16 %v8258_v43, %v8259_v18  ;;  %v8276_v43 = vld [vmem:[#allocation56_spill] sm:$0xff]  ;;  %v8277_v18 = vld [vmem:[#allocation49_spill] sm:$0xff] }
 0x55c   :  { %v3869_v59 = vpop.f32.mrf.mxu2  ;;  %v4025_v50 = vpop.f32.mrf.mxu3 }
 0x55d   :  { %v3905_v5 = vadd.f32 %v3869_v59, %v3749_v23  ;;  %v3608_v47 = vpop.f32.mrf.mxu0  ;;  %v3716_v36 = vpop.f32.mrf.mxu1 }
 0x55e   :  { %v3642_v6 = vadd.f32 %v3608_v47, %v7554_v16 }
 0x55f   :  { %v7695_v28 = vadd.f32 %v4025_v50, %v3905_v5 }
 0x560   :  { %v3750_v7 = vadd.f32 %v3716_v36, %v3642_v6  ;;  %4983 = vmatmul.msk.bf16.gmra.mxu0 %vm1683_vm9, %v8245_v22  ;;  %4997 = vmatmul.msk.bf16.gmra.mxu1 %vm1683_vm9, %v8248_v39  ;;  %v8261_v39 = vld [vmem:[#allocation46_spill] sm:$0xff] }
 0x561   :  { %5011 = vmatmul.msk.bf16.gmra.mxu2 %vm1683_vm9, %v8251_v31  ;;  %v8263_v30 = vpack.c.bf16 %v8261_v39, %v8262_v25  ;;  %v8264_v31 = vld [vmem:[#allocation47_spill] sm:$0xff]  ;;  %v8280_v39 = vld [vmem:[#allocation58_spill] sm:$0xff] }
 0x564   :  { %v3872_v52 = vpop.f32.mrf.mxu2  ;;  %v4028_v16 = vpop.f32.mrf.mxu3 }
 0x565   :  { %v3906_v4 = vadd.f32 %v3872_v52, %v3750_v7  ;;  %v3610_v13 = vpop.f32.mrf.mxu0  ;;  %v3718_v11 = vpop.f32.mrf.mxu1  ;;  %v8265_v52 = vld [vmem:[#allocation6_spill] sm:$0xff] }
 0x566   :  { %v3643_v24 = vadd.f32 %v3610_v13, %v7556_v2  ;;  %v8256_v2 = vld [vmem:[#allocation25_spill] sm:$0xff] }
 0x567   :  { %v7710_v45 = vadd.f32 %v4028_v16, %v3906_v4  ;;  %v8257_v12 = vpack.c.bf16 %v8255_v48, %v8256_v2  ;;  %v8266_v16 = vpack.c.bf16 %v8264_v31, %v8265_v52  ;;  %v8268_v4 = vld [vmem:[#allocation40_spill] sm:$0xff]  ;;  %v8271_v48 = vld [vmem:[#allocation9_spill] sm:$0xff] }
 0x568   :  { %v3751_v56 = vadd.f32 %v3718_v11, %v3643_v24  ;;  %v3491_v11 = vadd.f32 %v7596_v9, %v7598_v27  ;;  %v8273_v9 = vld [vmem:[#allocation55_spill] sm:$0xff]  ;;  %v8274_v27 = vld [vmem:[#allocation5_spill] sm:$0xff] }
 0x569   :  { %v8283_v31 = vld [vmem:[#allocation57_spill] sm:$0xff] }
 0x56c   :  { %v3874_v32 = vpop.f32.mrf.mxu2  ;;  %v4030_v49 = vpop.f32.mrf.mxu3 }
 0x56d   :  { %v3907_v55 = vadd.f32 %v3874_v32, %v3751_v56  ;;  %v3613_v1 = vpop.f32.mrf.mxu0  ;;  %v3721_v38 = vpop.f32.mrf.mxu1 }
 0x56e   :  { %v3644_v62 = vadd.f32 %v3613_v1, %v7574_v53 }
 0x56f   :  { %v7713_v60 = vadd.f32 %v4030_v49, %v3907_v55 }
 0x570   :  { %v3752_v20 = vadd.f32 %v3721_v38, %v3644_v62  ;;  %4984 = vmatmul.msk.bf16.gmra.mxu0 %vm1683_vm9, %v8254_v37  ;;  %4998 = vmatmul.msk.bf16.gmra.mxu1 %vm1683_vm9, %v8257_v12  ;;  %v8270_v37 = vld [vmem:[#allocation54_spill] sm:$0xff]  ;;  %v8275_v12 = vpack.c.bf16 %v8273_v9, %v8274_v27 }
 0x571   :  { %5012 = vmatmul.msk.bf16.gmra.mxu2 %vm1683_vm9, %v8260_v46  ;;  %v8272_v2 = vpack.c.bf16 %v8270_v37, %v8271_v48  ;;  %v8278_v46 = vpack.c.bf16 %v8276_v43, %v8277_v18 }
 0x574   :  { %v3877_v23 = vpop.f32.mrf.mxu2  ;;  %v4033_v5 = vpop.f32.mrf.mxu3 }
 0x575   :  { %v3908_v53 = vadd.f32 %v3877_v23, %v3752_v20  ;;  %v3615_v59 = vpop.f32.mrf.mxu0  ;;  %v3723_v50 = vpop.f32.mrf.mxu1 }
 0x576   :  { %v3645_v47 = vadd.f32 %v3615_v59, %v7576_v40  ;;  %v8267_v40 = vld [vmem:[#allocation48_spill] sm:$0xff] }
 0x577   :  { %v7728_v36 = vadd.f32 %v4033_v5, %v3908_v53  ;;  %v8269_v13 = vpack.c.bf16 %v8267_v40, %v8268_v4 }
 0x578   :  { %v3753_v6 = vadd.f32 %v3723_v50, %v3645_v47 }
 0x57c   :  { %v3879_v7 = vpop.f32.mrf.mxu2 }
 0x57d   :  { %v7730_v63 = vadd.f32 %v3879_v7, %v3753_v6  ;;  %v3618_v34 = vpop.f32.mrf.mxu0  ;;  %v3726_v22 = vpop.f32.mrf.mxu1 }
 0x57e   :  { %v3646_v54 = vadd.f32 %v3618_v34, %v7594_v57 }
 0x580   :  { %v3754_v15 = vadd.f32 %v3726_v22, %v3646_v54  ;;  %4985 = vmatmul.msk.bf16.gmra.mxu0 %vm1683_vm9, %v8263_v30  ;;  %4999 = vmatmul.msk.bf16.gmra.mxu1 %vm1683_vm9, %v8266_v16  ;;  %v8282_v30 = vld [vmem:[#allocation63_spill] sm:$0xff] }
 0x581   :  { %5013 = vmatmul.msk.bf16.gmra.mxu2 %vm1683_vm9, %v8269_v13  ;;  %v8284_v52 = vpack.c.bf16 %v8282_v30, %v8283_v31  ;;  %v8286_v16 = vld [vmem:[#allocation59_spill] sm:$0xff] }
 0x584   :  { %v3882_v57 = vpop.f32.mrf.mxu2 }
 0x585   :  { %v7747_v24 = vadd.f32 %v3882_v57, %v3754_v15  ;;  %v3620_v56 = vpop.f32.mrf.mxu0  ;;  %v3728_v32 = vpop.f32.mrf.mxu1  ;;  %v8279_v15 = vld [vmem:[#allocation62_spill] sm:$0xff] }
 0x586   :  { %v3647_v49 = vadd.f32 %v3620_v56, %v3491_v11  ;;  %v8281_v25 = vpack.c.bf16 %v8279_v15, %v8280_v39 }
 0x588   :  { %v3755_v55 = vadd.f32 %v3728_v32, %v3647_v49 }
 0x58c   :  { %v3884_v1 = vpop.f32.mrf.mxu2 }
 0x58d   :  { %v7749_v38 = vadd.f32 %v3884_v1, %v3755_v55  ;;  %v3623_v62 = vpop.f32.mrf.mxu0  ;;  %v3731_v20 = vpop.f32.mrf.mxu1 }
 0x58e   :  { %v3648_v8 = vadd.f32 %v3623_v62, %v7616_v42 }
 0x590   :  { %v3756_v33 = vadd.f32 %v3731_v20, %v3648_v8  ;;  %4986 = vmatmul.msk.bf16.gmra.mxu0 %vm1683_vm9, %v8272_v2  ;;  %5000 = vmatmul.msk.bf16.gmra.mxu1 %vm1683_vm9, %v8275_v12  ;;  %v8288_v8 = vpack.c.bf16 %v7489_v41, %v7446_v10 }
 0x591   :  { %5014 = vmatmul.msk.bf16.gmra.mxu2 %vm1683_vm9, %v8278_v46 }
 0x594   :  { %v3887_v23 = vpop.f32.mrf.mxu2 }
 0x595   :  { %v7764_v53 = vadd.f32 %v3887_v23, %v3756_v33  ;;  %v3625_v42 = vpop.f32.mrf.mxu0  ;;  %v3733_v59 = vpop.f32.mrf.mxu1 }
 0x596   :  { %v3649_v50 = vadd.f32 %v3625_v42, %v7618_v14  ;;  %v8285_v14 = vld [vmem:[#allocation64_spill] sm:$0xff] }
 0x597   :  { %v8287_v40 = vpack.c.bf16 %v8285_v14, %v8286_v16 }
 0x598   :  { %v3757_v5 = vadd.f32 %v3733_v59, %v3649_v50 }
 0x59c   :  { %v3889_v47 = vpop.f32.mrf.mxu2 }
 0x59d   :  { %v7767_v6 = vadd.f32 %v3889_v47, %v3757_v5  ;;  %v3628_v7 = vpop.f32.mrf.mxu0  ;;  %v3736_v34 = vpop.f32.mrf.mxu1 }
 0x59e   :  { %v3650_v22 = vadd.f32 %v3628_v7, %v7636_v44 }
 0x5a0   :  { %v3758_v54 = vadd.f32 %v3736_v34, %v3650_v22  ;;  %4987 = vmatmul.msk.bf16.gmra.mxu0 %vm1683_vm9, %v8281_v25  ;;  %5001 = vmatmul.msk.bf16.gmra.mxu1 %vm1683_vm9, %v8284_v52 }
 0x5a1   :  { %5015 = vmatmul.msk.bf16.gmra.mxu2 %vm1683_vm9, %v8287_v40 }
 0x5a4   :  { %v3892_v4 = vpop.f32.mrf.mxu2 }
 0x5a5   :  { %v7782_v13 = vadd.f32 %v3892_v4, %v3758_v54  ;;  %v3630_v44 = vpop.f32.mrf.mxu0  ;;  %v3738_v11 = vpop.f32.mrf.mxu1 }
 0x5a6   :  { %v3651_v57 = vadd.f32 %v3630_v44, %v7638_v61  ;;  %v8289_v61 = vpack.c.bf16 %v7492_v58, %v7452_v26  ;;  %v5019_v26 = vld [vmem:[%s7880_s8] sm:$0xf]  ;;  %v5044_v58 = vld [vmem:[%s7880_s8] sm:$0x10] }
 0x5a7   :  { %v5020_v46 = vor.u32 %v5044_v58, %v5019_v26 }
 0x5a8   :  { %v3759_v56 = vadd.f32 %v3738_v11, %v3651_v57 }
 0x5a9   :  { %v4609_v42 = vsel %vm1240_vm8, %v5020_v46, 0 }
 0x5aa   :  { %4618 = vmatpush.bf16.msra.mxu3 %v4609_v42 }
 0x5ac   :  { %v3894_v32 = vpop.f32.mrf.mxu2 }
 0x5ad   :  { %v7785_v49 = vadd.f32 %v3894_v32, %v3759_v56  ;;  %v3633_v55 = vpop.f32.mrf.mxu0  ;;  %v3741_v1 = vpop.f32.mrf.mxu1 }
 0x5ae   :  { %v3652_v62 = vadd.f32 %v3633_v55, %v7656_v51 }
 0x5b0   :  { %v3760_v20 = vadd.f32 %v3741_v1, %v3652_v62  ;;  %4988 = vmatmul.msk.bf16.gmra.mxu0 %vm1683_vm9, %v4097_v21  ;;  %5002 = vmatmul.msk.bf16.gmra.mxu1 %vm1683_vm9, %v8288_v8 }
 0x5b1   :  { %5016 = vmatmul.msk.bf16.gmra.mxu2 %vm1683_vm9, %v8289_v61 }
 0x5b4   :  { %v3897_v33 = vpop.f32.mrf.mxu2 }
 0x5b5   :  { %v7800_v37 = vadd.f32 %v3897_v33, %v3760_v20  ;;  %v3635_v51 = vpop.f32.mrf.mxu0  ;;  %v3743_v48 = vpop.f32.mrf.mxu1 }
 0x5b6   :  { %v3653_v2 = vadd.f32 %v3635_v51, %v7659_v17 }
 0x5b8   :  { %v3761_v19 = vadd.f32 %v3743_v48, %v3653_v2  ;;  %v4035_v2 = vpop.f32.mrf.mxu3 }
 0x5bc   :  { %v3899_v35 = vpop.f32.mrf.mxu2 }
 0x5bd   :  { %v7803_v21 = vadd.f32 %v3899_v35, %v3761_v19  ;;  %v4142_v9 = vpop.f32.mrf.mxu0  ;;  %v4266_v10 = vpop.f32.mrf.mxu1 }
 0x5be   :  { %v4182_v41 = vadd.f32 %v4142_v9, %v7674_v0  ;;  %v7816_v0 = vld [vmem:[%s7879_s7] ss:$0 sm:$0xff] }
 0x5c0   :  { %v4306_v27 = vadd.f32 %v4266_v10, %v4182_v41 }
 0x5c4   :  { %v4390_v12 = vpop.f32.mrf.mxu2 }
 0x5c5   :  { %v4430_v43 = vadd.f32 %v4390_v12, %v4306_v27  ;;  %v4144_v17 = vpop.f32.mrf.mxu0  ;;  %v4268_v18 = vpop.f32.mrf.mxu1 }
 0x5c6   :  { %v4183_v23 = vadd.f32 %v4144_v17, %v7677_v29 }
 0x5c7   :  { %v4450_v50 = vadd.f32 %v7816_v0, %v4430_v43 }
 0x5c8   :  { %v4307_v59 = vadd.f32 %v4268_v18, %v4183_v23 }
 0x5c9   :  { %v4466_v54 = vmax.f32 %v4450_v50, 0.0 }
 0x5cb   :  { %v4483_v25 = vsel %vm4482_vm10, %v4466_v54, -inf }
 0x5cc   :  { %v4392_v5 = vpop.f32.mrf.mxu2 }
 0x5cd   :  { %v4431_v47 = vadd.f32 %v4392_v5, %v4307_v59  ;;  %v4147_v7 = vpop.f32.mrf.mxu0  ;;  %v4271_v34 = vpop.f32.mrf.mxu1 }
 0x5ce   :  { %v4184_v22 = vadd.f32 %v4147_v7, %v7692_v3 }
 0x5cf   :  { %v4451_v29 = vadd.f32 %v7816_v0, %v4431_v47  ;;  %v4038_v47 = vpop.f32.mrf.mxu3 }
 0x5d0   :  { %v4308_v15 = vadd.f32 %v4271_v34, %v4184_v22 }
 0x5d1   :  { %v4467_v39 = vmax.f32 %v4451_v29, 0.0 }
 0x5d3   :  { %v4484_v30 = vsel %vm4482_vm10, %v4467_v39, -inf }
 0x5d4   :  { %v4485_v31 = vmax.f32 %v4483_v25, %v4484_v30  ;;  %v4395_v52 = vpop.f32.mrf.mxu2 }
 0x5d5   :  { %v4432_v14 = vadd.f32 %v4395_v52, %v4308_v15  ;;  %v4149_v16 = vpop.f32.mrf.mxu0  ;;  %v4273_v40 = vpop.f32.mrf.mxu1 }
 0x5d6   :  { %v4185_v4 = vadd.f32 %v4149_v16, %v7695_v28  ;;  %v4486_v44 = vrot.slane %v4485_v31, 4 }
 0x5d7   :  { %v4452_v3 = vadd.f32 %v7816_v0, %v4432_v14 }
 0x5d8   :  { %v4309_v11 = vadd.f32 %v4273_v40, %v4185_v4  ;;  %v4487_v57 = vmax.f32 %v4485_v31, %v4486_v44  ;;  %v4065_v4 = vadd.f32 %v4035_v2, %v7730_v63  ;;  %v4066_v63 = vadd.f32 %v4038_v47, %v7747_v24 }
 0x5d9   :  { %v4468_v20 = vmax.f32 %v4452_v3, 0.0 }
 0x5da   :  { %v4488_v61 = vrot.slane %v4487_v57, 2 }
 0x5db   :  { %v4492_v48 = vsel %vm4482_vm10, %v4468_v20, -inf }
 0x5dc   :  { %v4397_v56 = vpop.f32.mrf.mxu2  ;;  %v4489_v19 = vmax.f32 %v4487_v57, %v4488_v61 }
 0x5dd   :  { %v4433_v32 = vadd.f32 %v4397_v56, %v4309_v11  ;;  %v4152_v55 = vpop.f32.mrf.mxu0  ;;  %v4276_v1 = vpop.f32.mrf.mxu1 }
 0x5de   :  { %v4186_v62 = vadd.f32 %v4152_v55, %v7710_v45  ;;  %v4490_v26 = vrot.slane %v4489_v19, 1 }
 0x5df   :  { %v4453_v8 = vadd.f32 %v7816_v0, %v4433_v32  ;;  %v4040_v32 = vpop.f32.mrf.mxu3 }
 0x5e0   :  { %v4310_v33 = vadd.f32 %v4276_v1, %v4186_v62  ;;  %v4491_v46 = vmax.f32 %v4489_v19, %v4490_v26 }
 0x5e1   :  { %v4469_v51 = vmax.f32 %v4453_v8, 0.0 }
 0x5e3   :  { %v4493_v28 = vsel %vm4482_vm10, %v4469_v51, -inf }
 0x5e4   :  { %v4494_v35 = vmax.f32 %v4492_v48, %v4493_v28  ;;  %v4400_v9 = vpop.f32.mrf.mxu2 }
 0x5e5   :  { %v4434_v10 = vadd.f32 %v4400_v9, %v4310_v33  ;;  %v4154_v41 = vpop.f32.mrf.mxu0  ;;  %v4278_v27 = vpop.f32.mrf.mxu1 }
 0x5e6   :  { %v4495_v12 = vrot.slane %v4494_v35, 4  ;;  %v4187_v45 = vadd.f32 %v4154_v41, %v7713_v60  ;;  %v4555_v60 = vpack.c.bf16 %v4491_v46, %v4491_v46 }
 0x5e7   :  { %v4454_v18 = vadd.f32 %v7816_v0, %v4434_v10  ;;  %v4043_v41 = vpop.f32.mrf.mxu3 }
 0x5e8   :  { %v4496_v58 = vmax.f32 %v4494_v35, %v4495_v12  ;;  %v4311_v43 = vadd.f32 %v4278_v27, %v4187_v45  ;;  %v4577_v52 = vunpack.c.l.b16 %v4555_v60 }
 0x5e9   :  { %v4470_v22 = vmax.f32 %v4454_v18, 0.0 }
 0x5ea   :  { %v4497_v17 = vrot.slane %v4496_v58, 2 }
 0x5eb   :  { %v4501_v30 = vsel %vm4482_vm10, %v4470_v22, -inf }
 0x5ec   :  { %v4498_v23 = vmax.f32 %v4496_v58, %v4497_v17  ;;  %v4402_v42 = vpop.f32.mrf.mxu2  ;;  %v4067_v17 = vadd.f32 %v4040_v32, %v7749_v38  ;;  %v4068_v38 = vadd.f32 %v4043_v41, %v7764_v53 }
 0x5ed   :  { %v4435_v59 = vadd.f32 %v4402_v42, %v4311_v43  ;;  %v4157_v50 = vpop.f32.mrf.mxu0  ;;  %v4281_v5 = vpop.f32.mrf.mxu1 }
 0x5ee   :  { %v4499_v7 = vrot.slane %v4498_v23, 1  ;;  %v4188_v34 = vadd.f32 %v4157_v50, %v7728_v36 }
 0x5ef   :  { %v4455_v54 = vadd.f32 %v7816_v0, %v4435_v59  ;;  %v4045_v22 = vpop.f32.mrf.mxu3 }
 0x5f0   :  { %v4500_v29 = vmax.f32 %v4498_v23, %v4499_v7  ;;  %v4312_v15 = vadd.f32 %v4281_v5, %v4188_v34 }
 0x5f1   :  { %v4471_v39 = vmax.f32 %v4455_v54, 0.0 }
 0x5f2   :  { %v4556_v25 = vpack.c.bf16 %v4500_v29, %v4500_v29 }
 0x5f3   :  { %v4502_v31 = vsel %vm4482_vm10, %v4471_v39, -inf }
 0x5f4   :  { %v4578_v14 = vunpack.c.l.b16 %v4556_v25  ;;  %v4503_v16 = vmax.f32 %v4501_v30, %v4502_v31  ;;  %v4405_v40 = vpop.f32.mrf.mxu2 }
 0x5f5   :  { %v4436_v36 = vadd.f32 %v4405_v40, %v4312_v15  ;;  %v4159_v44 = vpop.f32.mrf.mxu0  ;;  %v4283_v11 = vpop.f32.mrf.mxu1 }
 0x5f6   :  { %v4586_v3 = vsel %vm4585_vm11, %v4578_v14, %v4577_v52  ;;  %v4504_v57 = vrot.slane %v4503_v16, 4  ;;  %v4189_v56 = vadd.f32 %v4159_v44, %v4065_v4 }
 0x5f7   :  { %v4456_v62 = vadd.f32 %v7816_v0, %v4436_v36 }
 0x5f8   :  { %v4505_v55 = vmax.f32 %v4503_v16, %v4504_v57  ;;  %v4313_v20 = vadd.f32 %v4283_v11, %v4189_v56  ;;  %v4069_v57 = vadd.f32 %v4045_v22, %v7767_v6 }
 0x5f9   :  { %v4472_v2 = vmax.f32 %v4456_v62, 0.0 }
 0x5fa   :  { %v4506_v1 = vrot.slane %v4505_v55, 2 }
 0x5fb   :  { %v4510_v12 = vsel %vm4482_vm10, %v4472_v2, -inf }
 0x5fc   :  { %v4507_v8 = vmax.f32 %v4505_v55, %v4506_v1  ;;  %v4407_v61 = vpop.f32.mrf.mxu2  ;;  %v4048_v55 = vpop.f32.mrf.mxu3 }
 0x5fd   :  { %v4437_v33 = vadd.f32 %v4407_v61, %v4313_v20  ;;  %v4162_v51 = vpop.f32.mrf.mxu0  ;;  %v4286_v48 = vpop.f32.mrf.mxu1  ;;  %v4070_v6 = vadd.f32 %v4048_v55, %v7782_v13 }
 0x5fe   :  { %v4508_v28 = vrot.slane %v4507_v8, 1  ;;  %v4190_v10 = vadd.f32 %v4162_v51, %v4066_v63 }
 0x5ff   :  { %v4457_v19 = vadd.f32 %v7816_v0, %v4437_v33 }
 0x600   :  { %v4509_v35 = vmax.f32 %v4507_v8, %v4508_v28  ;;  %v4314_v18 = vadd.f32 %v4286_v48, %v4190_v10 }
 0x601   :  { %v4473_v9 = vmax.f32 %v4457_v19, 0.0 }
 0x602   :  { %v4557_v27 = vpack.c.bf16 %v4509_v35, %v4509_v35 }
 0x603   :  { %v4511_v45 = vsel %vm4482_vm10, %v4473_v9, -inf }
 0x604   :  { %v4579_v26 = vunpack.c.l.b16 %v4557_v27  ;;  %v4512_v58 = vmax.f32 %v4510_v12, %v4511_v45  ;;  %v4410_v43 = vpop.f32.mrf.mxu2  ;;  %v4050_v27 = vpop.f32.mrf.mxu3 }
 0x605   :  { %v4164_v24 = vpop.f32.mrf.mxu0  ;;  %v4288_v46 = vpop.f32.mrf.mxu1  ;;  %v4438_v59 = vadd.f32 %v4410_v43, %v4314_v18 }
 0x606   :  { %v4588_v23 = vsel %vm4587_vm12, %v4579_v26, %v4586_v3  ;;  %v4513_v42 = vrot.slane %v4512_v58, 4  ;;  %v4191_v50 = vadd.f32 %v4164_v24, %v4067_v17 }
 0x607   :  { %v4458_v7 = vadd.f32 %v7816_v0, %v4438_v59 }
 0x608   :  { %v4514_v5 = vmax.f32 %v4512_v58, %v4513_v42  ;;  %v4315_v34 = vadd.f32 %v4288_v46, %v4191_v50 }
 0x609   :  { %v4474_v30 = vmax.f32 %v4458_v7, 0.0 }
 0x60a   :  { %v4515_v47 = vrot.slane %v4514_v5, 2 }
 0x60b   :  { %v4519_v4 = vsel %vm4482_vm10, %v4474_v30, -inf }
 0x60c   :  { %v4516_v54 = vmax.f32 %v4514_v5, %v4515_v47  ;;  %v4412_v60 = vpop.f32.mrf.mxu2  ;;  %v4053_v22 = vpop.f32.mrf.mxu3 }
 0x60d   :  { %v4439_v29 = vadd.f32 %v4412_v60, %v4315_v34  ;;  %v4167_v15 = vpop.f32.mrf.mxu0  ;;  %v4291_v39 = vpop.f32.mrf.mxu1 }
 0x60e   :  { %v4517_v25 = vrot.slane %v4516_v54, 1  ;;  %v4192_v16 = vadd.f32 %v4167_v15, %v4068_v38 }
 0x60f   :  { %v4459_v31 = vadd.f32 %v7816_v0, %v4439_v29 }
 0x610   :  { %v4518_v52 = vmax.f32 %v4516_v54, %v4517_v25  ;;  %v4316_v56 = vadd.f32 %v4291_v39, %v4192_v16 }
 0x611   :  { %v4475_v14 = vmax.f32 %v4459_v31, 0.0 }
 0x612   :  { %v4558_v40 = vpack.c.bf16 %v4518_v52, %v4518_v52 }
 0x613   :  { %v4520_v36 = vsel %vm4482_vm10, %v4475_v14, -inf }
 0x614   :  { %v4580_v44 = vunpack.c.l.b16 %v4558_v40  ;;  %v4521_v11 = vmax.f32 %v4519_v4, %v4520_v36  ;;  %v4415_v3 = vpop.f32.mrf.mxu2 }
 0x615   :  { %v4169_v32 = vpop.f32.mrf.mxu0  ;;  %v4293_v53 = vpop.f32.mrf.mxu1  ;;  %v4440_v20 = vadd.f32 %v4415_v3, %v4316_v56 }
 0x616   :  { %v4590_v1 = vsel %vm4589_vm13, %v4580_v44, %v4588_v23  ;;  %v4522_v62 = vrot.slane %v4521_v11, 4  ;;  %v4193_v8 = vadd.f32 %v4169_v32, %v4069_v57  ;;  %v4071_v23 = vadd.f32 %v4050_v27, %v7785_v49  ;;  %v4055_v3 = vpop.f32.mrf.mxu3 }
 0x617   :  { %v4460_v51 = vadd.f32 %v7816_v0, %v4440_v20  ;;  %v4072_v49 = vadd.f32 %v4053_v22, %v7800_v37 }
 0x618   :  { %v4523_v61 = vmax.f32 %v4521_v11, %v4522_v62  ;;  %v4317_v48 = vadd.f32 %v4293_v53, %v4193_v8  ;;  %v4073_v53 = vadd.f32 %v4055_v3, %v7803_v21 }
 0x619   :  { %v4476_v10 = vmax.f32 %v4460_v51, 0.0 }
 0x61a   :  { %v4524_v33 = vrot.slane %v4523_v61, 2 }
 0x61b   :  { %v4528_v43 = vsel %vm4482_vm10, %v4476_v10, -inf }
 0x61c   :  { %v4525_v28 = vmax.f32 %v4523_v61, %v4524_v33  ;;  %v4417_v63 = vpop.f32.mrf.mxu2 }
 0x61d   :  { %v4441_v2 = vadd.f32 %v4417_v63, %v4317_v48  ;;  %v4172_v19 = vpop.f32.mrf.mxu0  ;;  %v4296_v35 = vpop.f32.mrf.mxu1 }
 0x61e   :  { %v4526_v9 = vrot.slane %v4525_v28, 1  ;;  %v4194_v26 = vadd.f32 %v4172_v19, %v4070_v6 }
 0x61f   :  { %v4461_v41 = vadd.f32 %v7816_v0, %v4441_v2 }
 0x620   :  { %v4527_v12 = vmax.f32 %v4525_v28, %v4526_v9  ;;  %v4318_v42 = vadd.f32 %v4296_v35, %v4194_v26 }
 0x621   :  { %v4477_v45 = vmax.f32 %v4461_v41, 0.0 }
 0x622   :  { %v4559_v58 = vpack.c.bf16 %v4527_v12, %v4527_v12 }
 0x623   :  { %v4529_v17 = vsel %vm4482_vm10, %v4477_v45, -inf }
 0x624   :  { %v4581_v18 = vunpack.c.l.b16 %v4559_v58  ;;  %v4530_v24 = vmax.f32 %v4528_v43, %v4529_v17  ;;  %v4420_v46 = vpop.f32.mrf.mxu2 }
 0x625   :  { %v4174_v13 = vpop.f32.mrf.mxu0  ;;  %v4298_v5 = vpop.f32.mrf.mxu1  ;;  %v4442_v47 = vadd.f32 %v4420_v46, %v4318_v42 }
 0x626   :  { %v4592_v59 = vsel %vm4591_vm14, %v4581_v18, %v4590_v1  ;;  %v4531_v50 = vrot.slane %v4530_v24, 4  ;;  %v4195_v7 = vadd.f32 %v4174_v13, %v4071_v23 }
 0x627   :  { %v4462_v60 = vadd.f32 %v7816_v0, %v4442_v47 }
 0x628   :  { %v4532_v34 = vmax.f32 %v4530_v24, %v4531_v50  ;;  %v4319_v29 = vadd.f32 %v4298_v5, %v4195_v7  ;;  %v5056_v50 = vld [vmem:[%s7881_s9] ss:$0 sm:$0xff] }
 0x629   :  { %v4478_v31 = vmax.f32 %v4462_v60, 0.0 }
 0x62a   :  { %v4533_v54 = vrot.slane %v4532_v34, 2 }
 0x62b   :  { %v4537_v44 = vsel %vm4482_vm10, %v4478_v31, -inf }
 0x62c   :  { %v4534_v15 = vmax.f32 %v4532_v34, %v4533_v54  ;;  %v4422_v39 = vpop.f32.mrf.mxu2 }
 0x62d   :  { %v4443_v25 = vadd.f32 %v4422_v39, %v4319_v29  ;;  %v4177_v38 = vpop.f32.mrf.mxu0  ;;  %v4301_v16 = vpop.f32.mrf.mxu1 }
 0x62e   :  { %v4535_v30 = vrot.slane %v4534_v15, 1  ;;  %v4196_v4 = vadd.f32 %v4177_v38, %v4072_v49 }
 0x62f   :  { %v4463_v52 = vadd.f32 %v7816_v0, %v4443_v25 }
 0x630   :  { %v4536_v14 = vmax.f32 %v4534_v15, %v4535_v30  ;;  %v4320_v37 = vadd.f32 %v4301_v16, %v4196_v4 }
 0x631   :  { %v4479_v40 = vmax.f32 %v4463_v52, 0.0 }
 0x632   :  { %v4560_v36 = vpack.c.bf16 %v4536_v14, %v4536_v14 }
 0x633   :  { %v4538_v11 = vsel %vm4482_vm10, %v4479_v40, -inf }
 0x634   :  { %v4582_v57 = vunpack.c.l.b16 %v4560_v36  ;;  %v4539_v56 = vmax.f32 %v4537_v44, %v4538_v11  ;;  %v4425_v32 = vpop.f32.mrf.mxu2 }
 0x635   :  { %v4179_v55 = vpop.f32.mrf.mxu0  ;;  %v4444_v20 = vadd.f32 %v4425_v32, %v4320_v37  ;;  %v4303_v51 = vpop.f32.mrf.mxu1 }
 0x636   :  { %v4594_v1 = vsel %vm4593_vm15, %v4582_v57, %v4592_v59  ;;  %v4540_v62 = vrot.slane %v4539_v56, 4  ;;  %v4197_v8 = vadd.f32 %v4179_v55, %v4073_v53 }
 0x637   :  { %v4464_v48 = vadd.f32 %v7816_v0, %v4444_v20 }
 0x638   :  { %v4541_v61 = vmax.f32 %v4539_v56, %v4540_v62  ;;  %v4321_v28 = vadd.f32 %v4303_v51, %v4197_v8 }
 0x639   :  { %v4480_v9 = vmax.f32 %v4464_v48, 0.0 }
 0x63a   :  { %v4542_v33 = vrot.slane %v4541_v61, 2 }
 0x63b   :  { %v4546_v27 = vsel %vm4482_vm10, %v4480_v9, -inf }
 0x63c   :  { %v4543_v63 = vmax.f32 %v4541_v61, %v4542_v33  ;;  %v4427_v2 = vpop.f32.mrf.mxu2 }
 0x63d   :  { %v4445_v19 = vadd.f32 %v4427_v2, %v4321_v28 }
 0x63e   :  { %v4544_v35 = vrot.slane %v4543_v63, 1 }
 0x63f   :  { %v4465_v6 = vadd.f32 %v7816_v0, %v4445_v19 }
 0x640   :  { %v4545_v21 = vmax.f32 %v4543_v63, %v4544_v35 }
 0x641   :  { %v4481_v10 = vmax.f32 %v4465_v6, 0.0 }
 0x642   :  { %v4561_v41 = vpack.c.bf16 %v4545_v21, %v4545_v21 }
 0x643   :  { %v4547_v12 = vsel %vm4482_vm10, %v4481_v10, -inf }
 0x644   :  { %v4583_v45 = vunpack.c.l.b16 %v4561_v41  ;;  %v4548_v26 = vmax.f32 %v4546_v27, %v4547_v12 }
 0x646   :  { %v4596_v58 = vsel %vm4595_vm0, %v4583_v45, %v4594_v1  ;;  %v4549_v43 = vrot.slane %v4548_v26, 4 }
 0x648   :  { %v4550_v17 = vmax.f32 %v4548_v26, %v4549_v43 }
 0x64a   :  { %v4551_v18 = vrot.slane %v4550_v17, 2 }
 0x64c   :  { %v4552_v24 = vmax.f32 %v4550_v17, %v4551_v18 }
 0x64e   :  { %v4553_v46 = vrot.slane %v4552_v24, 1 }
 0x650   :  { %v4554_v23 = vmax.f32 %v4552_v24, %v4553_v46 }
 0x652   :  { %v4562_v42 = vpack.c.bf16 %v4554_v23, %v4554_v23 }
 0x654   :  { %v4584_v0 = vunpack.c.l.b16 %v4562_v42 }
 0x656   :  { %v4598_v13 = vsel %vm4597_vm1, %v4584_v0, %v4596_v58 }
 0x657   :  { %v4599_v59 = vpack.c.b16 %v4598_v13, %v4598_v13 }
 0x659   :  { %5021 = vmatmul.msk.bf16.vlgmr.msra.gmra.mxu3 %vm4482_vm10, %v4599_v59 }
 0x6dc   :  { %v4620_v5 = vpop.f32.mrf.mxu3 }
 0x6dd   :  { %v4621_v47 = vadd.f32 %v5056_v50, %v4620_v5 }
 0x6df   :  { %4624 = vst [vmem:[%s7882_s10] sm:$0xff] %v4621_v47 }
 0x6e4   :  { %v4622_v7 = vpop.f32.mrf.mxu3 }

</bundles_post_ra>
